<compile_context>
chip_gen: v6e
topology: v6e:2x2x1
jax: 0.10.0
libtpu: 0.0.40
codegen_flags: <defaults>
</compile_context>

<pallas_src>
import functools

import jax
import jax.numpy as jnp
from jax.experimental import pallas as pl
from jax.experimental.pallas import tpu as pltpu


# ----------------------------- helpers ---------------------------------------
def _round_up(v, m):
    return (v + m - 1) // m * m


def _elu(v):
    # ELU(alpha=1): v if v > 0 else exp(v) - 1  (exp arg clamped to avoid inf)
    return jnp.where(v > 0, v, jnp.exp(jnp.minimum(v, 0.0)) - 1.0)


# ----------------------------- kernel body ------------------------------------
def dragonnet_kernel(x_ref, w1_ref, w2_ref, w3_ref, w4_ref,
                     b1_ref, b2_ref, b3_ref, b4_ref, out_ref):
    """Fully fused DragonNet forward for one batch tile.

    x_ref  : (tile, xdim)      bf16, NOT lane-padded (full last dim)
    w1_ref : (xdim, hs)        trunk_l1
    w2_ref : (hs, hs)          trunk_l2
    w3_ref : (hs, hs+2*ho)     [prop_l1 | mu0_l1 | mu1_l1] fused
    w4_ref : (hs+2*ho, 128)    zero-padded block-diagonal final projection:
                               col 0 <- prop_out, col 1 <- mu0_out,
                               col 2 <- mu1_out, cols 3.. = 0
    b*_ref : (1, width)        f32 biases (separate refs -> no lane slicing)
    out_ref: (tile, 128)       lane 0 = sigmoid(prop), lane 1 = mu0, lane 2 = mu1
    """
    f32 = jnp.float32
    md = w1_ref.dtype  # matmul operand dtype (bf16 by default)

    # shared trunk: two MXU passes, f32 accumulate, f32 elementwise (v5e has
    # no bf16 VPU/EUP).
    h = _elu(jnp.dot(x_ref[...], w1_ref[...], preferred_element_type=f32)
             + b1_ref[...])
    h = _elu(jnp.dot(h.astype(md), w2_ref[...], preferred_element_type=f32)
             + b2_ref[...])

    # all three head hidden layers in ONE MXU pass: ha = [hp | h0 | h1]
    ha = _elu(jnp.dot(h.astype(md), w3_ref[...], preferred_element_type=f32)
              + b3_ref[...])

    # all three scalar outputs in ONE lane-dense MXU pass
    z = jnp.dot(ha.astype(md), w4_ref[...], preferred_element_type=f32) + b4_ref[...]

    # sigmoid only on lane 0 (propensity).  EUP exp + approx reciprocal instead
    # of VPU divides; clamp keeps exp finite so vrcp never sees inf.
    ez = jnp.exp(-jnp.maximum(z, -30.0))
    sig = pl.reciprocal(1.0 + ez, approx=True)
    lane = jax.lax.broadcasted_iota(jnp.int32, z.shape, dimension=1)
    out_ref[...] = jnp.where(lane == 0, sig, z).astype(out_ref.dtype)


# ----------------------------- weight packing ---------------------------------
def pack_params(params, *, matmul_dtype=jnp.bfloat16, out_w=128):
    """Pack the 16 PyTorch-style tensors into 4 weight slabs + 4 bias rows.

    Call ONCE at model load (not inside the per-call forward path)."""
    hs = params["w_t1"].shape[1]
    ho = params["w_01"].shape[1]
    head_w = hs + 2 * ho
    md = matmul_dtype

    w1 = params["w_t1"].astype(md)                      # (xdim, hs), no padding
    w2 = params["w_t2"].astype(md)                      # (hs, hs)
    w3 = jnp.concatenate(
        [params["w_p1"], params["w_01"], params["w_11"]], axis=1).astype(md)
    w4 = jnp.zeros((head_w, out_w), jnp.float32)        # block-diag, lane-dense
    w4 = w4.at[0:hs, 0:1].set(params["w_po"])
    w4 = w4.at[hs:hs + ho, 1:2].set(params["w_0o"])
    w4 = w4.at[hs + ho:hs + 2 * ho, 2:3].set(params["w_1o"])
    w4 = w4.astype(md)

    b1 = params["b_t1"].astype(jnp.float32)
    b2 = params["b_t2"].astype(jnp.float32)
    b3 = jnp.concatenate(
        [params["b_p1"], params["b_01"], params["b_11"]], axis=1).astype(jnp.float32)
    b4 = jnp.zeros((1, out_w), jnp.float32)
    b4 = b4.at[0, 0].set(params["b_po"][0, 0])
    b4 = b4.at[0, 1].set(params["b_0o"][0, 0])
    b4 = b4.at[0, 2].set(params["b_1o"][0, 0])

    return dict(w1=w1, w2=w2, w3=w3, w4=w4, b1=b1, b2=b2, b3=b3, b4=b4,
                ate=params["ate"])


# ----------------------------- wrapper ----------------------------------------
def dragonnet_forward(x, packed, *, batch_tile=512, out_dtype=jnp.bfloat16):
    """Fused DragonNet forward. Returns (p_hat, mu0, mu1, ate), each (N, 1) f32."""
    n, xdim = x.shape
    w1, w2, w3, w4 = packed["w1"], packed["w2"], packed["w3"], packed["w4"]
    b1, b2, b3, b4 = packed["b1"], packed["b2"], packed["b3"], packed["b4"]
    hs = w1.shape[1]
    head_w, out_w = w4.shape
    md = w1.dtype

    assert batch_tile % 16 == 0, "batch_tile must be a multiple of 16 (bf16 packing)"
    assert w1.shape[0] == xdim, "packed w1 does not match x feature width"

    # pad batch to a multiple of the tile (x last dim kept un-padded)
    n_pad = _round_up(n, batch_tile)
    x_p = x.astype(md)
    if n_pad != n:
        x_p = jnp.pad(x_p, ((0, n_pad - n), (0, 0)))

    grid = (n_pad // batch_tile,)

    def full_spec(a):
        nd = a.ndim
        return pl.BlockSpec(a.shape, lambda i, _nd=nd: (0,) * _nd)

    weight_bytes = sum(int(a.size) * a.dtype.itemsize
                       for a in (w1, w2, w3, w4, b1, b2, b3, b4))
    cost = pl.CostEstimate(
        flops=2 * n_pad * (xdim * hs + hs * hs + hs * head_w + head_w * out_w),
        transcendentals=n_pad * (2 * hs + head_w + 2 * out_w),
        bytes_accessed=(n_pad * xdim * x_p.dtype.itemsize
                        + n_pad * out_w * jnp.dtype(out_dtype).itemsize
                        + weight_bytes),
    )

    out = pl.pallas_call(
        dragonnet_kernel,
        out_shape=jax.ShapeDtypeStruct((n_pad, out_w), out_dtype),
        grid_spec=pltpu.PrefetchScalarGridSpec(
            num_scalar_prefetch=0,
            grid=grid,
            in_specs=[
                pl.BlockSpec((batch_tile, xdim), lambda i: (i, 0)),
                full_spec(w1), full_spec(w2), full_spec(w3), full_spec(w4),
                full_spec(b1), full_spec(b2), full_spec(b3), full_spec(b4),
            ],
            out_specs=pl.BlockSpec((batch_tile, out_w), lambda i: (i, 0)),
        ),
        compiler_params=pltpu.CompilerParams(
            dimension_semantics=("parallel",),        # megacore-shardable on v7x
            vmem_limit_bytes=32 * 1024 * 1024,        # keep <= ~48 MiB on v7x
        ),
        cost_estimate=cost,
    )(x_p, w1, w2, w3, w4, b1, b2, b3, b4)

    out = out[:n].astype(jnp.float32)
    return out[:, 0:1], out[:, 1:2], out[:, 2:3], packed["ate"]


# ----------------------------- parameter init ----------------------------------
def init_params(key, xdim, hidden_shared, hidden_outcome):
    """PyTorch nn.Linear-style init (uniform +-1/sqrt(fan_in)).
    Weights stored transposed: (in_features, out_features)."""
    def linear(key, fan_in, fan_out):
        kw, kb = jax.random.split(key)
        bound = 1.0 / jnp.sqrt(fan_in)
        w = jax.random.uniform(kw, (fan_in, fan_out), jnp.float32, -bound, bound)
        b = jax.random.uniform(kb, (1, fan_out), jnp.float32, -bound, bound)
        return w, b

    keys = jax.random.split(key, 8)
    p = {}
    p["w_t1"], p["b_t1"] = linear(keys[0], xdim, hidden_shared)
    p["w_t2"], p["b_t2"] = linear(keys[1], hidden_shared, hidden_shared)
    p["w_p1"], p["b_p1"] = linear(keys[2], hidden_shared, hidden_shared)
    p["w_po"], p["b_po"] = linear(keys[3], hidden_shared, 1)
    p["w_01"], p["b_01"] = linear(keys[4], hidden_shared, hidden_outcome)
    p["w_0o"], p["b_0o"] = linear(keys[5], hidden_outcome, 1)
    p["w_11"], p["b_11"] = linear(keys[6], hidden_shared, hidden_outcome)
    p["w_1o"], p["b_1o"] = linear(keys[7], hidden_outcome, 1)
    p["ate"] = jnp.float32(0.0)   # trainable scalar in the torch module (not updated)
    return p


# ----------------------------- pure-JAX reference ------------------------------
def reference_forward(x, p, matmul_dtype=jnp.float32):
    """Un-fused reference. matmul_dtype mirrors the kernel's matmul-operand cast."""
    md = matmul_dtype
    dot = lambda a, w: jnp.dot(a.astype(md), w.astype(md),
                               preferred_element_type=jnp.float32)
    elu = lambda v: jnp.where(v > 0, v, jnp.exp(jnp.minimum(v, 0.0)) - 1.0)
    h = elu(dot(x, p["w_t1"]) + p["b_t1"])
    h = elu(dot(h, p["w_t2"]) + p["b_t2"])
    hp = elu(dot(h, p["w_p1"]) + p["b_p1"])
    p_hat = jax.nn.sigmoid(dot(hp, p["w_po"]) + p["b_po"])
    h0 = elu(dot(h, p["w_01"]) + p["b_01"])
    mu0 = dot(h0, p["w_0o"]) + p["b_0o"]
    h1 = elu(dot(h, p["w_11"]) + p["b_11"])
    mu1 = dot(h1, p["w_1o"]) + p["b_1o"]
    return p_hat, mu0, mu1, p["ate"]


# ----------------------------- main ---------------------------------------------
if __name__ == "__main__":
    # DragonNet(xdim=8, hidden_shared=128, hidden_outcome=64).  N=1024 rows with
    # batch_tile=512 -> grid of 2 steps (pipelining + both TensorCores on v7x).
    N, XDIM, HIDDEN_SHARED, HIDDEN_OUTCOME = 1024, 8, 128, 64
    BATCH_TILE = 512   # primary tuning knob; sweep 512-2048 at larger N

    key = jax.random.PRNGKey(0)
    kx, kp = jax.random.split(key)
    x = jax.random.normal(kx, (N, XDIM), jnp.float32)
    params = init_params(kp, XDIM, HIDDEN_SHARED, HIDDEN_OUTCOME)

    # Pack / bf16-cast the weights ONCE (outside the per-call path).
    packed = pack_params(params, matmul_dtype=jnp.bfloat16)
    packed = jax.block_until_ready(packed)

    fwd = jax.jit(functools.partial(dragonnet_forward,
                                    batch_tile=BATCH_TILE,
                                    out_dtype=jnp.bfloat16))
    p_hat, mu0, mu1, ate = fwd(x, packed)
    jax.block_until_ready((p_hat, mu0, mu1, ate))

    assert p_hat.shape == (N, 1) and mu0.shape == (N, 1) and mu1.shape == (N, 1)

    # Tight check vs a reference using the same bf16-matmul / f32-accum policy
    # (tolerance covers the bf16 output slab + approx reciprocal).
    rp, r0, r1, ra = reference_forward(x, params, matmul_dtype=jnp.bfloat16)
    assert jnp.allclose(p_hat, rp, atol=2e-2, rtol=2e-2), float(jnp.max(jnp.abs(p_hat - rp)))
    assert jnp.allclose(mu0, r0, atol=2e-2, rtol=2e-2), float(jnp.max(jnp.abs(mu0 - r0)))
    assert jnp.allclose(mu1, r1, atol=2e-2, rtol=2e-2), float(jnp.max(jnp.abs(mu1 - r1)))
    assert jnp.allclose(ate, ra)

    # Loose semantic check vs the pure-f32 (PyTorch-equivalent) math.
    fp, f0, f1, _ = reference_forward(x, params, matmul_dtype=jnp.float32)
    assert jnp.allclose(p_hat, fp, atol=0.15, rtol=0.15)
    assert jnp.allclose(mu0, f0, atol=0.15, rtol=0.15)
    assert jnp.allclose(mu1, f1, atol=0.15, rtol=0.15)

    print("KERNEL_OK")
</pallas_src>

<mosaic_0001>
module attributes {stable_mosaic.version = 11 : i64} {
  func.func @dragonnet_kernel(%arg0: i32, %arg1: memref<512x8xbf16, #tpu.memory_space<vmem>>, %arg2: memref<8x128xbf16, #tpu.memory_space<vmem>>, %arg3: memref<128x128xbf16, #tpu.memory_space<vmem>>, %arg4: memref<128x256xbf16, #tpu.memory_space<vmem>>, %arg5: memref<256x128xbf16, #tpu.memory_space<vmem>>, %arg6: memref<1x128xf32, #tpu.memory_space<vmem>>, %arg7: memref<1x128xf32, #tpu.memory_space<vmem>>, %arg8: memref<1x256xf32, #tpu.memory_space<vmem>>, %arg9: memref<1x128xf32, #tpu.memory_space<vmem>>, %arg10: memref<512x128xbf16, #tpu.memory_space<vmem>>) attributes {dimension_semantics = [#tpu.dimension_semantics<parallel>], iteration_bounds = array<i64: 2>, scalar_prefetch = 0 : i64, scratch_operands = 0 : i64, tpu.core_type = #tpu.core_type<tc>, window_params = [{transform_indices = @transform_0, window_bounds = array<i64: 512, 8>}, {pipeline_mode = #tpu.pipeline_mode<synchronous>, transform_indices = @transform_1, window_bounds = array<i64: 8, 128>}, {pipeline_mode = #tpu.pipeline_mode<synchronous>, transform_indices = @transform_2, window_bounds = array<i64: 128, 128>}, {pipeline_mode = #tpu.pipeline_mode<synchronous>, transform_indices = @transform_3, window_bounds = array<i64: 128, 256>}, {pipeline_mode = #tpu.pipeline_mode<synchronous>, transform_indices = @transform_4, window_bounds = array<i64: 256, 128>}, {pipeline_mode = #tpu.pipeline_mode<synchronous>, transform_indices = @transform_5, window_bounds = array<i64: 1, 128>}, {pipeline_mode = #tpu.pipeline_mode<synchronous>, transform_indices = @transform_6, window_bounds = array<i64: 1, 128>}, {pipeline_mode = #tpu.pipeline_mode<synchronous>, transform_indices = @transform_7, window_bounds = array<i64: 1, 256>}, {pipeline_mode = #tpu.pipeline_mode<synchronous>, transform_indices = @transform_8, window_bounds = array<i64: 1, 128>}, {transform_indices = @transform_9, window_bounds = array<i64: 512, 128>}]} {
    %c0 = arith.constant 0 : index
    %c0_0 = arith.constant 0 : index
    %0 = vector.load %arg1[%c0, %c0_0] : memref<512x8xbf16, #tpu.memory_space<vmem>>, vector<512x8xbf16>
    %c0_1 = arith.constant 0 : index
    %c0_2 = arith.constant 0 : index
    %1 = vector.load %arg2[%c0_1, %c0_2] : memref<8x128xbf16, #tpu.memory_space<vmem>>, vector<8x128xbf16>
    %cst = arith.constant dense<0.000000e+00> : vector<512x128xf32>
    %2 = tpu.matmul %0, %1, %cst {dimension_numbers = #tpu.dot_dimension_numbers<[1], [0], [0], [1], [0, 0, 1, 1], [], []>} : vector<512x8xbf16>, vector<8x128xbf16>, vector<512x128xf32> -> vector<512x128xf32>
    %c0_3 = arith.constant 0 : index
    %c0_4 = arith.constant 0 : index
    %3 = vector.load %arg6[%c0_3, %c0_4] : memref<1x128xf32, #tpu.memory_space<vmem>>, vector<1x128xf32>
    %4 = vector.broadcast %3 : vector<1x128xf32> to vector<512x128xf32>
    %5 = arith.addf %2, %4 : vector<512x128xf32>
    %cst_5 = arith.constant 0.000000e+00 : f32
    %6 = vector.broadcast %cst_5 : f32 to vector<512x128xf32>
    %7 = arith.cmpf ogt, %5, %6 : vector<512x128xf32>
    %cst_6 = arith.constant 0.000000e+00 : f32
    %8 = vector.broadcast %cst_6 : f32 to vector<512x128xf32>
    %9 = arith.minimumf %5, %8 : vector<512x128xf32>
    %10 = math.exp %9 : vector<512x128xf32>
    %cst_7 = arith.constant 1.000000e+00 : f32
    %11 = vector.broadcast %cst_7 : f32 to vector<512x128xf32>
    %12 = arith.subf %10, %11 : vector<512x128xf32>
    %13 = arith.select %7, %5, %12 : vector<512x128xi1>, vector<512x128xf32>
    %14 = arith.truncf %13 : vector<512x128xf32> to vector<512x128xbf16>
    %c0_8 = arith.constant 0 : index
    %c0_9 = arith.constant 0 : index
    %15 = vector.load %arg3[%c0_8, %c0_9] : memref<128x128xbf16, #tpu.memory_space<vmem>>, vector<128x128xbf16>
    %cst_10 = arith.constant dense<0.000000e+00> : vector<512x128xf32>
    %16 = tpu.matmul %14, %15, %cst_10 {dimension_numbers = #tpu.dot_dimension_numbers<[1], [0], [0], [1], [0, 0, 1, 1], [], []>} : vector<512x128xbf16>, vector<128x128xbf16>, vector<512x128xf32> -> vector<512x128xf32>
    %c0_11 = arith.constant 0 : index
    %c0_12 = arith.constant 0 : index
    %17 = vector.load %arg7[%c0_11, %c0_12] : memref<1x128xf32, #tpu.memory_space<vmem>>, vector<1x128xf32>
    %18 = vector.broadcast %17 : vector<1x128xf32> to vector<512x128xf32>
    %19 = arith.addf %16, %18 : vector<512x128xf32>
    %cst_13 = arith.constant 0.000000e+00 : f32
    %20 = vector.broadcast %cst_13 : f32 to vector<512x128xf32>
    %21 = arith.cmpf ogt, %19, %20 : vector<512x128xf32>
    %cst_14 = arith.constant 0.000000e+00 : f32
    %22 = vector.broadcast %cst_14 : f32 to vector<512x128xf32>
    %23 = arith.minimumf %19, %22 : vector<512x128xf32>
    %24 = math.exp %23 : vector<512x128xf32>
    %cst_15 = arith.constant 1.000000e+00 : f32
    %25 = vector.broadcast %cst_15 : f32 to vector<512x128xf32>
    %26 = arith.subf %24, %25 : vector<512x128xf32>
    %27 = arith.select %21, %19, %26 : vector<512x128xi1>, vector<512x128xf32>
    %28 = arith.truncf %27 : vector<512x128xf32> to vector<512x128xbf16>
    %c0_16 = arith.constant 0 : index
    %c0_17 = arith.constant 0 : index
    %29 = vector.load %arg4[%c0_16, %c0_17] : memref<128x256xbf16, #tpu.memory_space<vmem>>, vector<128x256xbf16>
    %cst_18 = arith.constant dense<0.000000e+00> : vector<512x256xf32>
    %30 = tpu.matmul %28, %29, %cst_18 {dimension_numbers = #tpu.dot_dimension_numbers<[1], [0], [0], [1], [0, 0, 1, 1], [], []>} : vector<512x128xbf16>, vector<128x256xbf16>, vector<512x256xf32> -> vector<512x256xf32>
    %c0_19 = arith.constant 0 : index
    %c0_20 = arith.constant 0 : index
    %31 = vector.load %arg8[%c0_19, %c0_20] : memref<1x256xf32, #tpu.memory_space<vmem>>, vector<1x256xf32>
    %32 = vector.broadcast %31 : vector<1x256xf32> to vector<512x256xf32>
    %33 = arith.addf %30, %32 : vector<512x256xf32>
    %cst_21 = arith.constant 0.000000e+00 : f32
    %34 = vector.broadcast %cst_21 : f32 to vector<512x256xf32>
    %35 = arith.cmpf ogt, %33, %34 : vector<512x256xf32>
    %cst_22 = arith.constant 0.000000e+00 : f32
    %36 = vector.broadcast %cst_22 : f32 to vector<512x256xf32>
    %37 = arith.minimumf %33, %36 : vector<512x256xf32>
    %38 = math.exp %37 : vector<512x256xf32>
    %cst_23 = arith.constant 1.000000e+00 : f32
    %39 = vector.broadcast %cst_23 : f32 to vector<512x256xf32>
    %40 = arith.subf %38, %39 : vector<512x256xf32>
    %41 = arith.select %35, %33, %40 : vector<512x256xi1>, vector<512x256xf32>
    %42 = arith.truncf %41 : vector<512x256xf32> to vector<512x256xbf16>
    %c0_24 = arith.constant 0 : index
    %c0_25 = arith.constant 0 : index
    %43 = vector.load %arg5[%c0_24, %c0_25] : memref<256x128xbf16, #tpu.memory_space<vmem>>, vector<256x128xbf16>
    %cst_26 = arith.constant dense<0.000000e+00> : vector<512x128xf32>
    %44 = tpu.matmul %42, %43, %cst_26 {dimension_numbers = #tpu.dot_dimension_numbers<[1], [0], [0], [1], [0, 0, 1, 1], [], []>} : vector<512x256xbf16>, vector<256x128xbf16>, vector<512x128xf32> -> vector<512x128xf32>
    %c0_27 = arith.constant 0 : index
    %c0_28 = arith.constant 0 : index
    %45 = vector.load %arg9[%c0_27, %c0_28] : memref<1x128xf32, #tpu.memory_space<vmem>>, vector<1x128xf32>
    %46 = vector.broadcast %45 : vector<1x128xf32> to vector<512x128xf32>
    %47 = arith.addf %44, %46 : vector<512x128xf32>
    %cst_29 = arith.constant -3.000000e+01 : f32
    %48 = vector.broadcast %cst_29 : f32 to vector<512x128xf32>
    %49 = arith.maximumf %47, %48 : vector<512x128xf32>
    %cst_30 = arith.constant 0.000000e+00 : f32
    %50 = vector.broadcast %cst_30 : f32 to vector<512x128xf32>
    %51 = arith.subf %50, %49 : vector<512x128xf32>
    %52 = math.exp %51 : vector<512x128xf32>
    %cst_31 = arith.constant 1.000000e+00 : f32
    %53 = vector.broadcast %cst_31 : f32 to vector<512x128xf32>
    %54 = arith.addf %53, %52 : vector<512x128xf32>
    %55 = tpu.reciprocal %54 {approx = true} : vector<512x128xf32> -> vector<512x128xf32>
    %56 = tpu.iota {dimensions = array<i32: 1>} : vector<512x128xi32>
    %c0_i32 = arith.constant 0 : i32
    %57 = vector.broadcast %c0_i32 : i32 to vector<512x128xi32>
    %58 = arith.cmpi eq, %56, %57 : vector<512x128xi32>
    %59 = arith.select %58, %55, %47 : vector<512x128xi1>, vector<512x128xf32>
    %60 = arith.truncf %59 : vector<512x128xf32> to vector<512x128xbf16>
    %c0_32 = arith.constant 0 : index
    %c0_33 = arith.constant 0 : index
    %61 = vector.load %arg10[%c0_32, %c0_33] : memref<512x128xbf16, #tpu.memory_space<vmem>>, vector<512x128xbf16>
    tpu.vector_store %arg10[%c0_32, %c0_33], %60 {strides = array<i32>} : memref<512x128xbf16, #tpu.memory_space<vmem>>, vector<512x128xbf16>,
    return
  }
  func.func @transform_0(%arg0: i32) -> (i32, i32) {
    %c0_i32 = arith.constant 0 : i32
    %c0_i32_0 = arith.constant 0 : i32
    return %arg0, %c0_i32 : i32, i32
  }
  func.func @transform_1(%arg0: i32) -> (i32, i32) {
    %c0_i32 = arith.constant 0 : i32
    %c0_i32_0 = arith.constant 0 : i32
    %c0_i32_1 = arith.constant 0 : i32
    return %c0_i32, %c0_i32_0 : i32, i32
  }
  func.func @transform_2(%arg0: i32) -> (i32, i32) {
    %c0_i32 = arith.constant 0 : i32
    %c0_i32_0 = arith.constant 0 : i32
    %c0_i32_1 = arith.constant 0 : i32
    return %c0_i32, %c0_i32_0 : i32, i32
  }
  func.func @transform_3(%arg0: i32) -> (i32, i32) {
    %c0_i32 = arith.constant 0 : i32
    %c0_i32_0 = arith.constant 0 : i32
    %c0_i32_1 = arith.constant 0 : i32
    return %c0_i32, %c0_i32_0 : i32, i32
  }
  func.func @transform_4(%arg0: i32) -> (i32, i32) {
    %c0_i32 = arith.constant 0 : i32
    %c0_i32_0 = arith.constant 0 : i32
    %c0_i32_1 = arith.constant 0 : i32
    return %c0_i32, %c0_i32_0 : i32, i32
  }
  func.func @transform_5(%arg0: i32) -> (i32, i32) {
    %c0_i32 = arith.constant 0 : i32
    %c0_i32_0 = arith.constant 0 : i32
    %c0_i32_1 = arith.constant 0 : i32
    return %c0_i32, %c0_i32_0 : i32, i32
  }
  func.func @transform_6(%arg0: i32) -> (i32, i32) {
    %c0_i32 = arith.constant 0 : i32
    %c0_i32_0 = arith.constant 0 : i32
    %c0_i32_1 = arith.constant 0 : i32
    return %c0_i32, %c0_i32_0 : i32, i32
  }
  func.func @transform_7(%arg0: i32) -> (i32, i32) {
    %c0_i32 = arith.constant 0 : i32
    %c0_i32_0 = arith.constant 0 : i32
    %c0_i32_1 = arith.constant 0 : i32
    return %c0_i32, %c0_i32_0 : i32, i32
  }
  func.func @transform_8(%arg0: i32) -> (i32, i32) {
    %c0_i32 = arith.constant 0 : i32
    %c0_i32_0 = arith.constant 0 : i32
    %c0_i32_1 = arith.constant 0 : i32
    return %c0_i32, %c0_i32_0 : i32, i32
  }
  func.func @transform_9(%arg0: i32) -> (i32, i32) {
    %c0_i32 = arith.constant 0 : i32
    %c0_i32_0 = arith.constant 0 : i32
    return %arg0, %c0_i32 : i32, i32
  }
}

</mosaic_0001>

<bundles_post_ra>
// kernel: dragonnet_forward.1
= control target key start
LH: loop header
LB: loop body
LE: loop exit
PB: predicated region body
PF: predicated region fallthrough
CT: control target
= control target key end

     0   :  { %s6559_s30 = smov 0   ;;  %s9146_s0 = inlined_call_operand.vmem [shape: bf16[1024,8], index: 0, kind: input, shape index: {}]   ;;  %s9147_s1 = inlined_call_operand.vmem [shape: bf16[8,128], index: 1, kind: input, shape index: {}]   ;;  %s9148_s2 = inlined_call_operand.vmem [shape: bf16[128,128], index: 2, kind: input, shape index: {}]   ;;  %s9149_s3 = inlined_call_operand.vmem [shape: bf16[128,256], index: 3, kind: input, shape index: {}]   ;;  %s9150_s4 = inlined_call_operand.vmem [shape: bf16[256,128], index: 4, kind: input, shape index: {}]   ;;  %s9151_s5 = inlined_call_operand.vmem [shape: f32[1,128], index: 5, kind: input, shape index: {}]   ;;  %s9152_s6 = inlined_call_operand.vmem [shape: f32[1,128], index: 6, kind: input, shape index: {}]   ;;  %s9153_s7 = inlined_call_operand.vmem [shape: f32[1,256], index: 7, kind: input, shape index: {}]   ;;  %s9154_s8 = inlined_call_operand.vmem [shape: f32[1,128], index: 8, kind: input, shape index: {}]   ;;  %s9155_s9 = inlined_call_operand.vmem [shape: bf16[1024,128], index: 9, kind: output, shape index: {}]  }
   0x1 LB: > { %s4695_s10 = sadd.s32 4294967295, %s6506_s30   ;;  %p4699_p0 = scmp.ge.s32.totalorder %s6506_s30, 1  ;;  %s6506_s30 = sphi %s6559_s30, %s19_s30  }
   0x2   : > { %p288_p1 = scmp.lt.s32.totalorder %s6506_s30, 3 }
   0x4   : > { %p289_p2 = pnand %p4699_p0, %p288_p1 }
   0x5   : > { %s4700_s13 = sshll.u32 (!%p289_p2), %s4695_s10, 6 }
   0x6   : > { %292 = sbr.rel (%p289_p2) target bundleno = 1191 (0x4a7), region = 56  ;;  %p325_p3 = scmp.lt.s32.totalorder (!%p289_p2), %s4700_s13, 127 }
   0xb   : > { %v401_v0 = vld [vmem:[%s9147_s1] sm:$0xf]  ;;  %vm666_vm0 = vcmask 1043456   ;;  %vm569_vm1 = vcmask 64512   ;;  %s9157_s13 = smov (!%p325_p3, %s4700_s13), 127  ;;  %v5681_v21 = vld [vmem:[%s9148_s2 + $0x38] sm:$0xff]  }
   0xc   : > { %5639 = vmatprep.subr.msk.bf16.mxu0 %vm666_vm0, %v401_v0  ;;  %v668_v1 = vsel %vm666_vm0, %v401_v0, 0  ;;  %s4701_s14 = sshll.u32 %s9157_s13, 2  ;;  %5527 = vmatprep.subr.bf16.mxu1 %v5681_v21  ;;  %v5682_v22 = vld [vmem:[%s9148_s2 + $0x30] sm:$0xff]   ;;  %v5683_v25 = vld [vmem:[%s9148_s2 + $0x28] sm:$0xff]   ;;  %v5684_v27 = vld [vmem:[%s9148_s2 + $0x20] sm:$0xff]  }
   0xd   : > { %5462 = vmatpush3.bf16.msra.mxu0 %v668_v1  ;;  %s6578_s17 = scalar_lea.vmem %s9146_s0, %s4701_s14  ;;  %5528 = vmatpush3.bf16.msra.mxu1 %v5681_v21  ;;  %v5685_v29 = vld [vmem:[%s9148_s2 + $0x18] sm:$0xff]   ;;  %v5686_v31 = vld [vmem:[%s9148_s2 + $0x10] sm:$0xff]   ;;  %v5687_v33 = vld [vmem:[%s9148_s2 + $0x8] sm:$0xff]   ;;  %s8698_s23 = scalar_lea.vmem %s9155_s9, %s4701_s14 }
   0xe   : > { %v5649_v2 = vld [vmem:[%s6578_s17] sm:$0xff]   ;;  %v5650_v3 = vld [vmem:[%s6578_s17 + $0x8] sm:$0xff]   ;;  %v5651_v4 = vld [vmem:[%s6578_s17 + $0x10] sm:$0xff]   ;;  %5529 = vmatprep.subr.bf16.mxu1 %v5682_v22 }
   0xf   : > { %5463 = vmatprep.mubr.msk.bf16.mxu0 %vm569_vm1, %v5649_v2  ;;  %v5652_v5 = vld [vmem:[%s6578_s17 + $0x18] sm:$0xff]   ;;  %v5653_v6 = vld [vmem:[%s6578_s17 + $0x20] sm:$0xff]   ;;  %v5654_v7 = vld [vmem:[%s6578_s17 + $0x28] sm:$0xff]  }
  0x10   : > { %5464 = vmatmul.mubr.msk.bf16.vlgmr.msra.gmra.mxu0 %vm569_vm1, %v5650_v3  ;;  %v5655_v8 = vld [vmem:[%s6578_s17 + $0x30] sm:$0xff]   ;;  %v5656_v9 = vld [vmem:[%s6578_s17 + $0x38] sm:$0xff]   ;;  %v5657_v10 = vld [vmem:[%s6578_s17 + $0x40] sm:$0xff]  }
  0x11   : > { %5467 = vmatprep.mubr.msk.bf16.mxu0 %vm569_vm1, %v5651_v4  ;;  %v5658_v11 = vld [vmem:[%s6578_s17 + $0x48] sm:$0xff]   ;;  %v5659_v12 = vld [vmem:[%s6578_s17 + $0x50] sm:$0xff]   ;;  %v5660_v13 = vld [vmem:[%s6578_s17 + $0x58] sm:$0xff]   ;;  %5530 = vmatpush3.bf16.msra.mxu1 %v5682_v22 }
  0x12   : > { %v5661_v14 = vld [vmem:[%s6578_s17 + $0x60] sm:$0xff]   ;;  %v5662_v15 = vld [vmem:[%s6578_s17 + $0x68] sm:$0xff]   ;;  %v5663_v16 = vld [vmem:[%s6578_s17 + $0x70] sm:$0xff]   ;;  %5531 = vmatprep.subr.bf16.mxu1 %v5683_v25 }
  0x13   : > { %v5664_v17 = vld [vmem:[%s6578_s17 + $0x78] sm:$0xff]   ;;  %v5665_v18 = vld [vmem:[%s6578_s17 + $0x80] sm:$0xff]   ;;  %v5666_v19 = vld [vmem:[%s6578_s17 + $0x88] sm:$0xff]  }
  0x14   : > { %v5667_v20 = vld [vmem:[%s6578_s17 + $0x90] sm:$0xff]   ;;  %v5668_v23 = vld [vmem:[%s6578_s17 + $0x98] sm:$0xff]   ;;  %v5669_v24 = vld [vmem:[%s6578_s17 + $0xa0] sm:$0xff]  }
  0x15   : > { %5532 = vmatpush3.bf16.msra.mxu1 %v5683_v25  ;;  %v5670_v26 = vld [vmem:[%s6578_s17 + $0xa8] sm:$0xff]   ;;  %v5671_v28 = vld [vmem:[%s6578_s17 + $0xb0] sm:$0xff]   ;;  %v5672_v30 = vld [vmem:[%s6578_s17 + $0xb8] sm:$0xff]  }
  0x16   : > { %5533 = vmatprep.subr.bf16.mxu1 %v5684_v27  ;;  %v5673_v32 = vld [vmem:[%s6578_s17 + $0xc0] sm:$0xff]   ;;  %v5674_v34 = vld [vmem:[%s6578_s17 + $0xc8] sm:$0xff]   ;;  %v5675_v36 = vld [vmem:[%s6578_s17 + $0xd0] sm:$0xff]  }
  0x17   : > { %v5688_v35 = vld [vmem:[%s9148_s2] sm:$0xff]   ;;  %v5676_v37 = vld [vmem:[%s6578_s17 + $0xd8] sm:$0xff]   ;;  %v5678_v39 = vld [vmem:[%s6578_s17 + $0xe8] sm:$0xff]  }
  0x18   : > { %5468 = vmatmul.mubr.msk.bf16.gmra.mxu0 %vm569_vm1, %v5652_v5  ;;  %v5677_v38 = vld [vmem:[%s6578_s17 + $0xe0] sm:$0xff]   ;;  %v5679_v40 = vld [vmem:[%s6578_s17 + $0xf0] sm:$0xff]   ;;  %v5680_v41 = vld [vmem:[%s6578_s17 + $0xf8] sm:$0xff]  }
  0x19   : > { %5471 = vmatprep.mubr.msk.bf16.mxu0 %vm569_vm1, %v5653_v6  ;;  %5534 = vmatpush3.bf16.msra.mxu1 %v5684_v27  ;;  %v5689_v42 = vld [vmem:[%s9149_s3 + $0x70] ss:$8 sps:$4 sm:$0xff]   ;;  %v5691_v43 = vld [vmem:[%s9149_s3 + $0x74] ss:$8 sps:$4 sm:$0xff]   ;;  %v5692_v44 = vld [vmem:[%s9149_s3 + $0x60] ss:$8 sps:$4 sm:$0xff]  }
  0x1a   : > { %5535 = vmatprep.subr.bf16.mxu1 %v5685_v29  ;;  %2259 = vmatprep.subr.bf16.mxu0 %v5691_v43  ;;  %v5694_v45 = vld [vmem:[%s9149_s3 + $0x64] ss:$8 sps:$4 sm:$0xff]   ;;  %v5695_v46 = vld [vmem:[%s9149_s3 + $0x50] ss:$8 sps:$4 sm:$0xff]   ;;  %v5697_v47 = vld [vmem:[%s9149_s3 + $0x54] ss:$8 sps:$4 sm:$0xff]  }
  0x1b   : > { %2260 = vmatpush1.bf16.msra.mxu0 %v5689_v42  ;;  %v6689_v48 = vld [vmem:[%s9151_s5] ss:$0 sm:$0xff]  ;;  %v5700_v54 = vld [vmem:[%s9149_s3 + $0x44] ss:$8 sps:$4 sm:$0xff]  }
  0x1c   : > { %2261 = vmatprep.subr.bf16.mxu0 %v5694_v45  ;;  %v5698_v53 = vld [vmem:[%s9149_s3 + $0x40] ss:$8 sps:$4 sm:$0xff]  }
  0x1d   : > { %5536 = vmatpush3.bf16.msra.mxu1 %v5685_v29  ;;  %v5704_v25 = vld [vmem:[%s9149_s3 + $0x20] ss:$8 sps:$4 sm:$0xff]  }
  0x1e   : > { %5537 = vmatprep.subr.bf16.mxu1 %v5686_v31 }
  0x1f   : > { %2262 = vmatpush1.bf16.msra.mxu0 %v5692_v44 }
  0x20   : > { %5472 = vmatmul.mubr.msk.bf16.gmra.mxu0 %vm569_vm1, %v5654_v7  ;;  %2263 = vmatprep.subr.bf16.mxu0 %v5697_v47  ;;  %v5701_v7 = vld [vmem:[%s9149_s3 + $0x30] ss:$8 sps:$4 sm:$0xff]  }
  0x21   : > { %5475 = vmatprep.mubr.msk.bf16.mxu0 %vm569_vm1, %v5655_v8  ;;  %5538 = vmatpush3.bf16.msra.mxu1 %v5686_v31  ;;  %v5703_v8 = vld [vmem:[%s9149_s3 + $0x34] ss:$8 sps:$4 sm:$0xff]  }
  0x22   : > { %5539 = vmatprep.subr.bf16.mxu1 %v5687_v33 }
  0x23   : > { %2264 = vmatpush1.bf16.msra.mxu0 %v5695_v46 }
  0x24   : > { %2265 = vmatprep.subr.bf16.mxu0 %v5700_v54 }
  0x25   : > { %5540 = vmatpush3.bf16.msra.mxu1 %v5687_v33 }
  0x26   : > { %5541 = vmatprep.subr.bf16.mxu1 %v5688_v35 }
  0x27   : > { %2266 = vmatpush1.bf16.msra.mxu0 %v5698_v53  ;;  %v5709_v53 = vld [vmem:[%s9149_s3 + $0x14] ss:$8 sps:$4 sm:$0xff]  }
  0x28   : > { %5476 = vmatmul.mubr.msk.bf16.gmra.mxu0 %vm569_vm1, %v5656_v9  ;;  %2267 = vmatprep.subr.bf16.mxu0 %v5703_v8 }
  0x29   : > { %5479 = vmatprep.mubr.msk.bf16.mxu0 %vm569_vm1, %v5657_v10  ;;  %5542 = vmatpush3.bf16.msra.mxu1 %v5688_v35 }
  0x2b   : > { %2268 = vmatpush1.bf16.msra.mxu0 %v5701_v7 }
  0x30   : > { %5480 = vmatmul.mubr.msk.bf16.gmra.mxu0 %vm569_vm1, %v5658_v11 }
  0x31   : > { %5483 = vmatprep.mubr.msk.bf16.mxu0 %vm569_vm1, %v5659_v12 }
  0x38   : > { %5484 = vmatmul.mubr.msk.bf16.gmra.mxu0 %vm569_vm1, %v5660_v13 }
  0x39   : > { %5487 = vmatprep.mubr.msk.bf16.mxu0 %vm569_vm1, %v5661_v14 }
  0x40   : > { %5488 = vmatmul.mubr.msk.bf16.gmra.mxu0 %vm569_vm1, %v5662_v15 }
  0x41   : > { %5491 = vmatprep.mubr.msk.bf16.mxu0 %vm569_vm1, %v5663_v16 }
  0x48   : > { %5492 = vmatmul.mubr.msk.bf16.gmra.mxu0 %vm569_vm1, %v5664_v17 }
  0x49   : > { %5495 = vmatprep.mubr.msk.bf16.mxu0 %vm569_vm1, %v5665_v18 }
  0x50   : > { %5496 = vmatmul.mubr.msk.bf16.gmra.mxu0 %vm569_vm1, %v5666_v19 }
  0x51   : > { %5499 = vmatprep.mubr.msk.bf16.mxu0 %vm569_vm1, %v5667_v20 }
  0x58   : > { %5500 = vmatmul.mubr.msk.bf16.gmra.mxu0 %vm569_vm1, %v5668_v23 }
  0x59   : > { %5503 = vmatprep.mubr.msk.bf16.mxu0 %vm569_vm1, %v5669_v24 }
  0x60   : > { %5504 = vmatmul.mubr.msk.bf16.gmra.mxu0 %vm569_vm1, %v5670_v26  ;;  %v5706_v26 = vld [vmem:[%s9149_s3 + $0x24] ss:$8 sps:$4 sm:$0xff]  }
  0x61   : > { %5507 = vmatprep.mubr.msk.bf16.mxu0 %vm569_vm1, %v5671_v28  ;;  %2269 = vmatprep.subr.bf16.mxu0 %v5706_v26 }
  0x62   : > { %2270 = vmatpush1.bf16.msra.mxu0 %v5704_v25 }
  0x63   : > { %2271 = vmatprep.subr.bf16.mxu0 %v5709_v53 }
  0x68   : > { %5508 = vmatmul.mubr.msk.bf16.gmra.mxu0 %vm569_vm1, %v5672_v30 }
  0x69   : > { %5511 = vmatprep.mubr.msk.bf16.mxu0 %vm569_vm1, %v5673_v32 }
  0x70   : > { %5512 = vmatmul.mubr.msk.bf16.gmra.mxu0 %vm569_vm1, %v5674_v34 }
  0x71   : > { %5515 = vmatprep.mubr.msk.bf16.mxu0 %vm569_vm1, %v5675_v36 }
  0x78   : > { %5516 = vmatmul.mubr.msk.bf16.gmra.mxu0 %vm569_vm1, %v5676_v37 }
  0x79   : > { %5519 = vmatprep.mubr.msk.bf16.mxu0 %vm569_vm1, %v5677_v38 }
  0x80   : > { %5520 = vmatmul.mubr.msk.bf16.gmra.mxu0 %vm569_vm1, %v5678_v39 }
  0x81   : > { %5523 = vmatprep.mubr.msk.bf16.mxu0 %vm569_vm1, %v5679_v40 }
  0x88   : > { %5524 = vmatmul.mubr.msk.bf16.gmra.mxu0 %vm569_vm1, %v5680_v41 }
  0xd0   : > { %v5465_v49 = vpop.f32.mrf.mxu0 }
  0xd1   : > { %v6692_v50 = vadd.f32 %v5465_v49, %v6689_v48 }
  0xd2   : > { %v704_v51 = vpop.f32.mrf.mxu0 }
  0xd3   : > { %v6695_v52 = vadd.f32 %v6689_v48, %v704_v51  ;;  %v1025_v55 = vmin.f32 %v6692_v50, 0.0  ;;  %v5707_v51 = vld [vmem:[%s9149_s3 + $0x10] ss:$8 sps:$4 sm:$0xff]   ;;  %vm961_vm5 = vcmp.gt.f32.partialorder %v6692_v50, 0.0 }
  0xd4   : > { %v5466_v56 = vpop.f32.mrf.mxu0  ;;  %2272 = vmatpush1.bf16.msra.mxu0 %v5707_v51 }
  0xd5   : > { %v1023_v57 = vmin.f32 %v6695_v52, 0.0  ;;  %v6706_v58 = vadd.f32 %v5466_v56, %v6689_v48  ;;  %v1091_v62 = vmul.f32 1.442695, %v1025_v55  ;;  %vm959_vm4 = vcmp.gt.f32.partialorder %v6695_v52, 0.0 }
  0xd6   : > { %v707_v59 = vpop.f32.mrf.mxu0 }
  0xd7   : > { %v1087_v60 = vmul.f32 1.442695, %v1023_v57  ;;  %v1026_v61 = vmin.f32 %v6706_v58, 0.0  ;;  %v6710_v63 = vadd.f32 %v6689_v48, %v707_v59  ;;  %vm962_vm2 = vcmp.gt.f32.partialorder %v6706_v58, 0.0 }
  0xd8   : > { %v5469_v0 = vpop.f32.mrf.mxu0 }
  0xd9   : > { %v1093_v1 = vmul.f32 1.442695, %v1026_v61  ;;  %v6713_v2 = vadd.f32 %v5469_v0, %v6689_v48  ;;  %5729 = vpow2.f32 %v1087_v60  ;;  %v1024_v3 = vmin.f32 %v6710_v63, 0.0 }
  0xda   : > { %v720_v4 = vpop.f32.mrf.mxu0  ;;  %vm960_vm3 = vcmp.gt.f32.partialorder %v6710_v63, 0.0 }
  0xdb   : > { %5731 = vpow2.f32 %v1093_v1  ;;  %v1029_v5 = vmin.f32 %v6713_v2, 0.0  ;;  %v6718_v6 = vadd.f32 %v6689_v48, %v720_v4  ;;  %v1089_v9 = vmul.f32 1.442695, %v1024_v3 }
  0xdc   : > { %5733 = vpow2.f32 %v1091_v62  ;;  %v5470_v10 = vpop.f32.mrf.mxu0  ;;  %vm965_vm6 = vcmp.gt.f32.partialorder %v6713_v2, 0.0 }
  0xdd   : > { %v1099_v11 = vmul.f32 1.442695, %v1029_v5  ;;  %v1027_v12 = vmin.f32 %v6718_v6, 0.0  ;;  %v6728_v13 = vadd.f32 %v5470_v10, %v6689_v48  ;;  %5735 = vpow2.f32 %v1089_v9 }
  0xde   : > { %v723_v14 = vpop.f32.mrf.mxu0  ;;  %vm963_vm9 = vcmp.gt.f32.partialorder %v6718_v6, 0.0 }
  0xdf   : > { %v1095_v15 = vmul.f32 1.442695, %v1027_v12  ;;  %v1030_v16 = vmin.f32 %v6728_v13, 0.0  ;;  %v6732_v17 = vadd.f32 %v6689_v48, %v723_v14  ;;  %5737 = vpow2.f32 %v1099_v11 }
  0xe0   : > { %v5473_v18 = vpop.f32.mrf.mxu0  ;;  %vm966_vm7 = vcmp.gt.f32.partialorder %v6728_v13, 0.0 }
  0xe1   : > { %v1101_v19 = vmul.f32 1.442695, %v1030_v16  ;;  %v6735_v20 = vadd.f32 %v5473_v18, %v6689_v48  ;;  %5739 = vpow2.f32 %v1095_v15  ;;  %v1028_v21 = vmin.f32 %v6732_v17, 0.0 }
  0xe2   : > { %v736_v22 = vpop.f32.mrf.mxu0  ;;  %vm964_vm8 = vcmp.gt.f32.partialorder %v6732_v17, 0.0 }
  0xe3   : > { %5741 = vpow2.f32 %v1101_v19  ;;  %v1033_v23 = vmin.f32 %v6735_v20, 0.0  ;;  %v6740_v24 = vadd.f32 %v6689_v48, %v736_v22  ;;  %v1097_v27 = vmul.f32 1.442695, %v1028_v21 }
  0xe4   : > { %v5474_v28 = vpop.f32.mrf.mxu0  ;;  %vm969_vm10 = vcmp.gt.f32.partialorder %v6735_v20, 0.0 }
  0xe5   : > { %v1107_v29 = vmul.f32 1.442695, %v1033_v23  ;;  %v1031_v30 = vmin.f32 %v6740_v24, 0.0  ;;  %v6750_v31 = vadd.f32 %v5474_v28, %v6689_v48  ;;  %5743 = vpow2.f32 %v1097_v27 }
  0xe6   : > { %v739_v32 = vpop.f32.mrf.mxu0  ;;  %v5730_v33 = vpop.eup %5729  ;;  %vm967_vm11 = vcmp.gt.f32.partialorder %v6740_v24, 0.0 }
  0xe7   : > { %v1103_v34 = vmul.f32 1.442695, %v1031_v30  ;;  %v1034_v35 = vmin.f32 %v6750_v31, 0.0  ;;  %v6754_v37 = vadd.f32 %v6689_v48, %v739_v32  ;;  %5745 = vpow2.f32 %v1107_v29 }
  0xe8   : > { %v5732_v36 = vpop.eup %5731  ;;  %v5477_v38 = vpop.f32.mrf.mxu0  ;;  %v4769_v49 = vadd.f32 -1.0, %v5730_v33  ;;  %vm970_vm12 = vcmp.gt.f32.partialorder %v6750_v31, 0.0 }
  0xe9   : > { %v5734_v39 = vpop.eup %5733  ;;  %v1109_v40 = vmul.f32 1.442695, %v1034_v35  ;;  %v6757_v41 = vadd.f32 %v5477_v38, %v6689_v48  ;;  %5747 = vpow2.f32 %v1103_v34  ;;  %v1032_v42 = vmin.f32 %v6754_v37, 0.0 }
  0xea   : > { %v752_v43 = vpop.f32.mrf.mxu0  ;;  %v4772_v44 = vadd.f32 -1.0, %v5732_v36  ;;  %v5736_v45 = vpop.eup %5735  ;;  %v4771_v57 = vadd.f32 -1.0, %v5734_v39  ;;  %v1279_v8 = vsel %vm959_vm4, %v6695_v52, %v4769_v49  ;;  %vm968_vm13 = vcmp.gt.f32.partialorder %v6754_v37, 0.0 }
  0xeb   : > { %5749 = vpow2.f32 %v1109_v40  ;;  %v1037_v46 = vmin.f32 %v6757_v41, 0.0  ;;  %v6762_v47 = vadd.f32 %v6689_v48, %v752_v43  ;;  %v1105_v54 = vmul.f32 1.442695, %v1032_v42 }
  0xec   : > { %v5478_v55 = vpop.f32.mrf.mxu0  ;;  %v4770_v56 = vadd.f32 -1.0, %v5736_v45  ;;  %v5738_v62 = vpop.eup %5737  ;;  %v1282_v3 = vsel %vm962_vm2, %v6706_v58, %v4772_v44  ;;  %vm973_vm14 = vcmp.gt.f32.partialorder %v6757_v41, 0.0 }
  0xed   : > { %v1115_v59 = vmul.f32 1.442695, %v1037_v46  ;;  %v1035_v60 = vmin.f32 %v6762_v47, 0.0  ;;  %v6773_v61 = vadd.f32 %v5478_v55, %v6689_v48  ;;  %5751 = vpow2.f32 %v1105_v54 }
  0xee   : > { %v755_v0 = vpop.f32.mrf.mxu0  ;;  %v1280_v1 = vsel %vm960_vm3, %v6710_v63, %v4770_v56  ;;  %v5740_v4 = vpop.eup %5739  ;;  %v1281_v63 = vsel %vm961_vm5, %v6692_v50, %v4771_v57  ;;  %v4775_v19 = vadd.f32 -1.0, %v5738_v62  ;;  %vm971_vm15 = vcmp.gt.f32.partialorder %v6762_v47, 0.0 }
  0xef   : > { %v1111_v5 = vmul.f32 1.442695, %v1035_v60  ;;  %v1038_v7 = vmin.f32 %v6773_v61, 0.0  ;;  %5753 = vpow2.f32 %v1115_v59  ;;  %v6783_v10 = vadd.f32 %v6689_v48, %v755_v0 }
  0xf0   : > { %v5742_v9 = vpop.eup %5741  ;;  %v5481_v11 = vpop.f32.mrf.mxu0  ;;  %v1343_v12 = vpack.c.bf16 %v1280_v1, %v1279_v8  ;;  %v1344_v15 = vpack.c.bf16 %v1282_v3, %v1281_v63  ;;  %v4773_v23 = vadd.f32 -1.0, %v5740_v4  ;;  %v1285_v36 = vsel %vm965_vm6, %v6713_v2, %v4775_v19 }
  0xf1   : > { %v1117_v14 = vmul.f32 1.442695, %v1038_v7  ;;  %v6787_v58 = vadd.f32 %v5481_v11, %v6689_v48  ;;  %v4776_v16 = vadd.f32 -1.0, %v5742_v9  ;;  %5755 = vpow2.f32 %v1111_v5 }
  0xf2   : > { %v1036_v52 = vmin.f32 %v6783_v10, 0.0  ;;  %5543 = vmatprep.mubr.bf16.mxu1 %v1343_v12  ;;  %v768_v18 = vpop.f32.mrf.mxu0  ;;  %v5744_v21 = vpop.eup %5743  ;;  %v1283_v42 = vsel %vm963_vm9, %v6718_v6, %v4773_v23  ;;  %vm974_vm0 = vcmp.gt.f32.partialorder %v6773_v61, 0.0  ;;  %vm972_vm1 = vcmp.gt.f32.partialorder %v6783_v10, 0.0 }
  0xf3   : > { %5757 = vpow2.f32 %v1117_v14  ;;  %v1041_v22 = vmin.f32 %v6787_v58, 0.0  ;;  %5544 = vmatmul.mubr.bf16.vlgmr.msra.gmra.mxu1 %v1344_v15  ;;  %v6793_v50 = vadd.f32 %v6689_v48, %v768_v18  ;;  %v4774_v27 = vadd.f32 -1.0, %v5744_v21 }
  0xf4   : > { %v1113_v25 = vmul.f32 1.442695, %v1036_v52  ;;  %v5482_v26 = vpop.f32.mrf.mxu0  ;;  %v1286_v32 = vsel %vm966_vm7, %v6728_v13, %v4776_v16  ;;  %v5746_v33 = vpop.eup %5745  ;;  %vm977_vm2 = vcmp.gt.f32.partialorder %v6787_v58, 0.0 }
  0xf5   : > { %v1123_v28 = vmul.f32 1.442695, %v1041_v22  ;;  %v1039_v29 = vmin.f32 %v6793_v50, 0.0  ;;  %v6799_v30 = vadd.f32 %v5482_v26, %v6689_v48  ;;  %v1284_v35 = vsel %vm964_vm8, %v6732_v17, %v4774_v27 }
  0xf6   : > { %5759 = vpow2.f32 %v1113_v25  ;;  %v771_v34 = vpop.f32.mrf.mxu0  ;;  %v5748_v38 = vpop.eup %5747  ;;  %v1345_v45 = vpack.c.bf16 %v1284_v35, %v1283_v42  ;;  %v1346_v46 = vpack.c.bf16 %v1286_v32, %v1285_v36  ;;  %v4779_v53 = vadd.f32 -1.0, %v5746_v33 }
  0xf7   : > { %5761 = vpow2.f32 %v1123_v28  ;;  %v1119_v39 = vmul.f32 1.442695, %v1039_v29  ;;  %v1042_v40 = vmin.f32 %v6799_v30, 0.0  ;;  %v6810_v13 = vadd.f32 %v6689_v48, %v771_v34 }
  0xf8   : > { %v5750_v43 = vpop.eup %5749  ;;  %v5485_v44 = vpop.f32.mrf.mxu0  ;;  %5547 = vmatprep.mubr.bf16.mxu1 %v1345_v45  ;;  %v4777_v57 = vadd.f32 -1.0, %v5748_v38  ;;  %v1289_v9 = vsel %vm969_vm10, %v6735_v20, %v4779_v53  ;;  %vm978_vm3 = vcmp.gt.f32.partialorder %v6799_v30, 0.0  ;;  %vm975_vm4 = vcmp.gt.f32.partialorder %v6793_v50, 0.0 }
  0xf9   : > { %5763 = vpow2.f32 %v1119_v39  ;;  %v1125_v17 = vmul.f32 1.442695, %v1042_v40  ;;  %v6813_v49 = vadd.f32 %v5485_v44, %v6689_v48  ;;  %v4780_v2 = vadd.f32 -1.0, %v5750_v43 }
  0xfa   : > { %v1040_v51 = vmin.f32 %v6810_v13, 0.0  ;;  %v784_v6 = vpop.f32.mrf.mxu0  ;;  %v5752_v54 = vpop.eup %5751  ;;  %v1287_v14 = vsel %vm967_vm11, %v6740_v24, %v4777_v57  ;;  %vm976_vm5 = vcmp.gt.f32.partialorder %v6810_v13, 0.0 }
  0xfb   : > { %5765 = vpow2.f32 %v1125_v17  ;;  %v1045_v55 = vmin.f32 %v6813_v49, 0.0  ;;  %5548 = vmatmul.mubr.bf16.gmra.mxu1 %v1346_v46  ;;  %v6820_v56 = vadd.f32 %v6689_v48, %v784_v6  ;;  %v4778_v62 = vadd.f32 -1.0, %v5752_v54 }
  0xfc   : > { %v1121_v59 = vmul.f32 1.442695, %v1040_v51  ;;  %v5486_v60 = vpop.f32.mrf.mxu0  ;;  %v5754_v0 = vpop.eup %5753  ;;  %v1290_v5 = vsel %vm970_vm12, %v6750_v31, %v4780_v2  ;;  %vm981_vm6 = vcmp.gt.f32.partialorder %v6813_v49, 0.0 }
  0xfd   : > { %v1131_v1 = vmul.f32 1.442695, %v1045_v55  ;;  %v1043_v3 = vmin.f32 %v6820_v56, 0.0  ;;  %v6826_v4 = vadd.f32 %v5486_v60, %v6689_v48  ;;  %v1288_v8 = vsel %vm968_vm13, %v6754_v37, %v4778_v62 }
  0xfe   : > { %5767 = vpow2.f32 %v1121_v59  ;;  %v787_v7 = vpop.f32.mrf.mxu0  ;;  %v5756_v11 = vpop.eup %5755  ;;  %v1347_v52 = vpack.c.bf16 %v1288_v8, %v1287_v14  ;;  %v1348_v37 = vpack.c.bf16 %v1290_v5, %v1289_v9  ;;  %v4783_v18 = vadd.f32 -1.0, %v5754_v0 }
  0xff   : > { %5769 = vpow2.f32 %v1131_v1  ;;  %v1127_v12 = vmul.f32 1.442695, %v1043_v3  ;;  %v1046_v63 = vmin.f32 %v6826_v4, 0.0  ;;  %v6839_v15 = vadd.f32 %v6689_v48, %v787_v7 }
 0x100   : > { %v5758_v31 = vpop.eup %5757  ;;  %v5489_v16 = vpop.f32.mrf.mxu0  ;;  %5551 = vmatprep.mubr.bf16.mxu1 %v1347_v52  ;;  %v4781_v23 = vadd.f32 -1.0, %v5756_v11  ;;  %v1293_v34 = vsel %vm973_vm14, %v6757_v41, %v4783_v18  ;;  %vm979_vm7 = vcmp.gt.f32.partialorder %v6820_v56, 0.0  ;;  %vm982_vm8 = vcmp.gt.f32.partialorder %v6826_v4, 0.0 }
 0x101   : > { %5771 = vpow2.f32 %v1127_v12  ;;  %v1133_v19 = vmul.f32 1.442695, %v1046_v63  ;;  %v6842_v20 = vadd.f32 %v5489_v16, %v6689_v48  ;;  %v4784_v21 = vadd.f32 -1.0, %v5758_v31 }
 0x102   : > { %v1044_v24 = vmin.f32 %v6839_v15, 0.0  ;;  %v800_v22 = vpop.f32.mrf.mxu0  ;;  %v1291_v43 = vsel %vm971_vm15, %v6762_v47, %v4781_v23  ;;  %vm980_vm9 = vcmp.gt.f32.partialorder %v6839_v15, 0.0 }
 0x103   : > { %v5760_v25 = vpop.eup %5759  ;;  %5773 = vpow2.f32 %v1133_v19  ;;  %v1049_v26 = vmin.f32 %v6842_v20, 0.0  ;;  %5552 = vmatmul.mubr.bf16.gmra.mxu1 %v1348_v37  ;;  %v6850_v27 = vadd.f32 %v6689_v48, %v800_v22  ;;  %v1294_v39 = vsel %vm974_vm0, %v6773_v61, %v4784_v21 }
 0x104   : > { %v5762_v28 = vpop.eup %5761  ;;  %v1129_v29 = vmul.f32 1.442695, %v1044_v24  ;;  %v5490_v32 = vpop.f32.mrf.mxu0  ;;  %v4782_v33 = vadd.f32 -1.0, %v5760_v25  ;;  %v1350_v51 = vpack.c.bf16 %v1294_v39, %v1293_v34  ;;  %vm985_vm10 = vcmp.gt.f32.partialorder %v6842_v20, 0.0 }
 0x105   : > { %v1139_v35 = vmul.f32 1.442695, %v1049_v26  ;;  %v1047_v36 = vmin.f32 %v6850_v27, 0.0  ;;  %v6858_v38 = vadd.f32 %v5490_v32, %v6689_v48  ;;  %v4787_v46 = vadd.f32 -1.0, %v5762_v28 }
 0x106   : > { %v5764_v40 = vpop.eup %5763  ;;  %5775 = vpow2.f32 %v1129_v29  ;;  %v803_v42 = vpop.f32.mrf.mxu0  ;;  %v1292_v41 = vsel %vm972_vm1, %v6783_v10, %v4782_v33  ;;  %vm983_vm11 = vcmp.gt.f32.partialorder %v6850_v27, 0.0 }
 0x107   : > { %5777 = vpow2.f32 %v1139_v35  ;;  %v1135_v44 = vmul.f32 1.442695, %v1047_v36  ;;  %v1050_v45 = vmin.f32 %v6858_v38, 0.0  ;;  %v6872_v61 = vadd.f32 %v6689_v48, %v803_v42 }
 0x108   : > { %v5766_v17 = vpop.eup %5765  ;;  %v1349_v2 = vpack.c.bf16 %v1292_v41, %v1291_v43  ;;  %v5493_v6 = vpop.f32.mrf.mxu0  ;;  %v4785_v53 = vadd.f32 -1.0, %v5764_v40  ;;  %v1297_v0 = vsel %vm977_vm2, %v6787_v58, %v4787_v46  ;;  %vm986_vm12 = vcmp.gt.f32.partialorder %v6858_v38, 0.0 }
 0x109   : > { %5779 = vpow2.f32 %v1135_v44  ;;  %v1141_v54 = vmul.f32 1.442695, %v1050_v45  ;;  %v6875_v47 = vadd.f32 %v5493_v6, %v6689_v48  ;;  %v4788_v55 = vadd.f32 -1.0, %v5766_v17 }
 0x10a   : > { %v1048_v10 = vmin.f32 %v6872_v61, 0.0  ;;  %5555 = vmatprep.mubr.bf16.mxu1 %v1349_v2  ;;  %v816_v57 = vpop.f32.mrf.mxu0  ;;  %v1295_v58 = vsel %vm975_vm4, %v6793_v50, %v4785_v53  ;;  %vm984_vm13 = vcmp.gt.f32.partialorder %v6872_v61, 0.0 }
 0x10b   : > { %v5768_v59 = vpop.eup %5767  ;;  %5781 = vpow2.f32 %v1141_v54  ;;  %5556 = vmatmul.mubr.bf16.gmra.mxu1 %v1350_v51  ;;  %v1053_v60 = vmin.f32 %v6875_v47, 0.0  ;;  %v6882_v62 = vadd.f32 %v6689_v48, %v816_v57  ;;  %v1298_v8 = vsel %vm978_vm3, %v6799_v30, %v4788_v55 }
 0x10c   : > { %v5770_v1 = vpop.eup %5769  ;;  %v1137_v3 = vmul.f32 1.442695, %v1048_v10  ;;  %v5494_v5 = vpop.f32.mrf.mxu0  ;;  %v4786_v7 = vadd.f32 -1.0, %v5768_v59  ;;  %v1352_v30 = vpack.c.bf16 %v1298_v8, %v1297_v0  ;;  %vm989_vm14 = vcmp.gt.f32.partialorder %v6875_v47, 0.0 }
 0x10d   : > { %v1147_v9 = vmul.f32 1.442695, %v1053_v60  ;;  %v1051_v11 = vmin.f32 %v6882_v62, 0.0  ;;  %v6893_v12 = vadd.f32 %v5494_v5, %v6689_v48  ;;  %v4791_v37 = vadd.f32 -1.0, %v5770_v1 }
 0x10e   : > { %v5772_v63 = vpop.eup %5771  ;;  %5783 = vpow2.f32 %v1137_v3  ;;  %v1296_v14 = vsel %vm976_vm5, %v6810_v13, %v4786_v7  ;;  %v819_v31 = vpop.f32.mrf.mxu0  ;;  %vm987_vm0 = vcmp.gt.f32.partialorder %v6882_v62, 0.0 }
 0x10f   : > { %5785 = vpow2.f32 %v1147_v9  ;;  %v1143_v16 = vmul.f32 1.442695, %v1051_v11  ;;  %v1054_v52 = vmin.f32 %v6893_v12, 0.0  ;;  %v1351_v19 = vpack.c.bf16 %v1296_v14, %v1295_v58 }
 0x110   : > { %v5774_v18 = vpop.eup %5773  ;;  %v6905_v50 = vadd.f32 %v6689_v48, %v819_v31  ;;  %v4789_v21 = vadd.f32 -1.0, %v5772_v63  ;;  %v5497_v24 = vpop.f32.mrf.mxu0  ;;  %v1301_v29 = vsel %vm981_vm6, %v6813_v49, %v4791_v37  ;;  %vm990_vm15 = vcmp.gt.f32.partialorder %v6893_v12, 0.0 }
 0x111   : > { %5787 = vpow2.f32 %v1143_v16  ;;  %v1149_v22 = vmul.f32 1.442695, %v1054_v52  ;;  %v4792_v23 = vadd.f32 -1.0, %v5774_v18  ;;  %v6908_v13 = vadd.f32 %v5497_v24, %v6689_v48  ;;  %5559 = vmatprep.mubr.bf16.mxu1 %v1351_v19 }
 0x112   : > { %v1052_v25 = vmin.f32 %v6905_v50, 0.0  ;;  %v832_v26 = vpop.f32.mrf.mxu0  ;;  %v1299_v39 = vsel %vm979_vm7, %v6820_v56, %v4789_v21  ;;  %vm988_vm1 = vcmp.gt.f32.partialorder %v6905_v50, 0.0 }
 0x113   : > { %v5776_v28 = vpop.eup %5775  ;;  %5789 = vpow2.f32 %v1149_v22  ;;  %5560 = vmatmul.mubr.bf16.gmra.mxu1 %v1352_v30  ;;  %v1302_v32 = vsel %vm982_vm8, %v6826_v4, %v4792_v23  ;;  %v1057_v33 = vmin.f32 %v6908_v13, 0.0  ;;  %v6923_v40 = vadd.f32 %v6689_v48, %v832_v26 }
 0x114   : > { %v5778_v34 = vpop.eup %5777  ;;  %v1145_v35 = vmul.f32 1.442695, %v1052_v25  ;;  %v4790_v36 = vadd.f32 -1.0, %v5776_v28  ;;  %v5498_v42 = vpop.f32.mrf.mxu0  ;;  %v1354_v44 = vpack.c.bf16 %v1302_v32, %v1301_v29  ;;  %vm993_vm2 = vcmp.gt.f32.partialorder %v6908_v13, 0.0 }
 0x115   : > { %v1155_v49 = vmul.f32 1.442695, %v1057_v33  ;;  %v6927_v43 = vadd.f32 %v5498_v42, %v6689_v48  ;;  %v1055_v45 = vmin.f32 %v6923_v40, 0.0  ;;  %v4795_v2 = vadd.f32 -1.0, %v5778_v34 }
 0x116   : > { %v5780_v4 = vpop.eup %5779  ;;  %5791 = vpow2.f32 %v1145_v35  ;;  %v1300_v41 = vsel %vm980_vm9, %v6839_v15, %v4790_v36  ;;  %v835_v56 = vpop.f32.mrf.mxu0  ;;  %vm991_vm3 = vcmp.gt.f32.partialorder %v6923_v40, 0.0 }
 0x117   : > { %v1353_v46 = vpack.c.bf16 %v1300_v41, %v1299_v39  ;;  %5793 = vpow2.f32 %v1155_v49  ;;  %v1058_v17 = vmin.f32 %v6927_v43, 0.0  ;;  %v1151_v6 = vmul.f32 1.442695, %v1055_v45 }
 0x118   : > { %v5782_v51 = vpop.eup %5781  ;;  %v4793_v53 = vadd.f32 -1.0, %v5780_v4  ;;  %v6936_v54 = vadd.f32 %v6689_v48, %v835_v56  ;;  %v5501_v55 = vpop.f32.mrf.mxu0  ;;  %v1305_v3 = vsel %vm985_vm10, %v6842_v20, %v4795_v2  ;;  %vm994_vm4 = vcmp.gt.f32.partialorder %v6927_v43, 0.0 }
 0x119   : > { %5563 = vmatprep.mubr.bf16.mxu1 %v1353_v46  ;;  %v1157_v15 = vmul.f32 1.442695, %v1058_v17  ;;  %v4796_v10 = vadd.f32 -1.0, %v5782_v51  ;;  %v6940_v57 = vadd.f32 %v5501_v55, %v6689_v48  ;;  %5795 = vpow2.f32 %v1151_v6 }
 0x11a   : > { %v1056_v59 = vmin.f32 %v6936_v54, 0.0  ;;  %v848_v60 = vpop.f32.mrf.mxu0  ;;  %v1303_v1 = vsel %vm983_vm11, %v6850_v27, %v4793_v53  ;;  %vm992_vm5 = vcmp.gt.f32.partialorder %v6936_v54, 0.0 }
 0x11b   : > { %v5784_v0 = vpop.eup %5783  ;;  %5564 = vmatmul.mubr.bf16.gmra.mxu1 %v1354_v44  ;;  %5797 = vpow2.f32 %v1157_v15  ;;  %v1061_v5 = vmin.f32 %v6940_v57, 0.0  ;;  %v1306_v11 = vsel %vm986_vm12, %v6858_v38, %v4796_v10  ;;  %v6955_v58 = vadd.f32 %v6689_v48, %v848_v60 }
 0x11c   : > { %v5786_v7 = vpop.eup %5785  ;;  %v4794_v8 = vadd.f32 -1.0, %v5784_v0  ;;  %v1153_v9 = vmul.f32 1.442695, %v1056_v59  ;;  %v5502_v63 = vpop.f32.mrf.mxu0  ;;  %v1356_v52 = vpack.c.bf16 %v1306_v11, %v1305_v3  ;;  %vm997_vm6 = vcmp.gt.f32.partialorder %v6940_v57, 0.0 }
 0x11d   : > { %v1163_v27 = vmul.f32 1.442695, %v1061_v5  ;;  %v6959_v14 = vadd.f32 %v5502_v63, %v6689_v48  ;;  %v1059_v38 = vmin.f32 %v6955_v58, 0.0  ;;  %v4799_v37 = vadd.f32 -1.0, %v5786_v7 }
 0x11e   : > { %v5788_v20 = vpop.eup %5787  ;;  %v1304_v31 = vsel %vm984_vm13, %v6872_v61, %v4794_v8  ;;  %5799 = vpow2.f32 %v1153_v9  ;;  %v851_v30 = vpop.f32.mrf.mxu0  ;;  %vm995_vm7 = vcmp.gt.f32.partialorder %v6955_v58, 0.0 }
 0x11f   : > { %v1355_v16 = vpack.c.bf16 %v1304_v31, %v1303_v1  ;;  %5801 = vpow2.f32 %v1163_v27  ;;  %v4797_v19 = vadd.f32 -1.0, %v5788_v20  ;;  %v1159_v21 = vmul.f32 1.442695, %v1059_v38 }
 0x120   : > { %v5790_v18 = vpop.eup %5789  ;;  %v1062_v24 = vmin.f32 %v6959_v14, 0.0  ;;  %v6968_v22 = vadd.f32 %v6689_v48, %v851_v30  ;;  %v5505_v23 = vpop.f32.mrf.mxu0  ;;  %v1309_v33 = vsel %vm989_vm14, %v6875_v47, %v4799_v37  ;;  %vm998_vm8 = vcmp.gt.f32.partialorder %v6959_v14, 0.0 }
 0x121   : > { %5567 = vmatprep.mubr.bf16.mxu1 %v1355_v16  ;;  %v4800_v61 = vadd.f32 -1.0, %v5790_v18  ;;  %v6972_v25 = vadd.f32 %v5505_v23, %v6689_v48  ;;  %5803 = vpow2.f32 %v1159_v21  ;;  %v1307_v49 = vsel %vm987_vm0, %v6882_v62, %v4797_v19 }
 0x122   : > { %v1165_v26 = vmul.f32 1.442695, %v1062_v24  ;;  %v1060_v28 = vmin.f32 %v6968_v22, 0.0  ;;  %v864_v29 = vpop.f32.mrf.mxu0  ;;  %vm996_vm9 = vcmp.gt.f32.partialorder %v6968_v22, 0.0 }
 0x123   : > { %v5792_v32 = vpop.eup %5791  ;;  %5568 = vmatmul.mubr.bf16.gmra.mxu1 %v1356_v52  ;;  %v1310_v34 = vsel %vm990_vm15, %v6893_v12, %v4800_v61  ;;  %v1065_v35 = vmin.f32 %v6972_v25, 0.0  ;;  %v6984_v36 = vadd.f32 %v6689_v48, %v864_v29  ;;  %vm1001_vm10 = vcmp.gt.f32.partialorder %v6972_v25, 0.0 }
 0x124   : > { %v5794_v39 = vpop.eup %5793  ;;  %v4798_v42 = vadd.f32 -1.0, %v5792_v32  ;;  %5805 = vpow2.f32 %v1165_v26  ;;  %v1161_v4 = vmul.f32 1.442695, %v1060_v28  ;;  %v5506_v41 = vpop.f32.mrf.mxu0  ;;  %v1358_v45 = vpack.c.bf16 %v1310_v34, %v1309_v33 }
 0x125   : > { %v1171_v47 = vmul.f32 1.442695, %v1065_v35  ;;  %v1063_v44 = vmin.f32 %v6984_v36, 0.0  ;;  %v6995_v56 = vadd.f32 %v5506_v41, %v6689_v48  ;;  %v4803_v2 = vadd.f32 -1.0, %v5794_v39 }
 0x126   : > { %v1308_v12 = vsel %vm988_vm1, %v6905_v50, %v4798_v42  ;;  %5807 = vpow2.f32 %v1161_v4  ;;  %v867_v46 = vpop.f32.mrf.mxu0  ;;  %v5796_v17 = vpop.eup %5795  ;;  %vm999_vm11 = vcmp.gt.f32.partialorder %v6984_v36, 0.0 }
 0x127   : > { %v1357_v62 = vpack.c.bf16 %v1308_v12, %v1307_v49  ;;  %5809 = vpow2.f32 %v1171_v47  ;;  %v1167_v51 = vmul.f32 1.442695, %v1063_v44  ;;  %v4801_v53 = vadd.f32 -1.0, %v5796_v17 }
 0x128   : > { %v5798_v6 = vpop.eup %5797  ;;  %v1066_v55 = vmin.f32 %v6995_v56, 0.0  ;;  %v7000_v15 = vadd.f32 %v6689_v48, %v867_v46  ;;  %v5509_v50 = vpop.f32.mrf.mxu0  ;;  %v1313_v7 = vsel %vm993_vm2, %v6908_v13, %v4803_v2  ;;  %vm1002_vm12 = vcmp.gt.f32.partialorder %v6995_v56, 0.0 }
 0x129   : > { %5571 = vmatprep.mubr.bf16.mxu1 %v1357_v62  ;;  %v4804_v10 = vadd.f32 -1.0, %v5798_v6  ;;  %5811 = vpow2.f32 %v1167_v51  ;;  %v7004_v59 = vadd.f32 %v5509_v50, %v6689_v48  ;;  %v1311_v5 = vsel %vm991_vm3, %v6923_v40, %v4801_v53 }
 0x12a   : > { %v1173_v60 = vmul.f32 1.442695, %v1066_v55  ;;  %v1064_v0 = vmin.f32 %v7000_v15, 0.0  ;;  %v880_v1 = vpop.f32.mrf.mxu0  ;;  %vm1000_vm13 = vcmp.gt.f32.partialorder %v7000_v15, 0.0 }
 0x12b   : > { %v5800_v3 = vpop.eup %5799  ;;  %5572 = vmatmul.mubr.bf16.gmra.mxu1 %v1358_v45  ;;  %v1069_v8 = vmin.f32 %v7004_v59, 0.0  ;;  %v7016_v9 = vadd.f32 %v6689_v48, %v880_v1  ;;  %v1314_v27 = vsel %vm994_vm4, %v6927_v43, %v4804_v10  ;;  %vm1005_vm14 = vcmp.gt.f32.partialorder %v7004_v59, 0.0 }
 0x12c   : > { %v5802_v11 = vpop.eup %5801  ;;  %v4802_v63 = vadd.f32 -1.0, %v5800_v3  ;;  %5813 = vpow2.f32 %v1173_v60  ;;  %v1169_v20 = vmul.f32 1.442695, %v1064_v0  ;;  %v5510_v31 = vpop.f32.mrf.mxu0  ;;  %v1360_v43 = vpack.c.bf16 %v1314_v27, %v1313_v7 }
 0x12d   : > { %v1179_v38 = vmul.f32 1.442695, %v1069_v8  ;;  %v1067_v40 = vmin.f32 %v7016_v9, 0.0  ;;  %v7027_v30 = vadd.f32 %v5510_v31, %v6689_v48  ;;  %v4807_v18 = vadd.f32 -1.0, %v5802_v11 }
 0x12e   : > { %v1312_v13 = vsel %vm992_vm5, %v6936_v54, %v4802_v63  ;;  %5815 = vpow2.f32 %v1169_v20  ;;  %v883_v16 = vpop.f32.mrf.mxu0  ;;  %v5804_v52 = vpop.eup %5803  ;;  %vm1003_vm0 = vcmp.gt.f32.partialorder %v7016_v9, 0.0 }
 0x12f   : > { %v1359_v37 = vpack.c.bf16 %v1312_v13, %v1311_v5  ;;  %v1175_v19 = vmul.f32 1.442695, %v1067_v40  ;;  %5817 = vpow2.f32 %v1179_v38  ;;  %v4805_v21 = vadd.f32 -1.0, %v5804_v52 }
 0x130   : > { %v1070_v24 = vmin.f32 %v7027_v30, 0.0  ;;  %v7031_v23 = vadd.f32 %v6689_v48, %v883_v16  ;;  %v5513_v61 = vpop.f32.mrf.mxu0  ;;  %v1317_v34 = vsel %vm997_vm6, %v6940_v57, %v4807_v18  ;;  %vm1006_vm15 = vcmp.gt.f32.partialorder %v7027_v30, 0.0 }
 0x131   : > { %v5806_v26 = vpop.eup %5805  ;;  %5575 = vmatprep.mubr.bf16.mxu1 %v1359_v37  ;;  %5819 = vpow2.f32 %v1175_v19  ;;  %v7036_v54 = vadd.f32 %v5513_v61, %v6689_v48  ;;  %v1315_v41 = vsel %vm995_vm7, %v6955_v58, %v4805_v21 }
 0x132   : > { %v4808_v28 = vadd.f32 -1.0, %v5806_v26  ;;  %v1181_v29 = vmul.f32 1.442695, %v1070_v24  ;;  %v896_v32 = vpop.f32.mrf.mxu0  ;;  %v1068_v35 = vmin.f32 %v7031_v23, 0.0  ;;  %vm1004_vm1 = vcmp.gt.f32.partialorder %v7031_v23, 0.0 }
 0x133   : > { %v5808_v33 = vpop.eup %5807  ;;  %5576 = vmatmul.mubr.bf16.gmra.mxu1 %v1360_v43  ;;  %v1073_v39 = vmin.f32 %v7036_v54, 0.0  ;;  %v7045_v42 = vadd.f32 %v6689_v48, %v896_v32  ;;  %vm1009_vm2 = vcmp.gt.f32.partialorder %v7036_v54, 0.0 }
 0x134   : > { %v5810_v49 = vpop.eup %5809  ;;  %v4806_v4 = vadd.f32 -1.0, %v5808_v33  ;;  %v1318_v47 = vsel %vm998_vm8, %v6959_v14, %v4808_v28  ;;  %5821 = vpow2.f32 %v1181_v29  ;;  %v5514_v44 = vpop.f32.mrf.mxu0  ;;  %v1177_v57 = vmul.f32 1.442695, %v1068_v35 }
 0x135   : > { %v1187_v12 = vmul.f32 1.442695, %v1073_v39  ;;  %v1362_v17 = vpack.c.bf16 %v1318_v47, %v1317_v34  ;;  %v1071_v62 = vmin.f32 %v7045_v42, 0.0  ;;  %v7059_v58 = vadd.f32 %v5514_v44, %v6689_v48 }
 0x136   : > { %v5812_v45 = vpop.eup %5811  ;;  %v1316_v46 = vsel %vm996_vm9, %v6968_v22, %v4806_v4  ;;  %v899_v2 = vpop.f32.mrf.mxu0  ;;  %5823 = vpow2.f32 %v1177_v57  ;;  %v4811_v6 = vadd.f32 -1.0, %v5810_v49  ;;  %vm1007_vm4 = vcmp.gt.f32.partialorder %v7045_v42, 0.0 }
 0x137   : > { %v1361_v51 = vpack.c.bf16 %v1316_v46, %v1315_v41  ;;  %v4809_v14 = vadd.f32 -1.0, %v5812_v45  ;;  %5825 = vpow2.f32 %v1187_v12  ;;  %v1183_v53 = vmul.f32 1.442695, %v1071_v62 }
 0x138   : > { %v1074_v55 = vmin.f32 %v7059_v58, 0.0  ;;  %v5517_v50 = vpop.f32.mrf.mxu0  ;;  %v7065_v22 = vadd.f32 %v6689_v48, %v899_v2  ;;  %v1321_v8 = vsel %vm1001_vm10, %v6972_v25, %v4811_v6  ;;  %vm1010_vm3 = vcmp.gt.f32.partialorder %v7059_v58, 0.0 }
 0x139   : > { %v5814_v10 = vpop.eup %5813  ;;  %5579 = vmatprep.mubr.bf16.mxu1 %v1361_v51  ;;  %v7068_v60 = vadd.f32 %v5517_v50, %v6689_v48  ;;  %5827 = vpow2.f32 %v1183_v53  ;;  %v1319_v7 = vsel %vm999_vm11, %v6984_v36, %v4809_v14 }
 0x13a   : > { %v4812_v0 = vadd.f32 -1.0, %v5814_v10  ;;  %v1189_v1 = vmul.f32 1.442695, %v1074_v55  ;;  %v912_v3 = vpop.f32.mrf.mxu0  ;;  %v1072_v11 = vmin.f32 %v7065_v22, 0.0  ;;  %vm1008_vm5 = vcmp.gt.f32.partialorder %v7065_v22, 0.0 }
 0x13b   : > { %v5816_v5 = vpop.eup %5815  ;;  %5580 = vmatmul.mubr.bf16.gmra.mxu1 %v1362_v17  ;;  %v1077_v63 = vmin.f32 %v7068_v60, 0.0  ;;  %v7083_v31 = vadd.f32 %v6689_v48, %v912_v3  ;;  %vm1013_vm6 = vcmp.gt.f32.partialorder %v7068_v60, 0.0 }
 0x13c   : > { %v4810_v27 = vadd.f32 -1.0, %v5816_v5  ;;  %v1322_v20 = vsel %vm1002_vm12, %v6995_v56, %v4812_v0  ;;  %5829 = vpow2.f32 %v1189_v1  ;;  %v5518_v38 = vpop.f32.mrf.mxu0  ;;  %v5818_v40 = vpop.eup %5817  ;;  %v1185_v36 = vmul.f32 1.442695, %v1072_v11 }
 0x13d   : > { %v1195_v13 = vmul.f32 1.442695, %v1077_v63  ;;  %v1075_v52 = vmin.f32 %v7083_v31, 0.0  ;;  %v7090_v37 = vadd.f32 %v5518_v38, %v6689_v48  ;;  %v1364_v18 = vpack.c.bf16 %v1322_v20, %v1321_v8  ;;  %v7098_v48 = vld [vmem:[%s9151_s5] ss:$0 sm:$0xff] }
 0x13e   : > { %v5820_v16 = vpop.eup %5819  ;;  %v1320_v25 = vsel %vm1000_vm13, %v7000_v15, %v4810_v27  ;;  %v915_v43 = vpop.f32.mrf.mxu0  ;;  %5831 = vpow2.f32 %v1185_v36  ;;  %v4815_v19 = vadd.f32 -1.0, %v5818_v40  ;;  %vm1011_vm8 = vcmp.gt.f32.partialorder %v7083_v31, 0.0 }
 0x13f   : > { %v1363_v56 = vpack.c.bf16 %v1320_v25, %v1319_v7  ;;  %5833 = vpow2.f32 %v1195_v13  ;;  %v1191_v21 = vmul.f32 1.442695, %v1075_v52  ;;  %v1078_v24 = vmin.f32 %v7090_v37, 0.0 }
 0x140   : > { %v5521_v61 = vpop.f32.mrf.mxu0  ;;  %v4813_v15 = vadd.f32 -1.0, %v5820_v16  ;;  %v7101_v28 = vadd.f32 %v7098_v48, %v915_v43  ;;  %v1325_v4 = vsel %vm1005_vm14, %v7004_v59, %v4815_v19  ;;  %vm1014_vm7 = vcmp.gt.f32.partialorder %v7090_v37, 0.0 }
 0x141   : > { %v5822_v26 = vpop.eup %5821  ;;  %5583 = vmatprep.mubr.bf16.mxu1 %v1363_v56  ;;  %v7104_v29 = vadd.f32 %v7098_v48, %v5521_v61  ;;  %5835 = vpow2.f32 %v1191_v21  ;;  %v1197_v33 = vmul.f32 1.442695, %v1078_v24  ;;  %v5710_v24 = vld [vmem:[%s9149_s3] ss:$8 sps:$4 sm:$0xff]  }
 0x142   : > { %v4816_v32 = vadd.f32 -1.0, %v5822_v26  ;;  %v928_v34 = vpop.f32.mrf.mxu0  ;;  %v1076_v35 = vmin.f32 %v7101_v28, 0.0  ;;  %v1323_v45 = vsel %vm1003_vm0, %v7016_v9, %v4813_v15  ;;  %vm1012_vm9 = vcmp.gt.f32.partialorder %v7101_v28, 0.0 }
 0x143   : > { %5584 = vmatmul.mubr.bf16.gmra.mxu1 %v1364_v18  ;;  %v1081_v39 = vmin.f32 %v7104_v29, 0.0  ;;  %v5824_v49 = vpop.eup %5823  ;;  %5837 = vpow2.f32 %v1197_v33  ;;  %v7117_v47 = vadd.f32 %v7098_v48, %v928_v34  ;;  %vm1017_vm10 = vcmp.gt.f32.partialorder %v7104_v29, 0.0 }
 0x144   : > { %v1326_v41 = vsel %vm1006_vm15, %v7027_v30, %v4816_v32  ;;  %v5522_v44 = vpop.f32.mrf.mxu0  ;;  %v5826_v57 = vpop.eup %5825  ;;  %v4814_v12 = vadd.f32 -1.0, %v5824_v49  ;;  %v1193_v46 = vmul.f32 1.442695, %v1076_v35 }
 0x145   : > { %v1203_v17 = vmul.f32 1.442695, %v1081_v39  ;;  %v1079_v62 = vmin.f32 %v7117_v47, 0.0  ;;  %v7124_v59 = vadd.f32 %v7098_v48, %v5522_v44  ;;  %v1366_v14 = vpack.c.bf16 %v1326_v41, %v1325_v4 }
 0x146   : > { %v931_v2 = vpop.f32.mrf.mxu0  ;;  %v5828_v30 = vpop.eup %5827  ;;  %v1324_v51 = vsel %vm1004_vm1, %v7031_v23, %v4814_v12  ;;  %5839 = vpow2.f32 %v1193_v46  ;;  %v4819_v53 = vadd.f32 -1.0, %v5826_v57  ;;  %v6508_v39 = vmov 0  }
 0x147   : > { %v7130_v6 = vadd.f32 %v7098_v48, %v931_v2  ;;  %v1365_v9 = vpack.c.bf16 %v1324_v51, %v1323_v45  ;;  %5841 = vpow2.f32 %v1203_v17  ;;  %v4817_v10 = vadd.f32 -1.0, %v5828_v30  ;;  %2291 = vmatprep.mubr.bf16.mxu0 %v6508_v39  ;;  %5607 = vmatprep.subr.bf16.mxu1 %v6508_v39 }
 0x148   : > { %v5525_v55 = vpop.f32.mrf.mxu0  ;;  %v1199_v0 = vmul.f32 1.442695, %v1079_v62  ;;  %v1082_v1 = vmin.f32 %v7124_v59, 0.0  ;;  %v1329_v27 = vsel %vm1009_vm2, %v7036_v54, %v4819_v53  ;;  %vm1015_vm11 = vcmp.gt.f32.partialorder %v7117_v47, 0.0 }
 0x149   : > { %v5830_v50 = vpop.eup %5829  ;;  %5587 = vmatprep.mubr.bf16.mxu1 %v1365_v9  ;;  %v1080_v3 = vmin.f32 %v7130_v6, 0.0  ;;  %v7138_v5 = vadd.f32 %v7098_v48, %v5525_v55  ;;  %v1327_v25 = vsel %vm1007_vm4, %v7045_v42, %v4817_v10  ;;  %vm1018_vm12 = vcmp.gt.f32.partialorder %v7124_v59, 0.0 }
 0x14a   : > { %v4820_v23 = vadd.f32 -1.0, %v5830_v50  ;;  %v944_v7 = vpop.f32.mrf.mxu0  ;;  %5843 = vpow2.f32 %v1199_v0  ;;  %v1205_v8 = vmul.f32 1.442695, %v1082_v1  ;;  %vm1016_vm13 = vcmp.gt.f32.partialorder %v7130_v6, 0.0 }
 0x14b   : > { %5588 = vmatmul.mubr.bf16.gmra.mxu1 %v1366_v14  ;;  %v7142_v11 = vadd.f32 %v7098_v48, %v944_v7  ;;  %v5832_v63 = vpop.eup %5831  ;;  %v1201_v38 = vmul.f32 1.442695, %v1080_v3  ;;  %v1085_v40 = vmin.f32 %v7138_v5, 0.0  ;;  %vm1021_vm14 = vcmp.gt.f32.partialorder %v7138_v5, 0.0 }
 0x14c   : > { %v1330_v20 = vsel %vm1010_vm3, %v7059_v58, %v4820_v23  ;;  %v5526_v36 = vpop.f32.mrf.mxu0  ;;  %v5834_v13 = vpop.eup %5833  ;;  %v4818_v16 = vadd.f32 -1.0, %v5832_v63  ;;  %5845 = vpow2.f32 %v1205_v8  ;;  %v5712_v58 = vld [vmem:[%s9149_s3 + $0x4] ss:$8 sps:$4 sm:$0xff]  }
 0x14d   : > { %5847 = vpow2.f32 %v1201_v38  ;;  %v1211_v52 = vmul.f32 1.442695, %v1085_v40  ;;  %v1083_v43 = vmin.f32 %v7142_v11, 0.0  ;;  %v1368_v19 = vpack.c.bf16 %v1330_v20, %v1329_v27  ;;  %2273 = vmatprep.subr.bf16.mxu0 %v5712_v58 }
 0x14e   : > { %v947_v54 = vpop.f32.mrf.mxu0  ;;  %v5836_v56 = vpop.eup %5835  ;;  %v1328_v18 = vsel %vm1008_vm5, %v7065_v22, %v4818_v16  ;;  %v7162_v21 = vadd.f32 %v7098_v48, %v5526_v36  ;;  %v4823_v26 = vadd.f32 -1.0, %v5834_v13  ;;  %2274 = vmatpush1.bf16.msra.mxu0 %v5710_v24  ;;  %vm1019_vm15 = vcmp.gt.f32.partialorder %v7142_v11, 0.0  ;;  %v7208_v36 = vld [vmem:[%s9152_s6] ss:$0 sm:$0xff] }
 0x14f   : > { %v7165_v42 = vadd.f32 %v7098_v48, %v947_v54  ;;  %v1367_v61 = vpack.c.bf16 %v1328_v18, %v1327_v25  ;;  %5849 = vpow2.f32 %v1211_v52  ;;  %v4821_v22 = vadd.f32 -1.0, %v5836_v56  ;;  %3579 = vmatprep.subr.bf16.mxu0 %v6508_v39 }
 0x150   : > { %v5838_v15 = vpop.eup %5837  ;;  %v1207_v32 = vmul.f32 1.442695, %v1083_v43  ;;  %v1086_v33 = vmin.f32 %v7162_v21, 0.0  ;;  %v1333_v4 = vsel %vm1013_vm6, %v7068_v60, %v4823_v26  ;;  %vm1022_vm0 = vcmp.gt.f32.partialorder %v7162_v21, 0.0 }
 0x151   : > { %5591 = vmatprep.mubr.bf16.mxu1 %v1367_v61  ;;  %v4824_v48 = vadd.f32 -1.0, %v5838_v15  ;;  %v1084_v34 = vmin.f32 %v7165_v42, 0.0  ;;  %v1331_v45 = vsel %vm1011_vm8, %v7083_v31, %v4821_v22  ;;  %vm1020_vm1 = vcmp.gt.f32.partialorder %v7165_v42, 0.0 }
 0x152   : > { %5851 = vpow2.f32 %v1207_v32  ;;  %v1213_v35 = vmul.f32 1.442695, %v1086_v33 }
 0x153   : > { %5592 = vmatmul.mubr.bf16.gmra.mxu1 %v1368_v19  ;;  %v5840_v49 = vpop.eup %5839  ;;  %v1334_v41 = vsel %vm1014_vm7, %v7090_v37, %v4824_v48  ;;  %v1209_v44 = vmul.f32 1.442695, %v1084_v34  ;;  %v5713_v19 = vld [vmem:[%s9150_s4 + $0x38] sm:$0xff]  }
 0x154   : > { %v5842_v57 = vpop.eup %5841  ;;  %v4822_v12 = vadd.f32 -1.0, %v5840_v49  ;;  %5853 = vpow2.f32 %v1213_v35  ;;  %v1370_v60 = vpack.c.bf16 %v1334_v41, %v1333_v4  ;;  %5623 = vmatpush1.bf16.msra.mxu1 %v5713_v19  ;;  %v5714_v35 = vld [vmem:[%s9150_s4 + $0x30] sm:$0xff]  }
 0x155   : > { %5855 = vpow2.f32 %v1209_v44  ;;  %v4827_v2 = vadd.f32 -1.0, %v5842_v57  ;;  %5608 = vmatprep.subr.bf16.mxu1 %v6508_v39 }
 0x156   : > { %v1332_v46 = vsel %vm1012_vm9, %v7101_v28, %v4822_v12 }
 0x157   : > { %v5844_v17 = vpop.eup %5843  ;;  %v1369_v62 = vpack.c.bf16 %v1332_v46, %v1331_v45  ;;  %v1337_v9 = vsel %vm1017_vm10, %v7104_v29, %v4827_v2  ;;  %v5715_v2 = vld [vmem:[%s9150_s4 + $0x28] sm:$0xff]  }
 0x158   : > { %v4825_v37 = vadd.f32 -1.0, %v5844_v17  ;;  %5624 = vmatpush1.bf16.msra.mxu1 %v5714_v35 }
 0x159   : > { %v5846_v30 = vpop.eup %5845  ;;  %5595 = vmatprep.mubr.bf16.mxu1 %v1369_v62  ;;  %5609 = vmatprep.subr.bf16.mxu1 %v6508_v39 }
 0x15a   : > { %v5848_v51 = vpop.eup %5847  ;;  %v4828_v31 = vadd.f32 -1.0, %v5846_v30  ;;  %v1335_v28 = vsel %vm1015_vm11, %v7117_v47, %v4825_v37 }
 0x15b   : > { %5596 = vmatmul.mubr.bf16.gmra.mxu1 %v1370_v60  ;;  %v4826_v14 = vadd.f32 -1.0, %v5848_v51 }
 0x15c   : > { %v5850_v53 = vpop.eup %5849  ;;  %v1338_v55 = vsel %vm1018_vm12, %v7124_v59, %v4828_v31  ;;  %5625 = vmatpush1.bf16.msra.mxu1 %v5715_v2 }
 0x15d   : > { %v1336_v50 = vsel %vm1016_vm13, %v7130_v6, %v4826_v14  ;;  %v1372_v0 = vpack.c.bf16 %v1338_v55, %v1337_v9  ;;  %v4831_v23 = vadd.f32 -1.0, %v5850_v53  ;;  %5610 = vmatprep.subr.bf16.mxu1 %v6508_v39 }
 0x15e   : > { %v1371_v10 = vpack.c.bf16 %v1336_v50, %v1335_v28 }
 0x15f   : > { %v5852_v1 = vpop.eup %5851  ;;  %v1341_v8 = vsel %vm1021_vm14, %v7138_v5, %v4831_v23 }
 0x160   : > { %5599 = vmatprep.mubr.bf16.mxu1 %v1371_v10  ;;  %v4829_v3 = vadd.f32 -1.0, %v5852_v1 }
 0x161   : > { %v5854_v7 = vpop.eup %5853 }
 0x162   : > { %v5856_v47 = vpop.eup %5855  ;;  %v4832_v29 = vadd.f32 -1.0, %v5854_v7  ;;  %v1339_v6 = vsel %vm1019_vm15, %v7142_v11, %v4829_v3 }
 0x163   : > { %5600 = vmatmul.mubr.bf16.gmra.mxu1 %v1372_v0  ;;  %v4830_v59 = vadd.f32 -1.0, %v5856_v47 }
 0x164   : > { %v1342_v63 = vsel %vm1022_vm0, %v7162_v21, %v4832_v29  ;;  %v5716_v29 = vld [vmem:[%s9150_s4 + $0x20] sm:$0xff]  }
 0x165   : > { %v1340_v27 = vsel %vm1020_vm1, %v7165_v42, %v4830_v59  ;;  %v1374_v38 = vpack.c.bf16 %v1342_v63, %v1341_v8  ;;  %5626 = vmatpush1.bf16.msra.mxu1 %v5716_v29 }
 0x166   : > { %v1373_v20 = vpack.c.bf16 %v1340_v27, %v1339_v6  ;;  %5611 = vmatprep.subr.bf16.mxu1 %v6508_v39 }
 0x168   : > { %5603 = vmatprep.mubr.bf16.mxu1 %v1373_v20 }
 0x16b   : > { %5604 = vmatmul.mubr.bf16.gmra.mxu1 %v1374_v38 }
 0x1b3   : > { %v5545_v40 = vpop.f32.mrf.mxu1 }
 0x1b4   : > { %v7215_v52 = vadd.f32 %v5545_v40, %v7208_v36 }
 0x1b5   : > { %v1480_v13 = vpop.f32.mrf.mxu1 }
 0x1b6   : > { %v1481_v16 = vadd.f32 %v7208_v36, %v1480_v13  ;;  %v1801_v21 = vmin.f32 %v7215_v52, 0.0  ;;  %vm1737_vm5 = vcmp.gt.f32.partialorder %v7215_v52, 0.0 }
 0x1b7   : > { %v5546_v11 = vpop.f32.mrf.mxu1 }
 0x1b8   : > { %v1799_v25 = vmin.f32 %v1481_v16, 0.0  ;;  %v7212_v5 = vadd.f32 %v5546_v11, %v7208_v36  ;;  %v1867_v22 = vmul.f32 1.442695, %v1801_v21  ;;  %vm1735_vm2 = vcmp.gt.f32.partialorder %v1481_v16, 0.0 }
 0x1b9   : > { %v1483_v43 = vpop.f32.mrf.mxu1 }
 0x1ba   : > { %v1863_v54 = vmul.f32 1.442695, %v1799_v25  ;;  %v1802_v58 = vmin.f32 %v7212_v5, 0.0  ;;  %v1484_v56 = vadd.f32 %v7208_v36, %v1483_v43  ;;  %vm1738_vm4 = vcmp.gt.f32.partialorder %v7212_v5, 0.0 }
 0x1bb   : > { %v5549_v18 = vpop.f32.mrf.mxu1 }
 0x1bc   : > { %5857 = vpow2.f32 %v1863_v54  ;;  %v1800_v42 = vmin.f32 %v1484_v56, 0.0  ;;  %v1869_v61 = vmul.f32 1.442695, %v1802_v58  ;;  %v7240_v45 = vadd.f32 %v5549_v18, %v7208_v36  ;;  %v5717_v58 = vld [vmem:[%s9150_s4 + $0x18] sm:$0xff]  }
 0x1bd   : > { %v1496_v24 = vpop.f32.mrf.mxu1  ;;  %vm1736_vm3 = vcmp.gt.f32.partialorder %v1484_v56, 0.0  ;;  %5627 = vmatpush1.bf16.msra.mxu1 %v5717_v58 }
 0x1be   : > { %v1865_v26 = vmul.f32 1.442695, %v1800_v42  ;;  %v7225_v32 = vadd.f32 %v7208_v36, %v1496_v24  ;;  %v1805_v30 = vmin.f32 %v7240_v45, 0.0  ;;  %5612 = vmatprep.subr.bf16.mxu1 %v6508_v39  ;;  %vm1741_vm9 = vcmp.gt.f32.partialorder %v7240_v45, 0.0 }
 0x1bf   : > { %v5550_v15 = vpop.f32.mrf.mxu1 }
 0x1c0   : > { %5859 = vpow2.f32 %v1865_v26  ;;  %v1803_v49 = vmin.f32 %v7225_v32, 0.0  ;;  %v7236_v44 = vadd.f32 %v5550_v15, %v7208_v36  ;;  %v1875_v10 = vmul.f32 1.442695, %v1805_v30 }
 0x1c1   : > { %v1499_v33 = vpop.f32.mrf.mxu1  ;;  %5861 = vpow2.f32 %v1869_v61  ;;  %vm1739_vm7 = vcmp.gt.f32.partialorder %v7225_v32, 0.0 }
 0x1c2   : > { %v7228_v48 = vadd.f32 %v7208_v36, %v1499_v33  ;;  %5863 = vpow2.f32 %v1867_v22  ;;  %v1871_v46 = vmul.f32 1.442695, %v1803_v49  ;;  %v1806_v17 = vmin.f32 %v7236_v44, 0.0  ;;  %v5718_v49 = vld [vmem:[%s9150_s4 + $0x10] sm:$0xff]  }
 0x1c3   : > { %v5553_v34 = vpop.f32.mrf.mxu1  ;;  %vm1742_vm8 = vcmp.gt.f32.partialorder %v7236_v44, 0.0  ;;  %5628 = vmatpush1.bf16.msra.mxu1 %v5718_v49 }
 0x1c4   : > { %v1804_v4 = vmin.f32 %v7228_v48, 0.0  ;;  %v1877_v14 = vmul.f32 1.442695, %v1806_v17  ;;  %v7271_v40 = vadd.f32 %v5553_v34, %v7208_v36  ;;  %vm1740_vm6 = vcmp.gt.f32.partialorder %v7228_v48, 0.0  ;;  %5613 = vmatprep.subr.bf16.mxu1 %v6508_v39 }
 0x1c5   : > { %v1512_v41 = vpop.f32.mrf.mxu1 }
 0x1c6   : > { %v1873_v57 = vmul.f32 1.442695, %v1804_v4  ;;  %v7254_v0 = vadd.f32 %v7208_v36, %v1512_v41  ;;  %vm1745_vm13 = vcmp.gt.f32.partialorder %v7271_v40, 0.0 }
 0x1c7   : > { %v5554_v12 = vpop.f32.mrf.mxu1 }
 0x1c8   : > { %5865 = vpow2.f32 %v1873_v57  ;;  %v1807_v59 = vmin.f32 %v7254_v0, 0.0  ;;  %v7265_v8 = vadd.f32 %v5554_v12, %v7208_v36  ;;  %vm1743_vm11 = vcmp.gt.f32.partialorder %v7254_v0, 0.0 }
 0x1c9   : > { %v5858_v60 = vpop.eup %5857  ;;  %v1515_v62 = vpop.f32.mrf.mxu1  ;;  %5867 = vpow2.f32 %v1871_v46 }
 0x1ca   : > { %v4842_v37 = vadd.f32 -1.0, %v5858_v60  ;;  %v7248_v28 = vadd.f32 %v7208_v36, %v1515_v62  ;;  %5869 = vpow2.f32 %v1877_v14  ;;  %v1879_v13 = vmul.f32 1.442695, %v1807_v59  ;;  %v5719_v14 = vld [vmem:[%s9150_s4 + $0x8] sm:$0xff]  }
 0x1cb   : > { %v7251_v53 = vpop.f32.mrf.mxu1  ;;  %5871 = vpow2.f32 %v1875_v10  ;;  %v1810_v43 = vmin.f32 %v7265_v8, 0.0  ;;  %5629 = vmatpush1.bf16.msra.mxu1 %v5719_v14  ;;  %vm1746_vm12 = vcmp.gt.f32.partialorder %v7265_v8, 0.0 }
 0x1cc   : > { %v2055_v55 = vsel %vm1735_vm2, %v1481_v16, %v4842_v37  ;;  %v1808_v3 = vmin.f32 %v7248_v28, 0.0  ;;  %v7312_v17 = vadd.f32 %v7251_v53, %v7208_v36  ;;  %vm1744_vm10 = vcmp.gt.f32.partialorder %v7248_v28, 0.0  ;;  %5614 = vmatprep.subr.bf16.mxu1 %v6508_v39 }
 0x1cd   : > { %v5860_v51 = vpop.eup %5859  ;;  %v1528_v47 = vpop.f32.mrf.mxu1  ;;  %v1885_v18 = vmul.f32 1.442695, %v1810_v43 }
 0x1ce   : > { %v4843_v31 = vadd.f32 -1.0, %v5860_v51  ;;  %v5862_v9 = vpop.eup %5861  ;;  %v1881_v63 = vmul.f32 1.442695, %v1808_v3  ;;  %v7292_v26 = vadd.f32 %v7208_v36, %v1528_v47  ;;  %vm1749_vm1 = vcmp.gt.f32.partialorder %v7312_v17, 0.0 }
 0x1cf   : > { %v5864_v1 = vpop.eup %5863  ;;  %v4845_v7 = vadd.f32 -1.0, %v5862_v9  ;;  %v5558_v38 = vpop.f32.mrf.mxu1  ;;  %v1813_v9 = vmin.f32 %v7312_v17, 0.0 }
 0x1d0   : > { %v2056_v50 = vsel %vm1736_vm3, %v1484_v56, %v4843_v31  ;;  %v4844_v6 = vadd.f32 -1.0, %v5864_v1  ;;  %5873 = vpow2.f32 %v1881_v63  ;;  %v1809_v56 = vmin.f32 %v7271_v40, 0.0  ;;  %v5720_v63 = vld [vmem:[%s9150_s4] sm:$0xff]  }
 0x1d1   : > { %v2119_v23 = vpack.c.bf16 %v2056_v50, %v2055_v55  ;;  %v2058_v27 = vsel %vm1738_vm4, %v7212_v5, %v4845_v7  ;;  %v1531_v54 = vpop.f32.mrf.mxu1  ;;  %5875 = vpow2.f32 %v1879_v13  ;;  %v1811_v4 = vmin.f32 %v7292_v26, 0.0  ;;  %5630 = vmatpush1.bf16.msra.mxu1 %v5720_v63 }
 0x1d2   : > { %v2057_v16 = vsel %vm1737_vm5, %v7215_v52, %v4844_v6  ;;  %v1883_v61 = vmul.f32 1.442695, %v1809_v56  ;;  %5877 = vpow2.f32 %v1885_v18  ;;  %v7305_v41 = vadd.f32 %v5558_v38, %v7208_v36  ;;  %5615 = vmatprep.subr.bf16.mxu1 %v6508_v39  ;;  %v5721_v18 = vld [vmem:[%s9150_s4 + $0x78] sm:$0xff]  }
 0x1d3   : > { %2292 = vmatmul.mubr.bf16.vlgmr.msra.gmra.mxu0 %v2119_v23  ;;  %v2120_v25 = vpack.c.bf16 %v2058_v27, %v2057_v16  ;;  %v7289_v24 = vpop.f32.mrf.mxu1  ;;  %v1887_v62 = vmul.f32 1.442695, %v1811_v4  ;;  %v1891_v23 = vmul.f32 1.442695, %v1813_v9  ;;  %vm1747_vm15 = vcmp.gt.f32.partialorder %v7292_v26, 0.0 }
 0x1d4   : > { %2301 = vmatprep.mubr.bf16.mxu0 %v6508_v39  ;;  %3580 = vmatpush1.bf16.msra.mxu0 %v5713_v19  ;;  %v7284_v19 = vadd.f32 %v7208_v36, %v1531_v54  ;;  %5879 = vpow2.f32 %v1883_v61  ;;  %vm1750_vm0 = vcmp.gt.f32.partialorder %v7305_v41, 0.0 }
 0x1d5   : > { %3581 = vmatprep.subr.bf16.mxu0 %v6508_v39  ;;  %v5866_v20 = vpop.eup %5865  ;;  %5631 = vmatpush2.bf16.msra.mxu1 %v5721_v18 }
 0x1d6   : > { %v5868_v11 = vpop.eup %5867  ;;  %v4847_v5 = vadd.f32 -1.0, %v5866_v20  ;;  %vm1748_vm14 = vcmp.gt.f32.partialorder %v7284_v19, 0.0  ;;  %5616 = vmatprep.subr.bf16.mxu1 %v6508_v39 }
 0x1d7   : > { %v4846_v52 = vadd.f32 -1.0, %v5868_v11  ;;  %v5870_v42 = vpop.eup %5869 }
 0x1d8   : > { %3582 = vmatpush1.bf16.msra.mxu0 %v5714_v35  ;;  %v2060_v21 = vsel %vm1740_vm6, %v7228_v48, %v4847_v5  ;;  %v5872_v22 = vpop.eup %5871  ;;  %v1812_v48 = vmin.f32 %v7284_v19, 0.0  ;;  %v4849_v34 = vadd.f32 -1.0, %v5870_v42  ;;  %v1544_v35 = vpop.f32.mrf.mxu1 }
 0x1d9   : > { %3583 = vmatprep.subr.bf16.mxu0 %v6508_v39  ;;  %v2059_v15 = vsel %vm1739_vm7, %v7225_v32, %v4846_v52  ;;  %v4848_v32 = vadd.f32 -1.0, %v5872_v22  ;;  %v7333_v3 = vadd.f32 %v7208_v36, %v1544_v35 }
 0x1da   : > { %v2121_v33 = vpack.c.bf16 %v2060_v21, %v2059_v15  ;;  %v1889_v57 = vmul.f32 1.442695, %v1812_v48  ;;  %v2062_v12 = vsel %vm1742_vm8, %v7236_v44, %v4849_v34  ;;  %v5562_v60 = vpop.f32.mrf.mxu1  ;;  %v1814_v44 = vmin.f32 %v7305_v41, 0.0 }
 0x1db   : > { %2302 = vmatmul.mubr.bf16.gmra.mxu0 %v2120_v25  ;;  %v1815_v27 = vmin.f32 %v7333_v3, 0.0  ;;  %v7352_v25 = vadd.f32 %v7289_v24, %v7208_v36  ;;  %vm1751_vm3 = vcmp.gt.f32.partialorder %v7333_v3, 0.0 }
 0x1dc   : > { %2311 = vmatprep.mubr.bf16.mxu0 %v6508_v39  ;;  %3584 = vmatpush1.bf16.msra.mxu0 %v5715_v2  ;;  %v2061_v2 = vsel %vm1741_vm9, %v7240_v45, %v4848_v32  ;;  %5881 = vpow2.f32 %v1889_v57  ;;  %v1547_v31 = vpop.f32.mrf.mxu1  ;;  %v1893_v53 = vmul.f32 1.442695, %v1814_v44  ;;  %v5722_v57 = vld [vmem:[%s9150_s4 + $0x70] sm:$0xff]  }
 0x1dd   : > { %3585 = vmatprep.subr.bf16.mxu0 %v6508_v39  ;;  %v5874_v46 = vpop.eup %5873  ;;  %v2122_v30 = vpack.c.bf16 %v2062_v12, %v2061_v2  ;;  %5883 = vpow2.f32 %v1887_v62  ;;  %v7324_v55 = vadd.f32 %v7208_v36, %v1547_v31  ;;  %v1895_v43 = vmul.f32 1.442695, %v1815_v27  ;;  %5632 = vmatpush2.bf16.msra.mxu1 %v5722_v57 }
 0x1de   : > { %v5876_v37 = vpop.eup %5875  ;;  %v4851_v51 = vadd.f32 -1.0, %v5874_v46  ;;  %v7330_v1 = vpop.f32.mrf.mxu1  ;;  %5885 = vpow2.f32 %v1893_v53  ;;  %v1817_v21 = vmin.f32 %v7352_v25, 0.0  ;;  %5617 = vmatprep.subr.bf16.mxu1 %v6508_v39  ;;  %v5723_v53 = vld [vmem:[%s9150_s4 + $0x68] sm:$0xff]   ;;  %vm1753_vm5 = vcmp.gt.f32.partialorder %v7352_v25, 0.0 }
 0x1df   : > { %v4850_v45 = vadd.f32 -1.0, %v5876_v37  ;;  %v5878_v10 = vpop.eup %5877  ;;  %5887 = vpow2.f32 %v1891_v23  ;;  %vm1752_vm2 = vcmp.gt.f32.partialorder %v7324_v55, 0.0 }
 0x1e0   : > { %3586 = vmatpush1.bf16.msra.mxu0 %v5716_v29  ;;  %v2064_v50 = vsel %vm1744_vm10, %v7248_v28, %v4851_v51  ;;  %v1816_v28 = vmin.f32 %v7324_v55, 0.0  ;;  %v4853_v59 = vadd.f32 -1.0, %v5878_v10  ;;  %v1560_v6 = vpop.f32.mrf.mxu1 }
 0x1e1   : > { %3587 = vmatprep.subr.bf16.mxu0 %v6508_v39  ;;  %v2063_v7 = vsel %vm1743_vm11, %v7254_v0, %v4850_v45  ;;  %v5880_v47 = vpop.eup %5879  ;;  %v7344_v0 = vadd.f32 %v5562_v60, %v7208_v36  ;;  %v7372_v48 = vadd.f32 %v7208_v36, %v1560_v6  ;;  %5633 = vmatpush2.bf16.msra.mxu1 %v5723_v53 }
 0x1e2   : > { %v2123_v29 = vpack.c.bf16 %v2064_v50, %v2063_v7  ;;  %v4852_v20 = vadd.f32 -1.0, %v5880_v47  ;;  %v1897_v38 = vmul.f32 1.442695, %v1816_v28  ;;  %v2066_v13 = vsel %vm1746_vm12, %v7265_v8, %v4853_v59  ;;  %v5566_v11 = vpop.f32.mrf.mxu1  ;;  %5618 = vmatprep.subr.bf16.mxu1 %v6508_v39 }
 0x1e3   : > { %2312 = vmatmul.mubr.bf16.gmra.mxu0 %v2121_v33  ;;  %v1818_v56 = vmin.f32 %v7344_v0, 0.0  ;;  %v1899_v33 = vmul.f32 1.442695, %v1817_v21  ;;  %v1819_v12 = vmin.f32 %v7372_v48, 0.0  ;;  %vm1754_vm4 = vcmp.gt.f32.partialorder %v7344_v0, 0.0 }
 0x1e4   : > { %2321 = vmatprep.mubr.bf16.mxu0 %v6508_v39  ;;  %3588 = vmatpush1.bf16.msra.mxu0 %v5717_v58  ;;  %v2065_v5 = vsel %vm1745_vm13, %v7271_v40, %v4852_v20  ;;  %5889 = vpow2.f32 %v1897_v38  ;;  %v1563_v52 = vpop.f32.mrf.mxu1  ;;  %vm1755_vm7 = vcmp.gt.f32.partialorder %v7372_v48, 0.0 }
 0x1e5   : > { %3589 = vmatprep.subr.bf16.mxu0 %v6508_v39  ;;  %v2124_v58 = vpack.c.bf16 %v2066_v13, %v2065_v5  ;;  %5891 = vpow2.f32 %v1895_v43  ;;  %v1901_v40 = vmul.f32 1.442695, %v1818_v56  ;;  %v7363_v24 = vadd.f32 %v7208_v36, %v1563_v52 }
 0x1e6   : > { %v7369_v22 = vpop.f32.mrf.mxu1  ;;  %v1903_v44 = vmul.f32 1.442695, %v1819_v12 }
 0x1e7   : > { %5893 = vpow2.f32 %v1901_v40  ;;  %vm1756_vm6 = vcmp.gt.f32.partialorder %v7363_v24, 0.0 }
 0x1e8   : > { %3590 = vmatpush1.bf16.msra.mxu0 %v5718_v49  ;;  %v1576_v32 = vpop.f32.mrf.mxu1  ;;  %5895 = vpow2.f32 %v1899_v33 }
 0x1e9   : > { %3591 = vmatprep.subr.bf16.mxu0 %v6508_v39  ;;  %v5882_v16 = vpop.eup %5881  ;;  %v7409_v28 = vadd.f32 %v7208_v36, %v1576_v32 }
 0x1ea   : > { %v5884_v54 = vpop.eup %5883  ;;  %v4855_v8 = vadd.f32 -1.0, %v5882_v16  ;;  %v5570_v37 = vpop.f32.mrf.mxu1 }
 0x1eb   : > { %2322 = vmatmul.mubr.bf16.gmra.mxu0 %v2122_v30  ;;  %v4854_v42 = vadd.f32 -1.0, %v5884_v54  ;;  %v5886_v15 = vpop.eup %5885  ;;  %v7391_v30 = vadd.f32 %v7330_v1, %v7208_v36  ;;  %v1823_v38 = vmin.f32 %v7409_v28, 0.0  ;;  %v7417_v16 = vadd.f32 %v5570_v37, %v7208_v36 }
 0x1ec   : > { %2331 = vmatprep.mubr.bf16.mxu0 %v6508_v39  ;;  %3592 = vmatpush1.bf16.msra.mxu0 %v5719_v14  ;;  %v2068_v61 = vsel %vm1748_vm14, %v7284_v19, %v4855_v8  ;;  %v5888_v35 = vpop.eup %5887  ;;  %v1820_v19 = vmin.f32 %v7363_v24, 0.0  ;;  %v4857_v4 = vadd.f32 -1.0, %v5886_v15  ;;  %v1579_v45 = vpop.f32.mrf.mxu1  ;;  %v7423_v54 = vadd.f32 %v7369_v22, %v7208_v36 }
 0x1ed   : > { %3593 = vmatprep.subr.bf16.mxu0 %v6508_v39  ;;  %v2067_v34 = vsel %vm1747_vm15, %v7292_v26, %v4854_v42  ;;  %v4856_v46 = vadd.f32 -1.0, %v5888_v35  ;;  %v7383_v26 = vadd.f32 %v5566_v11, %v7208_v36  ;;  %v1821_v50 = vmin.f32 %v7391_v30, 0.0 }
 0x1ee   : > { %v2125_v49 = vpack.c.bf16 %v2068_v61, %v2067_v34  ;;  %v1905_v60 = vmul.f32 1.442695, %v1820_v19  ;;  %v2070_v62 = vsel %vm1750_vm0, %v7305_v41, %v4857_v4  ;;  %v7402_v1 = vadd.f32 %v7208_v36, %v1579_v45  ;;  %v5573_v47 = vpop.f32.mrf.mxu1 }
 0x1ef   : > { %v2069_v51 = vsel %vm1749_vm1, %v7312_v17, %v4856_v46  ;;  %v1822_v9 = vmin.f32 %v7383_v26, 0.0  ;;  %vm1758_vm8 = vcmp.gt.f32.partialorder %v7383_v26, 0.0  ;;  %vm1757_vm9 = vcmp.gt.f32.partialorder %v7391_v30, 0.0 }
 0x1f0   : > { %3594 = vmatpush1.bf16.msra.mxu0 %v5720_v63  ;;  %v2126_v14 = vpack.c.bf16 %v2070_v62, %v2069_v51  ;;  %5897 = vpow2.f32 %v1905_v60  ;;  %v1824_v27 = vmin.f32 %v7402_v1, 0.0  ;;  %v1592_v20 = vpop.f32.mrf.mxu1  ;;  %v7446_v60 = vadd.f32 %v5573_v47, %v7208_v36 }
 0x1f1   : > { %3595 = vmatprep.subr.bf16.mxu0 %v6508_v39  ;;  %v5890_v2 = vpop.eup %5889  ;;  %5899 = vpow2.f32 %v1903_v44  ;;  %v1909_v17 = vmul.f32 1.442695, %v1822_v9  ;;  %v7431_v61 = vadd.f32 %v7208_v36, %v1592_v20  ;;  %vm1759_vm10 = vcmp.gt.f32.partialorder %v7409_v28, 0.0 }
 0x1f2   : > { %v5892_v31 = vpop.eup %5891  ;;  %v4859_v41 = vadd.f32 -1.0, %v5890_v2  ;;  %v5574_v5 = vpop.f32.mrf.mxu1  ;;  %vm1760_vm11 = vcmp.gt.f32.partialorder %v7402_v1, 0.0  ;;  %vm1761_vm12 = vcmp.gt.f32.partialorder %v7423_v54, 0.0  ;;  %vm1762_vm13 = vcmp.gt.f32.partialorder %v7417_v16, 0.0 }
 0x1f3   : > { %2332 = vmatmul.mubr.bf16.gmra.mxu0 %v2123_v29  ;;  %v4858_v10 = vadd.f32 -1.0, %v5892_v31  ;;  %v1907_v29 = vmul.f32 1.442695, %v1821_v50  ;;  %5901 = vpow2.f32 %v1909_v17  ;;  %v1827_v4 = vmin.f32 %v7431_v61, 0.0 }
 0x1f4   : > { %2341 = vmatprep.mubr.bf16.mxu0 %v6508_v39  ;;  %3596 = vmatpush2.bf16.msra.mxu0 %v5721_v18  ;;  %v2072_v23 = vsel %vm1752_vm2, %v7324_v55, %v4859_v41  ;;  %v5894_v7 = vpop.eup %5893  ;;  %v1826_v18 = vmin.f32 %v7417_v16, 0.0  ;;  %v1595_v42 = vpop.f32.mrf.mxu1  ;;  %v7449_v62 = vadd.f32 %v5574_v5, %v7208_v36  ;;  %v1829_v41 = vmin.f32 %v7446_v60, 0.0 }
 0x1f5   : > { %3597 = vmatprep.subr.bf16.mxu0 %v6508_v39  ;;  %v2071_v59 = vsel %vm1751_vm3, %v7333_v3, %v4858_v10  ;;  %v5896_v6 = vpop.eup %5895  ;;  %v4861_v55 = vadd.f32 -1.0, %v5894_v7  ;;  %5903 = vpow2.f32 %v1907_v29  ;;  %v1913_v3 = vmul.f32 1.442695, %v1824_v27  ;;  %v5725_v10 = vld [vmem:[%s9150_s4 + $0x58] sm:$0xff]   ;;  %v5726_v27 = vld [vmem:[%s9150_s4 + $0x50] sm:$0xff]  }
 0x1f6   : > { %v2127_v63 = vpack.c.bf16 %v2072_v23, %v2071_v59  ;;  %v4860_v13 = vadd.f32 -1.0, %v5896_v6  ;;  %v7434_v15 = vadd.f32 %v7208_v36, %v1595_v42  ;;  %v7438_v34 = vpop.f32.mrf.mxu1  ;;  %v1830_v50 = vmin.f32 %v7449_v62, 0.0 }
 0x1f7   : > { %v2074_v11 = vsel %vm1754_vm4, %v7344_v0, %v4861_v55  ;;  %5905 = vpow2.f32 %v1913_v3  ;;  %v1825_v0 = vmin.f32 %v7423_v54, 0.0  ;;  %v1923_v17 = vmul.f32 1.442695, %v1829_v41 }
 0x1f8   : > { %3598 = vmatpush2.bf16.msra.mxu0 %v5722_v57  ;;  %v2073_v56 = vsel %vm1753_vm5, %v7352_v25, %v4860_v13  ;;  %v1917_v25 = vmul.f32 1.442695, %v1826_v18  ;;  %v1828_v57 = vmin.f32 %v7434_v15, 0.0  ;;  %v1608_v46 = vpop.f32.mrf.mxu1  ;;  %v1925_v29 = vmul.f32 1.442695, %v1830_v50 }
 0x1f9   : > { %3599 = vmatprep.subr.bf16.mxu0 %v6508_v39  ;;  %v2128_v52 = vpack.c.bf16 %v2074_v11, %v2073_v56  ;;  %v1915_v35 = vmul.f32 1.442695, %v1825_v0  ;;  %v7468_v23 = vadd.f32 %v7208_v36, %v1608_v46  ;;  %v5727_v11 = vld [vmem:[%s9150_s4 + $0x48] sm:$0xff]   ;;  %v5728_v0 = vld [vmem:[%s9150_s4 + $0x40] sm:$0xff]   ;;  %vm1763_vm14 = vcmp.gt.f32.partialorder %v7431_v61, 0.0 }
 0x1fa   : > { %v1921_v2 = vmul.f32 1.442695, %v1828_v57  ;;  %v5578_v51 = vpop.f32.mrf.mxu1  ;;  %vm1764_vm15 = vcmp.gt.f32.partialorder %v7434_v15, 0.0  ;;  %vm1765_vm0 = vcmp.gt.f32.partialorder %v7446_v60, 0.0  ;;  %vm1766_vm1 = vcmp.gt.f32.partialorder %v7449_v62, 0.0 }
 0x1fb   : > { %2342 = vmatmul.mubr.bf16.gmra.mxu0 %v2124_v58  ;;  %v1911_v58 = vmul.f32 1.442695, %v1823_v38  ;;  %vm1767_vm2 = vcmp.gt.f32.partialorder %v7468_v23, 0.0 }
 0x1fc   : > { %2351 = vmatprep.mubr.bf16.mxu0 %v6508_v39  ;;  %3600 = vmatpush2.bf16.msra.mxu0 %v5723_v53 }
 0x1fd   : > { %3601 = vmatprep.subr.bf16.mxu0 %v6508_v39  ;;  %v5898_v43 = vpop.eup %5897  ;;  %5907 = vpow2.f32 %v1911_v58 }
 0x1fe   : > { %v5900_v8 = vpop.eup %5899  ;;  %v4863_v21 = vadd.f32 -1.0, %v5898_v43  ;;  %5909 = vpow2.f32 %v1917_v25  ;;  %v7494_v43 = vadd.f32 %v7438_v34, %v7208_v36 }
 0x1ff   : > { %v4862_v40 = vadd.f32 -1.0, %v5900_v8  ;;  %5911 = vpow2.f32 %v1915_v35 }
 0x200   : > { %v2076_v22 = vsel %vm1756_vm6, %v7363_v24, %v4863_v21  ;;  %v5902_v33 = vpop.eup %5901  ;;  %vm1769_vm4 = vcmp.gt.f32.partialorder %v7494_v43, 0.0 }
 0x201   : > { %v4865_v12 = vadd.f32 -1.0, %v5902_v33 }
 0x202   : > { %v5904_v19 = vpop.eup %5903 }
 0x203   : > { %2352 = vmatmul.mubr.bf16.gmra.mxu0 %v2125_v49  ;;  %v2075_v49 = vsel %vm1755_vm7, %v7372_v48, %v4862_v40  ;;  %v4864_v24 = vadd.f32 -1.0, %v5904_v19  ;;  %v1919_v48 = vmul.f32 1.442695, %v1827_v4  ;;  %v2078_v37 = vsel %vm1758_vm8, %v7383_v26, %v4865_v12  ;;  %v1611_v26 = vpop.f32.mrf.mxu1 }
 0x204   : > { %2361 = vmatprep.mubr.bf16.mxu0 %v6508_v39  ;;  %v2129_v32 = vpack.c.bf16 %v2076_v22, %v2075_v49  ;;  %v5906_v44 = vpop.eup %5905  ;;  %v7474_v59 = vadd.f32 %v7208_v36, %v1611_v26 }
 0x205   : > { %v2077_v31 = vsel %vm1757_vm9, %v7391_v30, %v4864_v24  ;;  %5913 = vpow2.f32 %v1919_v48  ;;  %v4867_v53 = vadd.f32 -1.0, %v5906_v44  ;;  %v7470_v7 = vpop.f32.mrf.mxu1 }
 0x206   : > { %v2130_v45 = vpack.c.bf16 %v2078_v37, %v2077_v31  ;;  %5915 = vpow2.f32 %v1921_v2  ;;  %v1832_v3 = vmin.f32 %v7474_v59, 0.0  ;;  %vm1768_vm3 = vcmp.gt.f32.partialorder %v7474_v59, 0.0 }
 0x207   : > { %v2080_v47 = vsel %vm1760_vm11, %v7402_v1, %v4867_v53  ;;  %5917 = vpow2.f32 %v1923_v17  ;;  %v1831_v1 = vmin.f32 %v7468_v23, 0.0  ;;  %v1624_v38 = vpop.f32.mrf.mxu1 }
 0x208   : > { %5919 = vpow2.f32 %v1925_v29  ;;  %v1929_v18 = vmul.f32 1.442695, %v1832_v3  ;;  %v7514_v49 = vadd.f32 %v7208_v36, %v1624_v38 }
 0x209   : > { %v1927_v5 = vmul.f32 1.442695, %v1831_v1  ;;  %v5582_v58 = vpop.f32.mrf.mxu1 }
 0x20a   : > { %v5908_v9 = vpop.eup %5907  ;;  %v1835_v2 = vmin.f32 %v7514_v49, 0.0  ;;  %vm1771_vm6 = vcmp.gt.f32.partialorder %v7514_v49, 0.0 }
 0x20b   : > { %2362 = vmatmul.mubr.bf16.gmra.mxu0 %v2126_v14  ;;  %v5724_v14 = vld [vmem:[%s9150_s4 + $0x60] sm:$0xff]   ;;  %v4866_v30 = vadd.f32 -1.0, %v5908_v9  ;;  %v5910_v6 = vpop.eup %5909  ;;  %5921 = vpow2.f32 %v1927_v5  ;;  %v1627_v25 = vpop.f32.mrf.mxu1 }
 0x20c   : > { %2371 = vmatprep.mubr.bf16.mxu0 %v6508_v39  ;;  %5634 = vmatpush2.bf16.msra.mxu1 %v5724_v14  ;;  %v5912_v55 = vpop.eup %5911  ;;  %v4869_v13 = vadd.f32 -1.0, %v5910_v6  ;;  %5923 = vpow2.f32 %v1929_v18  ;;  %v7519_v12 = vadd.f32 %v7208_v36, %v1627_v25  ;;  %v1935_v31 = vmul.f32 1.442695, %v1835_v2 }
 0x20d   : > { %3602 = vmatpush2.bf16.msra.mxu0 %v5724_v14  ;;  %5619 = vmatprep.subr.bf16.mxu1 %v6508_v39 }
 0x20e   : > { %3603 = vmatprep.subr.bf16.mxu0 %v6508_v39  ;;  %v2082_v8 = vsel %vm1762_vm13, %v7417_v16, %v4869_v13  ;;  %v1833_v16 = vmin.f32 %v7494_v43, 0.0  ;;  %vm1772_vm7 = vcmp.gt.f32.partialorder %v7519_v12, 0.0 }
 0x210   : > { %5635 = vmatpush2.bf16.msra.mxu1 %v5725_v10  ;;  %v1931_v35 = vmul.f32 1.442695, %v1833_v16 }
 0x211   : > { %3604 = vmatpush2.bf16.msra.mxu0 %v5725_v10  ;;  %5620 = vmatprep.subr.bf16.mxu1 %v6508_v39 }
 0x212   : > { %3605 = vmatprep.subr.bf16.mxu0 %v6508_v39  ;;  %v5914_v56 = vpop.eup %5913  ;;  %5925 = vpow2.f32 %v1931_v35 }
 0x213   : > { %2372 = vmatmul.mubr.bf16.gmra.mxu0 %v2127_v63  ;;  %v2079_v63 = vsel %vm1759_vm10, %v7409_v28, %v4866_v30  ;;  %v4868_v28 = vadd.f32 -1.0, %v5912_v55  ;;  %v5916_v21 = vpop.eup %5915  ;;  %v4870_v22 = vadd.f32 -1.0, %v5914_v56 }
 0x214   : > { %2381 = vmatprep.mubr.bf16.mxu0 %v6508_v39  ;;  %v2131_v20 = vpack.c.bf16 %v2080_v47, %v2079_v63  ;;  %5636 = vmatpush2.bf16.msra.mxu1 %v5726_v27  ;;  %v4871_v33 = vadd.f32 -1.0, %v5916_v21  ;;  %v5918_v19 = vpop.eup %5917 }
 0x215   : > { %3606 = vmatpush2.bf16.msra.mxu0 %v5726_v27  ;;  %5621 = vmatprep.subr.bf16.mxu1 %v6508_v39  ;;  %v2081_v42 = vsel %vm1761_vm12, %v7423_v54, %v4868_v28  ;;  %v7510_v54 = vpop.f32.mrf.mxu1  ;;  %v2083_v4 = vsel %vm1763_vm14, %v7431_v61, %v4870_v22  ;;  %v5920_v46 = vpop.eup %5919  ;;  %v4872_v37 = vadd.f32 -1.0, %v5918_v19 }
 0x216   : > { %3607 = vmatprep.subr.bf16.mxu0 %v6508_v39  ;;  %v2132_v40 = vpack.c.bf16 %v2082_v8, %v2081_v42  ;;  %v4873_v44 = vadd.f32 -1.0, %v5920_v46 }
 0x217   : > { %v1640_v24 = vpop.f32.mrf.mxu1  ;;  %v2085_v9 = vsel %vm1765_vm0, %v7446_v60, %v4872_v37 }
 0x218   : > { %5637 = vmatpush2.bf16.msra.mxu1 %v5727_v11  ;;  %v5922_v14 = vpop.eup %5921  ;;  %v2086_v41 = vsel %vm1766_vm1, %v7449_v62, %v4873_v44  ;;  %v7543_v62 = vadd.f32 %v7208_v36, %v1640_v24 }
 0x219   : > { %3608 = vmatpush2.bf16.msra.mxu0 %v5727_v11  ;;  %5622 = vmatprep.subr.bf16.mxu1 %v6508_v39  ;;  %v5586_v61 = vpop.f32.mrf.mxu1  ;;  %v5924_v50 = vpop.eup %5923  ;;  %v2134_v30 = vpack.c.bf16 %v2086_v41, %v2085_v9 }
 0x21a   : > { %3609 = vmatprep.subr.bf16.mxu0 %v6508_v39  ;;  %v4875_v47 = vadd.f32 -1.0, %v5924_v50  ;;  %v1839_v3 = vmin.f32 %v7543_v62, 0.0  ;;  %v7562_v42 = vadd.f32 %v5586_v61, %v7208_v36  ;;  %vm1775_vm10 = vcmp.gt.f32.partialorder %v7543_v62, 0.0 }
 0x21b   : > { %2382 = vmatmul.mubr.bf16.gmra.mxu0 %v2128_v52  ;;  %v7498_v52 = vadd.f32 %v5578_v51, %v7208_v36  ;;  %v1836_v51 = vmin.f32 %v7519_v12, 0.0  ;;  %v1643_v26 = vpop.f32.mrf.mxu1 }
 0x21c   : > { %2391 = vmatprep.mubr.bf16.mxu0 %v6508_v39  ;;  %5638 = vmatpush2.bf16.msra.mxu1 %v5728_v0  ;;  %v2088_v55 = vsel %vm1768_vm3, %v7474_v59, %v4875_v47  ;;  %v7548_v1 = vadd.f32 %v7208_v36, %v1643_v26  ;;  %v1943_v59 = vmul.f32 1.442695, %v1839_v3  ;;  %vm1778_vm13 = vcmp.gt.f32.partialorder %v7562_v42, 0.0 }
 0x21d   : > { %v1834_v34 = vmin.f32 %v7498_v52, 0.0  ;;  %3610 = vmatpush2.bf16.msra.mxu0 %v5728_v0  ;;  %v1937_v53 = vmul.f32 1.442695, %v1836_v51  ;;  %v7536_v17 = vpop.f32.mrf.mxu1  ;;  %vm1770_vm5 = vcmp.gt.f32.partialorder %v7498_v52, 0.0 }
 0x21e   : > { %vm1776_vm11 = vcmp.gt.f32.partialorder %v7548_v1, 0.0 }
 0x21f   : > { %v1933_v57 = vmul.f32 1.442695, %v1834_v34  ;;  %v1656_v6 = vpop.f32.mrf.mxu1  ;;  %v5926_v63 = vpop.eup %5925 }
 0x220   : > { %v4876_v11 = vadd.f32 -1.0, %v5926_v63  ;;  %v7572_v35 = vadd.f32 %v7208_v36, %v1656_v6 }
 0x221   : > { %5927 = vpow2.f32 %v1933_v57  ;;  %v5590_v28 = vpop.f32.mrf.mxu1 }
 0x222   : > { %5929 = vpow2.f32 %v1935_v31  ;;  %v2089_v18 = vsel %vm1769_vm4, %v7494_v43, %v4876_v11  ;;  %v1843_v37 = vmin.f32 %v7572_v35, 0.0  ;;  %vm1779_vm14 = vcmp.gt.f32.partialorder %v7572_v35, 0.0 }
 0x223   : > { %2392 = vmatmul.mubr.bf16.gmra.mxu0 %v2129_v32  ;;  %v2084_v32 = vsel %vm1764_vm15, %v7434_v15, %v4871_v33  ;;  %v7528_v15 = vadd.f32 %v7470_v7, %v7208_v36  ;;  %v4874_v7 = vadd.f32 -1.0, %v5922_v14  ;;  %5931 = vpow2.f32 %v1937_v53  ;;  %v1659_v56 = vpop.f32.mrf.mxu1 }
 0x224   : > { %2401 = vmatprep.mubr.bf16.mxu0 %v6508_v39  ;;  %v2133_v48 = vpack.c.bf16 %v2084_v32, %v2083_v4  ;;  %v7577_v46 = vadd.f32 %v7208_v36, %v1659_v56  ;;  %v1951_v31 = vmul.f32 1.442695, %v1843_v37 }
 0x225   : > { %v1837_v10 = vmin.f32 %v7528_v15, 0.0  ;;  %v2087_v27 = vsel %vm1767_vm2, %v7468_v23, %v4874_v7  ;;  %v7557_v23 = vadd.f32 %v7510_v54, %v7208_v36  ;;  %v7564_v16 = vpop.f32.mrf.mxu1  ;;  %v1842_v54 = vmin.f32 %v7562_v42, 0.0 }
 0x226   : > { %v2135_v13 = vpack.c.bf16 %v2088_v55, %v2087_v27  ;;  %v1844_v61 = vmin.f32 %v7577_v46, 0.0  ;;  %vm1773_vm8 = vcmp.gt.f32.partialorder %v7528_v15, 0.0  ;;  %vm1780_vm15 = vcmp.gt.f32.partialorder %v7577_v46, 0.0 }
 0x227   : > { %v1939_v60 = vmul.f32 1.442695, %v1837_v10  ;;  %v1841_v22 = vmin.f32 %v7557_v23, 0.0  ;;  %v1672_v43 = vpop.f32.mrf.mxu1  ;;  %v1949_v57 = vmul.f32 1.442695, %v1842_v54  ;;  %vm1777_vm12 = vcmp.gt.f32.partialorder %v7557_v23, 0.0 }
 0x228   : > { %v1953_v26 = vmul.f32 1.442695, %v1844_v61 }
 0x229   : > { %5933 = vpow2.f32 %v1939_v60 }
 0x22b   : > { %2402 = vmatmul.mubr.bf16.gmra.mxu0 %v2130_v45  ;;  %v7533_v45 = vadd.f32 %v5582_v58, %v7208_v36  ;;  %v1840_v58 = vmin.f32 %v7548_v1, 0.0  ;;  %v7589_v36 = vld [vmem:[%s9152_s6] ss:$0 sm:$0xff] }
 0x22c   : > { %2411 = vmatprep.mubr.bf16.mxu0 %v6508_v39  ;;  %v7600_v50 = vadd.f32 %v7589_v36, %v5590_v28 }
 0x22d   : > { %v1838_v29 = vmin.f32 %v7533_v45, 0.0  ;;  %v1945_v0 = vmul.f32 1.442695, %v1840_v58  ;;  %vm1774_vm9 = vcmp.gt.f32.partialorder %v7533_v45, 0.0 }
 0x22e   : > { %v5928_v38 = vpop.eup %5927  ;;  %v1846_v60 = vmin.f32 %v7600_v50, 0.0  ;;  %vm1782_vm1 = vcmp.gt.f32.partialorder %v7600_v50, 0.0 }
 0x22f   : > { %v4877_v5 = vadd.f32 -1.0, %v5928_v38  ;;  %v5930_v8 = vpop.eup %5929 }
 0x230   : > { %v4878_v33 = vadd.f32 -1.0, %v5930_v8 }
 0x231   : > { %v2090_v21 = vsel %vm1770_vm5, %v7498_v52, %v4877_v5  ;;  %v1947_v52 = vmul.f32 1.442695, %v1841_v22 }
 0x232   : > { %v2136_v25 = vpack.c.bf16 %v2090_v21, %v2089_v18  ;;  %v2091_v4 = vsel %vm1771_vm6, %v7514_v49, %v4878_v33 }
 0x233   : > { %2412 = vmatmul.mubr.bf16.gmra.mxu0 %v2131_v20  ;;  %v1941_v20 = vmul.f32 1.442695, %v1838_v29 }
 0x234   : > { %2421 = vmatprep.mubr.bf16.mxu0 %v6508_v39 }
 0x235   : > { %5935 = vpow2.f32 %v1941_v20  ;;  %v1957_v20 = vmul.f32 1.442695, %v1846_v60 }
 0x236   : > { %5937 = vpow2.f32 %v1943_v59 }
 0x237   : > { %5939 = vpow2.f32 %v1945_v0 }
 0x238   : > { %5941 = vpow2.f32 %v1947_v52 }
 0x239   : > { %5943 = vpow2.f32 %v1949_v57 }
 0x23a   : > { %5945 = vpow2.f32 %v1951_v31 }
 0x23b   : > { %2422 = vmatmul.mubr.bf16.gmra.mxu0 %v2132_v40  ;;  %v5932_v40 = vpop.eup %5931  ;;  %5947 = vpow2.f32 %v1953_v26 }
 0x23c   : > { %2431 = vmatprep.mubr.bf16.mxu0 %v6508_v39  ;;  %v4879_v34 = vadd.f32 -1.0, %v5932_v40  ;;  %v5934_v19 = vpop.eup %5933 }
 0x23d   : > { %v4880_v44 = vadd.f32 -1.0, %v5934_v19 }
 0x23e   : > { %v2092_v32 = vsel %vm1772_vm7, %v7519_v12, %v4879_v34  ;;  %v7593_v12 = vadd.f32 %v7589_v36, %v7536_v17 }
 0x23f   : > { %v2137_v2 = vpack.c.bf16 %v2092_v32, %v2091_v4  ;;  %v2093_v41 = vsel %vm1773_vm8, %v7528_v15, %v4880_v44 }
 0x240   : > { %v1845_v7 = vmin.f32 %v7593_v12, 0.0  ;;  %vm1781_vm0 = vcmp.gt.f32.partialorder %v7593_v12, 0.0 }
 0x242   : > { %v5936_v24 = vpop.eup %5935  ;;  %v1955_v15 = vmul.f32 1.442695, %v1845_v7 }
 0x243   : > { %2432 = vmatmul.mubr.bf16.gmra.mxu0 %v2133_v48  ;;  %v7579_v48 = vpop.f32.mrf.mxu1  ;;  %v4881_v51 = vadd.f32 -1.0, %v5936_v24  ;;  %v5938_v9 = vpop.eup %5937 }
 0x244   : > { %2441 = vmatprep.mubr.bf16.mxu0 %v6508_v39  ;;  %v4882_v17 = vadd.f32 -1.0, %v5938_v9  ;;  %5949 = vpow2.f32 %v1955_v15  ;;  %v7628_v0 = vadd.f32 %v7589_v36, %v7579_v48 }
 0x245   : > { %v1675_v49 = vpop.f32.mrf.mxu1  ;;  %v2094_v53 = vsel %vm1774_vm9, %v7533_v45, %v4881_v51  ;;  %v7608_v45 = vadd.f32 %v7589_v36, %v1672_v43  ;;  %5951 = vpow2.f32 %v1957_v20 }
 0x246   : > { %v2138_v10 = vpack.c.bf16 %v2094_v53, %v2093_v41  ;;  %v2095_v27 = vsel %vm1775_vm10, %v7543_v62, %v4882_v17  ;;  %v7613_v38 = vadd.f32 %v7589_v36, %v1675_v49  ;;  %v1850_v43 = vmin.f32 %v7628_v0, 0.0 }
 0x247   : > { %v7595_v14 = vpop.f32.mrf.mxu1  ;;  %v1847_v28 = vmin.f32 %v7608_v45, 0.0  ;;  %vm1783_vm2 = vcmp.gt.f32.partialorder %v7608_v45, 0.0  ;;  %vm1786_vm5 = vcmp.gt.f32.partialorder %v7628_v0, 0.0 }
 0x248   : > { %v1848_v59 = vmin.f32 %v7613_v38, 0.0  ;;  %v1965_v57 = vmul.f32 1.442695, %v1850_v43  ;;  %v7645_v44 = vadd.f32 %v7589_v36, %v7595_v14  ;;  %vm1784_vm3 = vcmp.gt.f32.partialorder %v7613_v38, 0.0 }
 0x249   : > { %v1688_v47 = vpop.f32.mrf.mxu1  ;;  %v1959_v56 = vmul.f32 1.442695, %v1847_v28 }
 0x24a   : > { %v1961_v40 = vmul.f32 1.442695, %v1848_v59  ;;  %v7636_v52 = vadd.f32 %v7589_v36, %v1688_v47  ;;  %v1853_v14 = vmin.f32 %v7645_v44, 0.0  ;;  %vm1789_vm8 = vcmp.gt.f32.partialorder %v7645_v44, 0.0 }
 0x24b   : > { %2442 = vmatmul.mubr.bf16.gmra.mxu0 %v2134_v30  ;;  %v5940_v30 = vpop.eup %5939  ;;  %v5598_v6 = vpop.f32.mrf.mxu1  ;;  %5953 = vpow2.f32 %v1959_v56 }
 0x24c   : > { %2451 = vmatprep.mubr.bf16.mxu0 %v6508_v39  ;;  %v4883_v29 = vadd.f32 -1.0, %v5940_v30  ;;  %v5942_v63 = vpop.eup %5941  ;;  %5955 = vpow2.f32 %v1961_v40  ;;  %v1851_v51 = vmin.f32 %v7636_v52, 0.0  ;;  %v1971_v15 = vmul.f32 1.442695, %v1853_v14 }
 0x24d   : > { %v1691_v11 = vpop.f32.mrf.mxu1  ;;  %v4884_v5 = vadd.f32 -1.0, %v5942_v63  ;;  %vm1787_vm6 = vcmp.gt.f32.partialorder %v7636_v52, 0.0 }
 0x24e   : > { %v2096_v55 = vsel %vm1776_vm11, %v7548_v1, %v4883_v29  ;;  %v7622_v1 = vadd.f32 %v7589_v36, %v7564_v16  ;;  %v7641_v24 = vadd.f32 %v7589_v36, %v1691_v11  ;;  %v1967_v9 = vmul.f32 1.442695, %v1851_v51 }
 0x24f   : > { %v2139_v3 = vpack.c.bf16 %v2096_v55, %v2095_v27  ;;  %v5601_v62 = vpop.f32.mrf.mxu1  ;;  %v2097_v18 = vsel %vm1777_vm12, %v7557_v23, %v4884_v5  ;;  %v2169_v29 = vlaneseq }
 0x250   : > { %v1849_v34 = vmin.f32 %v7622_v1, 0.0  ;;  %v7660_v17 = vadd.f32 %v7589_v36, %v5601_v62  ;;  %vm1785_vm4 = vcmp.gt.f32.partialorder %v7622_v1, 0.0  ;;  %vm1788_vm7 = vcmp.gt.f32.partialorder %v7641_v24, 0.0 }
 0x251   : > { %v1704_v22 = vpop.f32.mrf.mxu1 }
 0x252   : > { %v1857_v55 = vmin.f32 %v7660_v17, 0.0  ;;  %vm1793_vm10 = vcmp.gt.f32.partialorder %v7660_v17, 0.0 }
 0x253   : > { %2452 = vmatmul.mubr.bf16.gmra.mxu0 %v2135_v13  ;;  %v5944_v13 = vpop.eup %5943  ;;  %v5602_v23 = vpop.f32.mrf.mxu1 }
 0x254   : > { %2461 = vmatprep.mubr.bf16.mxu0 %v6508_v39  ;;  %v4885_v58 = vadd.f32 -1.0, %v5944_v13  ;;  %v5946_v8 = vpop.eup %5945  ;;  %v7669_v20 = vadd.f32 %v7589_v36, %v5602_v23 }
 0x255   : > { %v4886_v54 = vadd.f32 -1.0, %v5946_v8 }
 0x256   : > { %v2098_v21 = vsel %vm1778_vm13, %v7562_v42, %v4885_v58  ;;  %v1963_v42 = vmul.f32 1.442695, %v1849_v34  ;;  %v2167_v34 = vld [vmem:[%s9153_s7] sm:$0x3]  ;;  %vm1794_vm12 = vcmp.gt.f32.partialorder %v7669_v20, 0.0 }
 0x257   : > { %v2140_v33 = vpack.c.bf16 %v2098_v21, %v2097_v18  ;;  %v2099_v4 = vsel %vm1779_vm14, %v7572_v35, %v4886_v54  ;;  %v1852_v35 = vmin.f32 %v7641_v24, 0.0  ;;  %v1979_v18 = vmul.f32 1.442695, %v1857_v55 }
 0x258   : > { %5957 = vpow2.f32 %v1963_v42  ;;  %v1858_v21 = vmin.f32 %v7669_v20, 0.0 }
 0x259   : > { %5959 = vpow2.f32 %v1965_v57 }
 0x25a   : > { %5961 = vpow2.f32 %v1967_v9 }
 0x25b   : > { %2462 = vmatmul.mubr.bf16.gmra.mxu0 %v2136_v25  ;;  %v5948_v25 = vpop.eup %5947 }
 0x25c   : > { %2471 = vmatprep.mubr.bf16.mxu0 %v6508_v39  ;;  %v4887_v16 = vadd.f32 -1.0, %v5948_v25  ;;  %v5950_v19 = vpop.eup %5949 }
 0x25d   : > { %v5952_v48 = vpop.eup %5951  ;;  %v4888_v49 = vadd.f32 -1.0, %v5950_v19 }
 0x25e   : > { %v2100_v32 = vsel %vm1780_vm15, %v7577_v46, %v4887_v16  ;;  %v4889_v31 = vadd.f32 -1.0, %v5952_v48  ;;  %v7652_v46 = vadd.f32 %v7589_v36, %v5598_v6  ;;  %v5954_v53 = vpop.eup %5953 }
 0x25f   : > { %v2141_v37 = vpack.c.bf16 %v2100_v32, %v2099_v4  ;;  %v2101_v26 = vsel %vm1781_vm0, %v7593_v12, %v4888_v49  ;;  %v5956_v7 = vpop.eup %5955  ;;  %v4890_v63 = vadd.f32 -1.0, %v5954_v53  ;;  %v7664_v12 = vadd.f32 %v7589_v36, %v1704_v22 }
 0x260   : > { %v2102_v30 = vsel %vm1782_vm1, %v7600_v50, %v4889_v31  ;;  %v1854_v47 = vmin.f32 %v7652_v46, 0.0  ;;  %v4891_v27 = vadd.f32 -1.0, %v5956_v7  ;;  %vm1790_vm9 = vcmp.gt.f32.partialorder %v7652_v46, 0.0 }
 0x261   : > { %v2142_v60 = vpack.c.bf16 %v2102_v30, %v2101_v26  ;;  %v2103_v58 = vsel %vm1783_vm2, %v7608_v45, %v4890_v63  ;;  %v1855_v62 = vmin.f32 %v7664_v12, 0.0  ;;  %vm1791_vm11 = vcmp.gt.f32.partialorder %v7664_v12, 0.0 }
 0x262   : > { %v1973_v50 = vmul.f32 1.442695, %v1854_v47  ;;  %v2104_v59 = vsel %vm1784_vm3, %v7613_v38, %v4891_v27 }
 0x263   : > { %2472 = vmatmul.mubr.bf16.gmra.mxu0 %v2137_v2  ;;  %v1707_v2 = vpop.f32.mrf.mxu1  ;;  %v2143_v38 = vpack.c.bf16 %v2104_v59, %v2103_v58  ;;  %v1975_v43 = vmul.f32 1.442695, %v1855_v62 }
 0x264   : > { %2481 = vmatprep.mubr.bf16.mxu0 %v6508_v39  ;;  %v7672_v13 = vadd.f32 %v7589_v36, %v1707_v2 }
 0x265   : > { %v5605_v61 = vpop.f32.mrf.mxu1  ;;  %v5958_v5 = vpop.eup %5957 }
 0x266   : > { %v7677_v28 = vadd.f32 %v7589_v36, %v5605_v61  ;;  %v5960_v8 = vpop.eup %5959  ;;  %v1856_v25 = vmin.f32 %v7672_v13, 0.0  ;;  %v4892_v54 = vadd.f32 -1.0, %v5958_v5  ;;  %vm1792_vm13 = vcmp.gt.f32.partialorder %v7672_v13, 0.0 }
 0x267   : > { %v1720_v41 = vpop.f32.mrf.mxu1  ;;  %v4893_v16 = vadd.f32 -1.0, %v5960_v8  ;;  %v5962_v51 = vpop.eup %5961 }
 0x268   : > { %v7685_v56 = vadd.f32 %v7589_v36, %v1720_v41  ;;  %v1977_v4 = vmul.f32 1.442695, %v1856_v25  ;;  %v2105_v61 = vsel %vm1785_vm4, %v7622_v1, %v4892_v54  ;;  %vm1797_vm14 = vcmp.gt.f32.partialorder %v7677_v28, 0.0 }
 0x269   : > { %v5606_v6 = vpop.f32.mrf.mxu1  ;;  %v2106_v49 = vsel %vm1786_vm5, %v7628_v0, %v4893_v16 }
 0x26a   : > { %v7689_v40 = vadd.f32 %v7589_v36, %v5606_v6  ;;  %v1859_v23 = vmin.f32 %v7685_v56, 0.0  ;;  %v2144_v30 = vpack.c.bf16 %v2106_v49, %v2105_v61  ;;  %vm1795_vm15 = vcmp.gt.f32.partialorder %v7685_v56, 0.0 }
 0x26b   : > { %2482 = vmatmul.mubr.bf16.gmra.mxu0 %v2138_v10  ;;  %v1969_v10 = vmul.f32 1.442695, %v1852_v35  ;;  %v1723_v11 = vpop.f32.mrf.mxu1 }
 0x26c   : > { %2491 = vmatprep.mubr.bf16.mxu0 %v6508_v39  ;;  %v7693_v22 = vadd.f32 %v7589_v36, %v1723_v11  ;;  %v1981_v36 = vmul.f32 1.442695, %v1858_v21  ;;  %v1862_v42 = vmin.f32 %v7689_v40, 0.0  ;;  %v1983_v31 = vmul.f32 1.442695, %v1859_v23 }
 0x26d   : > { %5963 = vpow2.f32 %v1969_v10  ;;  %v4894_v10 = vadd.f32 -1.0, %v5962_v51  ;;  %vm1798_vm0 = vcmp.gt.f32.partialorder %v7689_v40, 0.0 }
 0x26e   : > { %5965 = vpow2.f32 %v1971_v15  ;;  %v1860_v32 = vmin.f32 %v7693_v22, 0.0  ;;  %v1989_v14 = vmul.f32 1.442695, %v1862_v42  ;;  %vm1796_vm1 = vcmp.gt.f32.partialorder %v7693_v22, 0.0 }
 0x26f   : > { %5967 = vpow2.f32 %v1973_v50  ;;  %v2107_v50 = vsel %vm1787_vm6, %v7636_v52, %v4894_v10 }
 0x270   : > { %5969 = vpow2.f32 %v1979_v18  ;;  %v1985_v41 = vmul.f32 1.442695, %v1860_v32 }
 0x271   : > { %5971 = vpow2.f32 %v1975_v43 }
 0x272   : > { %5973 = vpow2.f32 %v1981_v36 }
 0x273   : > { %2492 = vmatmul.mubr.bf16.gmra.mxu0 %v2139_v3  ;;  %v2170_v3 = vshrl.u32 %v2169_v29, 7  ;;  %5975 = vpow2.f32 %v1977_v4 }
 0x274   : > { %2501 = vmatprep.mubr.bf16.mxu0 %v6508_v39 }
 0x275   : > { %v2171_v45 = vsub.s32 0, %v2170_v3  ;;  %v2175_v48 = vsub.s32 1, %v2170_v3 }
 0x277   : > { %v7704_v57 = vrot.slane %v2167_v34, %v2171_v45  ;;  %v7714_v26 = vrot.slane %v2167_v34, %v2175_v48 }
 0x27a   : > { %v5964_v35 = vpop.eup %5963 }
 0x27b   : > { %2502 = vmatmul.mubr.bf16.gmra.mxu0 %v2140_v33  ;;  %v1861_v33 = vmin.f32 %v7677_v28, 0.0  ;;  %v5966_v1 = vpop.eup %5965  ;;  %v4895_v0 = vadd.f32 -1.0, %v5964_v35 }
 0x27c   : > { %2511 = vmatprep.mubr.bf16.mxu0 %v6508_v39  ;;  %v4896_v27 = vadd.f32 -1.0, %v5966_v1 }
 0x27d   : > { %v1987_v2 = vmul.f32 1.442695, %v1861_v33  ;;  %v2108_v3 = vsel %vm1788_vm7, %v7641_v24, %v4895_v0 }
 0x27e   : > { %v2145_v25 = vpack.c.bf16 %v2108_v3, %v2107_v50  ;;  %v2109_v34 = vsel %vm1789_vm8, %v7645_v44, %v4896_v27 }
 0x27f   : > { %5977 = vpow2.f32 %v1987_v2 }
 0x280   : > { %5979 = vpow2.f32 %v1983_v31 }
 0x281   : > { %5981 = vpow2.f32 %v1989_v14 }
 0x282   : > { %5983 = vpow2.f32 %v1985_v41 }
 0x283   : > { %2512 = vmatmul.mubr.bf16.gmra.mxu0 %v2141_v37 }
 0x284   : > { %2521 = vmatprep.mubr.bf16.mxu0 %v6508_v39 }
 0x28b   : > { %2522 = vmatmul.mubr.bf16.gmra.mxu0 %v2142_v60  ;;  %v5968_v60 = vpop.eup %5967 }
 0x28c   : > { %2531 = vmatprep.mubr.bf16.mxu0 %v6508_v39  ;;  %v4897_v59 = vadd.f32 -1.0, %v5968_v60  ;;  %v5970_v52 = vpop.eup %5969 }
 0x28d   : > { %v5972_v43 = vpop.eup %5971  ;;  %v4900_v36 = vadd.f32 -1.0, %v5970_v52 }
 0x28e   : > { %v2110_v23 = vsel %vm1790_vm9, %v7652_v46, %v4897_v59  ;;  %v5974_v44 = vpop.eup %5973 }
 0x28f   : > { %v5976_v46 = vpop.eup %5975  ;;  %v2146_v41 = vpack.c.bf16 %v2110_v23, %v2109_v34  ;;  %v7775_v0 = vsel %vm1793_vm10, %v7660_v17, %v4900_v36 }
 0x290   : > { %v5978_v49 = vpop.eup %5977  ;;  %v4899_v27 = vadd.f32 -1.0, %v5976_v46 }
 0x291   : > { %v4904_v52 = vadd.f32 -1.0, %v5978_v49 }
 0x293   : > { %v2293_v19 = vpop.f32.mrf.mxu0  ;;  %2532 = vmatmul.mubr.bf16.gmra.mxu0 %v2143_v38 }
 0x294   : > { %2541 = vmatprep.mubr.bf16.mxu0 %v6508_v39  ;;  %v7712_v53 = vadd.f32 %v2293_v19, %v7704_v57 }
 0x295   : > { %v2295_v37 = vpop.f32.mrf.mxu0 }
 0x296   : > { %v2740_v15 = vmin.f32 %v7712_v53, 0.0  ;;  %v7720_v6 = vadd.f32 %v2295_v37, %v7714_v26 }
 0x297   : > { %v2297_v9 = vpop.f32.mrf.mxu0 }
 0x298   : > { %v7729_v11 = vadd.f32 %v2297_v9, %v7704_v57  ;;  %v2868_v8 = vmul.f32 1.442695, %v2740_v15  ;;  %v2741_v24 = vmin.f32 %v7720_v6, 0.0  ;;  %v5980_v9 = vpop.eup %5979  ;;  %vm2613_vm6 = vcmp.gt.f32.partialorder %v7720_v6, 0.0 }
 0x299   : > { %v2299_v7 = vpop.f32.mrf.mxu0  ;;  %v5982_v1 = vpop.eup %5981 }
 0x29a   : > { %v7745_v45 = vadd.f32 %v2299_v7, %v7714_v26  ;;  %v2742_v54 = vmin.f32 %v7729_v11, 0.0  ;;  %5985 = vpow2.f32 %v2868_v8  ;;  %v2870_v32 = vmul.f32 1.442695, %v2741_v24  ;;  %v5984_v15 = vpop.eup %5983 }
 0x29b   : > { %v2303_v47 = vpop.f32.mrf.mxu0  ;;  %2542 = vmatmul.mubr.bf16.gmra.mxu0 %v2144_v30  ;;  %v4898_v30 = vadd.f32 -1.0, %v5972_v43  ;;  %v4902_v8 = vadd.f32 -1.0, %v5980_v9  ;;  %v2112_v43 = vsel %vm1792_vm13, %v7672_v13, %v4899_v27  ;;  %vm2614_vm7 = vcmp.gt.f32.partialorder %v7729_v11, 0.0 }
 0x29c   : > { %v7723_v63 = vadd.f32 %v2303_v47, %v7704_v57  ;;  %2551 = vmatprep.mubr.bf16.mxu0 %v6508_v39  ;;  %v2743_v37 = vmin.f32 %v7745_v45, 0.0  ;;  %v2872_v31 = vmul.f32 1.442695, %v2742_v54  ;;  %v4901_v47 = vadd.f32 -1.0, %v5974_v44 }
 0x29d   : > { %v2305_v55 = vpop.f32.mrf.mxu0  ;;  %v2111_v17 = vsel %vm1791_vm11, %v7664_v12, %v4898_v30  ;;  %vm2615_vm11 = vcmp.gt.f32.partialorder %v7745_v45, 0.0  ;;  %vm2612_vm13 = vcmp.gt.f32.partialorder %v7712_v53, 0.0 }
 0x29e   : > { %v2744_v5 = vmin.f32 %v7723_v63, 0.0  ;;  %v7733_v58 = vadd.f32 %v2305_v55, %v7714_v26  ;;  %v2874_v50 = vmul.f32 1.442695, %v2743_v37  ;;  %v7793_v34 = vsel %vm1794_vm12, %v7669_v20, %v4901_v47 }
 0x29f   : > { %v2307_v62 = vpop.f32.mrf.mxu0  ;;  %v7807_v20 = vsel %vm1797_vm14, %v7677_v28, %v4904_v52  ;;  %vm2616_vm2 = vcmp.gt.f32.partialorder %v7723_v63, 0.0 }
 0x2a0   : > { %v2745_v18 = vmin.f32 %v7733_v58, 0.0  ;;  %v7741_v21 = vadd.f32 %v2307_v62, %v7704_v57  ;;  %v2876_v38 = vmul.f32 1.442695, %v2744_v5  ;;  %vm2617_vm3 = vcmp.gt.f32.partialorder %v7733_v58, 0.0 }
 0x2a1   : > { %v2309_v33 = vpop.f32.mrf.mxu0 }
 0x2a2   : > { %v2746_v16 = vmin.f32 %v7741_v21, 0.0  ;;  %v2878_v42 = vmul.f32 1.442695, %v2745_v18  ;;  %v7756_v19 = vadd.f32 %v2309_v33, %v7714_v26  ;;  %5987 = vpow2.f32 %v2876_v38 }
 0x2a3   : > { %v2313_v4 = vpop.f32.mrf.mxu0  ;;  %2552 = vmatmul.mubr.bf16.gmra.mxu0 %v2145_v25  ;;  %v4905_v25 = vadd.f32 -1.0, %v5982_v1  ;;  %v4903_v38 = vadd.f32 -1.0, %v5984_v15  ;;  %vm2618_vm4 = vcmp.gt.f32.partialorder %v7741_v21, 0.0 }
 0x2a4   : > { %v2880_v48 = vmul.f32 1.442695, %v2746_v16  ;;  %v7761_v2 = vadd.f32 %v2313_v4, %v7704_v57  ;;  %2561 = vmatprep.mubr.bf16.mxu0 %v6508_v39  ;;  %v2747_v51 = vmin.f32 %v7756_v19, 0.0  ;;  %vm2619_vm5 = vcmp.gt.f32.partialorder %v7756_v19, 0.0 }
 0x2a5   : > { %v2315_v61 = vpop.f32.mrf.mxu0  ;;  %v7818_v13 = vsel %vm1798_vm0, %v7689_v40, %v4905_v25 }
 0x2a6   : > { %5989 = vpow2.f32 %v2880_v48  ;;  %v2748_v35 = vmin.f32 %v7761_v2, 0.0  ;;  %v7770_v14 = vadd.f32 %v2315_v61, %v7714_v26  ;;  %v2882_v10 = vmul.f32 1.442695, %v2747_v51 }
 0x2a7   : > { %5991 = vpow2.f32 %v2878_v42  ;;  %v2317_v7 = vpop.f32.mrf.mxu0  ;;  %v7812_v42 = vsel %vm1795_vm15, %v7685_v56, %v4902_v8  ;;  %v5986_v48 = vpop.eup %5985  ;;  %v2147_v56 = vpack.c.bf16 %v2112_v43, %v2111_v17  ;;  %vm2620_vm10 = vcmp.gt.f32.partialorder %v7761_v2, 0.0 }
 0x2a8   : > { %5993 = vpow2.f32 %v2870_v32  ;;  %v2749_v60 = vmin.f32 %v7770_v14, 0.0  ;;  %v7779_v55 = vadd.f32 %v2317_v7, %v7704_v57  ;;  %v2884_v5 = vmul.f32 1.442695, %v2748_v35 }
 0x2a9   : > { %5995 = vpow2.f32 %v2882_v10  ;;  %v2319_v3 = vpop.f32.mrf.mxu0  ;;  %v7823_v32 = vsel %vm1796_vm1, %v7693_v22, %v4903_v38  ;;  %v2148_v22 = vpack.c.bf16 %v7793_v34, %v7775_v0  ;;  %v2150_v35 = vpack.c.bf16 %v7818_v13, %v7807_v20 }
 0x2aa   : > { %5997 = vpow2.f32 %v2872_v31  ;;  %v2886_v59 = vmul.f32 1.442695, %v2749_v60  ;;  %v7782_v62 = vadd.f32 %v2319_v3, %v7714_v26  ;;  %v2750_v24 = vmin.f32 %v7779_v55, 0.0 }
 0x2ab   : > { %v2323_v18 = vpop.f32.mrf.mxu0  ;;  %2562 = vmatmul.mubr.bf16.gmra.mxu0 %v2146_v41  ;;  %v2149_v9 = vpack.c.bf16 %v7823_v32, %v7812_v42  ;;  %vm2621_vm8 = vcmp.gt.f32.partialorder %v7770_v14, 0.0  ;;  %vm2622_vm9 = vcmp.gt.f32.partialorder %v7779_v55, 0.0 }
 0x2ac   : > { %5999 = vpow2.f32 %v2886_v59  ;;  %v2751_v33 = vmin.f32 %v7782_v62, 0.0  ;;  %2571 = vmatprep.mubr.bf16.mxu0 %v6508_v39  ;;  %v2888_v12 = vmul.f32 1.442695, %v2750_v24  ;;  %v7796_v54 = vadd.f32 %v2323_v18, %v7704_v57 }
 0x2ad   : > { %6001 = vpow2.f32 %v2874_v50  ;;  %v2325_v16 = vpop.f32.mrf.mxu0  ;;  %v7852_v24 = vadd.f32 -1.0, %v5986_v48  ;;  %vm2623_vm12 = vcmp.gt.f32.partialorder %v7782_v62, 0.0 }
 0x2ae   : > { %6003 = vpow2.f32 %v2884_v5  ;;  %v2890_v23 = vmul.f32 1.442695, %v2751_v33  ;;  %v7802_v36 = vadd.f32 %v2325_v16, %v7714_v26  ;;  %v2752_v4 = vmin.f32 %v7796_v54, 0.0 }
 0x2af   : > { %6005 = vpow2.f32 %v2888_v12  ;;  %v2327_v44 = vpop.f32.mrf.mxu0  ;;  %v5988_v51 = vpop.eup %5987  ;;  %vm2624_vm14 = vcmp.gt.f32.partialorder %v7796_v54, 0.0 }
 0x2b0   : > { %6007 = vpow2.f32 %v2890_v23  ;;  %v2753_v28 = vmin.f32 %v7802_v36, 0.0  ;;  %v7827_v46 = vadd.f32 %v2327_v44, %v7704_v57  ;;  %v2892_v61 = vmul.f32 1.442695, %v2752_v4 }
 0x2b1   : > { %v2329_v37 = vpop.f32.mrf.mxu0  ;;  %v4926_v59 = vadd.f32 -1.0, %v5988_v51  ;;  %vm2625_vm1 = vcmp.gt.f32.partialorder %v7802_v36, 0.0 }
 0x2b2   : > { %v2894_v49 = vmul.f32 1.442695, %v2753_v28  ;;  %v7830_v40 = vadd.f32 %v2329_v37, %v7714_v26  ;;  %v2754_v41 = vmin.f32 %v7827_v46, 0.0  ;;  %vm2626_vm15 = vcmp.gt.f32.partialorder %v7827_v46, 0.0 }
 0x2b3   : > { %v5990_v31 = vpop.eup %5989  ;;  %v2333_v30 = vpop.f32.mrf.mxu0  ;;  %2572 = vmatmul.mubr.bf16.gmra.mxu0 %v2147_v56 }
 0x2b4   : > { %v5992_v10 = vpop.eup %5991  ;;  %v2755_v7 = vmin.f32 %v7830_v40, 0.0  ;;  %2581 = vmatprep.mubr.bf16.mxu0 %v6508_v39  ;;  %v4928_v0 = vadd.f32 -1.0, %v5990_v31  ;;  %6009 = vpow2.f32 %v2894_v49  ;;  %v2896_v47 = vmul.f32 1.442695, %v2754_v41 }
 0x2b5   : > { %v5994_v1 = vpop.eup %5993  ;;  %v7845_v60 = vadd.f32 %v2333_v30, %v7704_v57  ;;  %v2335_v15 = vpop.f32.mrf.mxu0  ;;  %6011 = vpow2.f32 %v2892_v61  ;;  %v4927_v8 = vadd.f32 -1.0, %v5992_v10  ;;  %vm2627_vm0 = vcmp.gt.f32.partialorder %v7830_v40, 0.0 }
 0x2b6   : > { %v5996_v27 = vpop.eup %5995  ;;  %v2898_v50 = vmul.f32 1.442695, %v2755_v7  ;;  %v7849_v3 = vadd.f32 %v2335_v15, %v7714_v26  ;;  %6013 = vpow2.f32 %v2896_v47  ;;  %v3258_v33 = vsel %vm2618_vm4, %v7741_v21, %v4928_v0 }
 0x2b7   : > { %v5998_v5 = vpop.eup %5997  ;;  %v2756_v17 = vmin.f32 %v7845_v60, 0.0  ;;  %v2337_v52 = vpop.f32.mrf.mxu0  ;;  %v4929_v12 = vadd.f32 -1.0, %v5996_v27  ;;  %v4923_v16 = vadd.f32 -1.0, %v5994_v1  ;;  %v3256_v21 = vsel %vm2616_vm2, %v7723_v63, %v4926_v59 }
 0x2b8   : > { %6015 = vpow2.f32 %v2898_v50  ;;  %v2757_v18 = vmin.f32 %v7849_v3, 0.0  ;;  %v7858_v25 = vadd.f32 %v2337_v52, %v7704_v57  ;;  %v4924_v23 = vadd.f32 -1.0, %v5998_v5 }
 0x2b9   : > { %v6000_v38 = vpop.eup %5999  ;;  %v2339_v34 = vpop.f32.mrf.mxu0  ;;  %v2900_v56 = vmul.f32 1.442695, %v2756_v17  ;;  %v3257_v51 = vsel %vm2617_vm3, %v7733_v58, %v4927_v8  ;;  %v3259_v61 = vsel %vm2619_vm5, %v7756_v19, %v4929_v12  ;;  %v3382_v31 = vpack.c.bf16 %v3258_v33, %v3256_v21 }
 0x2ba   : > { %v6002_v43 = vpop.eup %6001  ;;  %v2902_v4 = vmul.f32 1.442695, %v2757_v18  ;;  %v2758_v44 = vmin.f32 %v7858_v25, 0.0  ;;  %v7868_v28 = vadd.f32 %v2339_v34, %v7714_v26  ;;  %v4931_v10 = vadd.f32 -1.0, %v6000_v38 }
 0x2bb   : > { %v6004_v48 = vpop.eup %6003  ;;  %v2343_v37 = vpop.f32.mrf.mxu0  ;;  %2582 = vmatmul.mubr.bf16.gmra.mxu0 %v2148_v22  ;;  %v3383_v7 = vpack.c.bf16 %v3259_v61, %v3257_v51  ;;  %v4925_v17 = vadd.f32 -1.0, %v6002_v43  ;;  %v7897_v52 = vsel %vm2614_vm7, %v7729_v11, %v4924_v23  ;;  %v3253_v33 = vsel %vm2613_vm6, %v7720_v6, %v4923_v16 }
 0x2bc   : > { %v6006_v49 = vpop.eup %6005  ;;  %v2904_v41 = vmul.f32 1.442695, %v2758_v44  ;;  %v2759_v30 = vmin.f32 %v7868_v28, 0.0  ;;  %2591 = vmatprep.mubr.bf16.mxu0 %v6508_v39  ;;  %6017 = vpow2.f32 %v2902_v4  ;;  %v7883_v22 = vadd.f32 %v2343_v37, %v7704_v57 }
 0x2bd   : > { %v6008_v63 = vpop.eup %6007  ;;  %v2345_v1 = vpop.f32.mrf.mxu0  ;;  %v4932_v58 = vadd.f32 -1.0, %v6006_v49  ;;  %3619 = vmatprep.mubr.bf16.mxu1 %v3383_v7  ;;  %v4930_v50 = vadd.f32 -1.0, %v6004_v48  ;;  %vm2630_vm2 = vcmp.gt.f32.partialorder %v7858_v25, 0.0  ;;  %vm2631_vm3 = vcmp.gt.f32.partialorder %v7868_v28, 0.0 }
 0x2be   : > { %6019 = vpow2.f32 %v2904_v41  ;;  %v2906_v0 = vmul.f32 1.442695, %v2759_v30  ;;  %v7886_v19 = vadd.f32 %v2345_v1, %v7714_v26  ;;  %v4933_v47 = vadd.f32 -1.0, %v6008_v63  ;;  %3620 = vmatmul.mubr.bf16.vlgmr.msra.gmra.mxu1 %v3382_v31 }
 0x2bf   : > { %6021 = vpow2.f32 %v2900_v56  ;;  %v2760_v15 = vmin.f32 %v7883_v22, 0.0  ;;  %v2347_v27 = vpop.f32.mrf.mxu0  ;;  %v3262_v38 = vsel %vm2622_vm9, %v7779_v55, %v4932_v58  ;;  %v3260_v16 = vsel %vm2620_vm10, %v7761_v2, %v4930_v50 }
 0x2c0   : > { %6023 = vpow2.f32 %v2906_v0  ;;  %v2761_v5 = vmin.f32 %v7886_v19, 0.0  ;;  %v7892_v59 = vadd.f32 %v2347_v27, %v7704_v57  ;;  %v3263_v18 = vsel %vm2623_vm12, %v7782_v62, %v4933_v47 }
 0x2c1   : > { %v2349_v8 = vpop.f32.mrf.mxu0  ;;  %v6010_v34 = vpop.eup %6009  ;;  %v3261_v62 = vsel %vm2621_vm8, %v7770_v14, %v4931_v10  ;;  %v2908_v55 = vmul.f32 1.442695, %v2760_v15  ;;  %v3384_v56 = vpack.c.bf16 %v3262_v38, %v3260_v16  ;;  %v3255_v14 = vsel %vm2615_vm11, %v7745_v45, %v4925_v17 }
 0x2c2   : > { %v2910_v12 = vmul.f32 1.442695, %v2761_v5  ;;  %v2762_v43 = vmin.f32 %v7892_v59, 0.0  ;;  %v7909_v11 = vadd.f32 %v2349_v8, %v7714_v26  ;;  %v6012_v23 = vpop.eup %6011  ;;  %v3385_v6 = vpack.c.bf16 %v3263_v18, %v3261_v62 }
 0x2c3   : > { %v2353_v4 = vpop.f32.mrf.mxu0  ;;  %2592 = vmatmul.mubr.bf16.gmra.mxu0 %v2149_v9  ;;  %v6014_v44 = vpop.eup %6013  ;;  %v4935_v9 = vadd.f32 -1.0, %v6010_v34  ;;  %v4934_v31 = vadd.f32 -1.0, %v6012_v23  ;;  %v3381_v7 = vpack.c.bf16 %v3255_v14, %v3253_v33  ;;  %v3252_v5 = vsel %vm2612_vm13, %v7712_v53, %v7852_v24 }
 0x2c4   : > { %v2912_v48 = vmul.f32 1.442695, %v2762_v43  ;;  %v2763_v21 = vmin.f32 %v7909_v11, 0.0  ;;  %2601 = vmatprep.mubr.bf16.mxu0 %v6508_v39  ;;  %6025 = vpow2.f32 %v2910_v12  ;;  %v7927_v42 = vadd.f32 %v2353_v4, %v7704_v57  ;;  %3627 = vmatprep.mubr.bf16.mxu1 %v3385_v6 }
 0x2c5   : > { %v6016_v37 = vpop.eup %6015  ;;  %v2355_v32 = vpop.f32.mrf.mxu0  ;;  %v4936_v2 = vadd.f32 -1.0, %v6014_v44  ;;  %v3265_v27 = vsel %vm2625_vm1, %v7802_v36, %v4935_v9  ;;  %v3264_v8 = vsel %vm2624_vm14, %v7796_v54, %v4934_v31  ;;  %v3380_v36 = vpack.c.bf16 %v7897_v52, %v3252_v5 }
 0x2c6   : > { %6027 = vpow2.f32 %v2912_v48  ;;  %v2914_v51 = vmul.f32 1.442695, %v2763_v21  ;;  %v7930_v61 = vadd.f32 %v2355_v32, %v7714_v26  ;;  %v4937_v49 = vadd.f32 -1.0, %v6016_v37  ;;  %3628 = vmatmul.mubr.bf16.gmra.mxu1 %v3384_v56 }
 0x2c7   : > { %6029 = vpow2.f32 %v2908_v55  ;;  %v2764_v39 = vmin.f32 %v7927_v42, 0.0  ;;  %v2357_v45 = vpop.f32.mrf.mxu0  ;;  %v3266_v1 = vsel %vm2626_vm15, %v7827_v46, %v4936_v2  ;;  %vm2628_vm4 = vcmp.gt.f32.partialorder %v7845_v60, 0.0 }
 0x2c8   : > { %6031 = vpow2.f32 %v2914_v51  ;;  %v2765_v41 = vmin.f32 %v7930_v61, 0.0  ;;  %v7937_v30 = vadd.f32 %v2357_v45, %v7704_v57  ;;  %v3267_v63 = vsel %vm2627_vm0, %v7830_v40, %v4937_v49 }
 0x2c9   : > { %v2359_v10 = vpop.f32.mrf.mxu0  ;;  %v6018_v58 = vpop.eup %6017  ;;  %v2916_v17 = vmul.f32 1.442695, %v2764_v39  ;;  %v3387_v46 = vpack.c.bf16 %v3267_v63, %v3265_v27  ;;  %v3386_v34 = vpack.c.bf16 %v3266_v1, %v3264_v8  ;;  %vm2629_vm5 = vcmp.gt.f32.partialorder %v7849_v3, 0.0 }
 0x2ca   : > { %v2918_v0 = vmul.f32 1.442695, %v2765_v41  ;;  %v2766_v47 = vmin.f32 %v7937_v30, 0.0  ;;  %v7944_v15 = vadd.f32 %v2359_v10, %v7714_v26  ;;  %v4939_v13 = vadd.f32 -1.0, %v6018_v58 }
 0x2cb   : > { %v6020_v50 = vpop.eup %6019  ;;  %v2363_v40 = vpop.f32.mrf.mxu0  ;;  %2602 = vmatmul.mubr.bf16.gmra.mxu0 %v2150_v35  ;;  %3635 = vmatprep.mubr.bf16.mxu1 %v3387_v46  ;;  %vm2634_vm6 = vcmp.gt.f32.partialorder %v7892_v59, 0.0  ;;  %vm2635_vm7 = vcmp.gt.f32.partialorder %v7909_v11, 0.0  ;;  %vm2632_vm8 = vcmp.gt.f32.partialorder %v7883_v22, 0.0  ;;  %vm2633_vm9 = vcmp.gt.f32.partialorder %v7886_v19, 0.0 }
 0x2cc   : > { %v6022_v18 = vpop.eup %6021  ;;  %v2920_v38 = vmul.f32 1.442695, %v2766_v47  ;;  %v2767_v33 = vmin.f32 %v7944_v15, 0.0  ;;  %3611 = vmatprep.mubr.bf16.mxu0 %v3381_v7  ;;  %6033 = vpow2.f32 %v2918_v0  ;;  %v7960_v24 = vadd.f32 %v2363_v40, %v7704_v57 }
 0x2cd   : > { %v6024_v53 = vpop.eup %6023  ;;  %v2365_v20 = vpop.f32.mrf.mxu0  ;;  %v4940_v35 = vadd.f32 -1.0, %v6020_v50  ;;  %v4938_v23 = vadd.f32 -1.0, %v6022_v18  ;;  %v3269_v37 = vsel %vm2629_vm5, %v7849_v3, %v4939_v13  ;;  %vm2638_vm10 = vcmp.gt.f32.partialorder %v7937_v30, 0.0 }
 0x2ce   : > { %6035 = vpow2.f32 %v2920_v38  ;;  %v2922_v12 = vmul.f32 1.442695, %v2767_v33  ;;  %v7963_v54 = vadd.f32 %v2365_v20, %v7714_v26  ;;  %v4941_v52 = vadd.f32 -1.0, %v6024_v53  ;;  %3636 = vmatmul.mubr.bf16.gmra.mxu1 %v3386_v34 }
 0x2cf   : > { %6037 = vpow2.f32 %v2916_v17  ;;  %v2768_v43 = vmin.f32 %v7960_v24, 0.0  ;;  %v2367_v62 = vpop.f32.mrf.mxu0  ;;  %v3270_v44 = vsel %vm2630_vm2, %v7858_v25, %v4940_v35  ;;  %v3268_v49 = vsel %vm2628_vm4, %v7845_v60, %v4938_v23 }
 0x2d0   : > { %6039 = vpow2.f32 %v2922_v12  ;;  %v2769_v55 = vmin.f32 %v7963_v54, 0.0  ;;  %v7970_v4 = vadd.f32 %v2367_v62, %v7704_v57  ;;  %v3271_v16 = vsel %vm2631_vm3, %v7868_v28, %v4941_v52 }
 0x2d1   : > { %v2369_v6 = vpop.f32.mrf.mxu0  ;;  %v6026_v48 = vpop.eup %6025  ;;  %v2924_v9 = vmul.f32 1.442695, %v2768_v43  ;;  %v3389_v51 = vpack.c.bf16 %v3271_v16, %v3269_v37  ;;  %v3388_v45 = vpack.c.bf16 %v3270_v44, %v3268_v49  ;;  %vm2639_vm11 = vcmp.gt.f32.partialorder %v7944_v15, 0.0 }
 0x2d2   : > { %v2926_v21 = vmul.f32 1.442695, %v2769_v55  ;;  %v2770_v56 = vmin.f32 %v7970_v4, 0.0  ;;  %v7978_v14 = vadd.f32 %v2369_v6, %v7714_v26  ;;  %v4943_v3 = vadd.f32 -1.0, %v6026_v48 }
 0x2d3   : > { %v6028_v32 = vpop.eup %6027  ;;  %v2373_v2 = vpop.f32.mrf.mxu0  ;;  %3612 = vmatmul.mubr.bf16.vlgmr.msra.gmra.mxu0 %v3380_v36  ;;  %3643 = vmatprep.mubr.bf16.mxu1 %v3389_v51  ;;  %vm2636_vm12 = vcmp.gt.f32.partialorder %v7927_v42, 0.0  ;;  %vm2637_vm13 = vcmp.gt.f32.partialorder %v7930_v61, 0.0  ;;  %vm2642_vm14 = vcmp.gt.f32.partialorder %v7970_v4, 0.0  ;;  %vm2640_vm0 = vcmp.gt.f32.partialorder %v7960_v24, 0.0 }
 0x2d4   : > { %v6030_v39 = vpop.eup %6029  ;;  %v2928_v28 = vmul.f32 1.442695, %v2770_v56  ;;  %v2771_v25 = vmin.f32 %v7978_v14, 0.0  ;;  %6041 = vpow2.f32 %v2926_v21  ;;  %v7984_v41 = vadd.f32 %v2373_v2, %v7704_v57 }
 0x2d5   : > { %v6032_v31 = vpop.eup %6031  ;;  %v2375_v10 = vpop.f32.mrf.mxu0  ;;  %v4944_v63 = vadd.f32 -1.0, %v6028_v32  ;;  %v4942_v47 = vadd.f32 -1.0, %v6030_v39  ;;  %v3273_v38 = vsel %vm2633_vm9, %v7886_v19, %v4943_v3  ;;  %vm2643_vm15 = vcmp.gt.f32.partialorder %v7978_v14, 0.0 }
 0x2d6   : > { %6043 = vpow2.f32 %v2928_v28  ;;  %v2930_v7 = vmul.f32 1.442695, %v2771_v25  ;;  %v7987_v1 = vadd.f32 %v2375_v10, %v7714_v26  ;;  %v4945_v60 = vadd.f32 -1.0, %v6032_v31  ;;  %3644 = vmatmul.mubr.bf16.gmra.mxu1 %v3388_v45 }
 0x2d7   : > { %6045 = vpow2.f32 %v2924_v9  ;;  %v2772_v58 = vmin.f32 %v7984_v41, 0.0  ;;  %v2377_v0 = vpop.f32.mrf.mxu0  ;;  %v3274_v40 = vsel %vm2634_vm6, %v7892_v59, %v4944_v63  ;;  %v3272_v13 = vsel %vm2632_vm8, %v7883_v22, %v4942_v47 }
 0x2d8   : > { %6047 = vpow2.f32 %v2930_v7  ;;  %v2773_v27 = vmin.f32 %v7987_v1, 0.0  ;;  %v7994_v50 = vadd.f32 %v2377_v0, %v7704_v57  ;;  %v3275_v17 = vsel %vm2635_vm7, %v7909_v11, %v4945_v60 }
 0x2d9   : > { %v2379_v5 = vpop.f32.mrf.mxu0  ;;  %v6034_v46 = vpop.eup %6033  ;;  %v2932_v34 = vmul.f32 1.442695, %v2772_v58  ;;  %v3391_v20 = vpack.c.bf16 %v3275_v17, %v3273_v38  ;;  %v3390_v59 = vpack.c.bf16 %v3274_v40, %v3272_v13  ;;  %vm2641_vm1 = vcmp.gt.f32.partialorder %v7963_v54, 0.0 }
 0x2da   : > { %v2934_v8 = vmul.f32 1.442695, %v2773_v27  ;;  %v2774_v18 = vmin.f32 %v7994_v50, 0.0  ;;  %v8002_v36 = vadd.f32 %v2379_v5, %v7714_v26  ;;  %v4947_v23 = vadd.f32 -1.0, %v6034_v46 }
 0x2db   : > { %v6036_v33 = vpop.eup %6035  ;;  %v2383_v53 = vpop.f32.mrf.mxu0  ;;  %3651 = vmatprep.mubr.bf16.mxu1 %v3391_v20  ;;  %vm2646_vm2 = vcmp.gt.f32.partialorder %v7994_v50, 0.0  ;;  %vm2644_vm4 = vcmp.gt.f32.partialorder %v7984_v41, 0.0  ;;  %vm2645_vm5 = vcmp.gt.f32.partialorder %v7987_v1, 0.0 }
 0x2dc   : > { %v6038_v35 = vpop.eup %6037  ;;  %v2936_v12 = vmul.f32 1.442695, %v2774_v18  ;;  %v2775_v11 = vmin.f32 %v8002_v36, 0.0  ;;  %6049 = vpow2.f32 %v2934_v8  ;;  %v8008_v43 = vadd.f32 %v2383_v53, %v7704_v57 }
 0x2dd   : > { %v6040_v52 = vpop.eup %6039  ;;  %v2385_v62 = vpop.f32.mrf.mxu0  ;;  %v4948_v19 = vadd.f32 -1.0, %v6036_v33  ;;  %v4946_v48 = vadd.f32 -1.0, %v6038_v35  ;;  %v3277_v28 = vsel %vm2637_vm13, %v7930_v61, %v4947_v23  ;;  %vm2647_vm3 = vcmp.gt.f32.partialorder %v8002_v36, 0.0 }
 0x2de   : > { %6051 = vpow2.f32 %v2936_v12  ;;  %v2938_v55 = vmul.f32 1.442695, %v2775_v11  ;;  %v8011_v6 = vadd.f32 %v2385_v62, %v7714_v26  ;;  %v4949_v22 = vadd.f32 -1.0, %v6040_v52  ;;  %3652 = vmatmul.mubr.bf16.gmra.mxu1 %v3390_v59 }
 0x2df   : > { %6053 = vpow2.f32 %v2932_v34  ;;  %v2776_v16 = vmin.f32 %v8008_v43, 0.0  ;;  %v2387_v44 = vpop.f32.mrf.mxu0  ;;  %v3278_v9 = vsel %vm2638_vm10, %v7937_v30, %v4948_v19  ;;  %v3276_v3 = vsel %vm2636_vm12, %v7927_v42, %v4946_v48 }
 0x2e0   : > { %6055 = vpow2.f32 %v2938_v55  ;;  %v2777_v21 = vmin.f32 %v8011_v6, 0.0  ;;  %v8018_v56 = vadd.f32 %v2387_v44, %v7704_v57  ;;  %v3279_v32 = vsel %vm2639_vm11, %v7944_v15, %v4949_v22 }
 0x2e1   : > { %v2389_v37 = vpop.f32.mrf.mxu0  ;;  %v6042_v2 = vpop.eup %6041  ;;  %v2940_v45 = vmul.f32 1.442695, %v2776_v16  ;;  %v3393_v10 = vpack.c.bf16 %v3279_v32, %v3277_v28  ;;  %v3392_v30 = vpack.c.bf16 %v3278_v9, %v3276_v3  ;;  %vm2648_vm8 = vcmp.gt.f32.partialorder %v8008_v43, 0.0 }
 0x2e2   : > { %v2942_v51 = vmul.f32 1.442695, %v2777_v21  ;;  %v2778_v49 = vmin.f32 %v8018_v56, 0.0  ;;  %v8026_v39 = vadd.f32 %v2389_v37, %v7714_v26  ;;  %v4951_v47 = vadd.f32 -1.0, %v6042_v2 }
 0x2e3   : > { %v6044_v25 = vpop.eup %6043  ;;  %v2393_v31 = vpop.f32.mrf.mxu0  ;;  %3659 = vmatprep.mubr.bf16.mxu1 %v3393_v10  ;;  %vm2650_vm6 = vcmp.gt.f32.partialorder %v8018_v56, 0.0  ;;  %vm2649_vm9 = vcmp.gt.f32.partialorder %v8011_v6, 0.0 }
 0x2e4   : > { %v6046_v63 = vpop.eup %6045  ;;  %v2944_v7 = vmul.f32 1.442695, %v2778_v49  ;;  %v2779_v15 = vmin.f32 %v8026_v39, 0.0  ;;  %6057 = vpow2.f32 %v2942_v51  ;;  %v8032_v58 = vadd.f32 %v2393_v31, %v7704_v57 }
 0x2e5   : > { %v6048_v60 = vpop.eup %6047  ;;  %v2395_v0 = vpop.f32.mrf.mxu0  ;;  %v4952_v61 = vadd.f32 -1.0, %v6044_v25  ;;  %v4950_v46 = vadd.f32 -1.0, %v6046_v63  ;;  %v3281_v12 = vsel %vm2641_vm1, %v7963_v54, %v4951_v47  ;;  %vm2651_vm7 = vcmp.gt.f32.partialorder %v8026_v39, 0.0 }
 0x2e6   : > { %6059 = vpow2.f32 %v2944_v7  ;;  %v2946_v27 = vmul.f32 1.442695, %v2779_v15  ;;  %v8035_v5 = vadd.f32 %v2395_v0, %v7714_v26  ;;  %v4953_v42 = vadd.f32 -1.0, %v6048_v60  ;;  %3660 = vmatmul.mubr.bf16.gmra.mxu1 %v3392_v30 }
 0x2e7   : > { %6061 = vpow2.f32 %v2940_v45  ;;  %v2780_v17 = vmin.f32 %v8032_v58, 0.0  ;;  %v2397_v40 = vpop.f32.mrf.mxu0  ;;  %v3282_v34 = vsel %vm2642_vm14, %v7970_v4, %v4952_v61  ;;  %v3280_v23 = vsel %vm2640_vm0, %v7960_v24, %v4950_v46 }
 0x2e8   : > { %6063 = vpow2.f32 %v2946_v27  ;;  %v2781_v8 = vmin.f32 %v8035_v5, 0.0  ;;  %v8042_v18 = vadd.f32 %v2397_v40, %v7704_v57  ;;  %v3283_v33 = vsel %vm2643_vm15, %v7978_v14, %v4953_v42 }
 0x2e9   : > { %v2399_v38 = vpop.f32.mrf.mxu0  ;;  %v6050_v53 = vpop.eup %6049  ;;  %v2948_v59 = vmul.f32 1.442695, %v2780_v17  ;;  %v3395_v62 = vpack.c.bf16 %v3283_v33, %v3281_v12  ;;  %v3394_v4 = vpack.c.bf16 %v3282_v34, %v3280_v23  ;;  %vm2653_vm10 = vcmp.gt.f32.partialorder %v8035_v5, 0.0 }
 0x2ea   : > { %v2950_v20 = vmul.f32 1.442695, %v2781_v8  ;;  %v2782_v13 = vmin.f32 %v8042_v18, 0.0  ;;  %v8050_v35 = vadd.f32 %v2399_v38, %v7714_v26  ;;  %v4955_v48 = vadd.f32 -1.0, %v6050_v53 }
 0x2eb   : > { %v6052_v11 = vpop.eup %6051  ;;  %v2403_v52 = vpop.f32.mrf.mxu0  ;;  %3667 = vmatprep.mubr.bf16.mxu1 %v3395_v62  ;;  %vm2654_vm12 = vcmp.gt.f32.partialorder %v8042_v18, 0.0  ;;  %vm2652_vm13 = vcmp.gt.f32.partialorder %v8032_v58, 0.0 }
 0x2ec   : > { %v6054_v19 = vpop.eup %6053  ;;  %v2952_v55 = vmul.f32 1.442695, %v2782_v13  ;;  %v2783_v14 = vmin.f32 %v8050_v35, 0.0  ;;  %6065 = vpow2.f32 %v2950_v20  ;;  %v8056_v16 = vadd.f32 %v2403_v52, %v7704_v57 }
 0x2ed   : > { %v6056_v22 = vpop.eup %6055  ;;  %v2405_v44 = vpop.f32.mrf.mxu0  ;;  %v4956_v54 = vadd.f32 -1.0, %v6052_v11  ;;  %v4954_v2 = vadd.f32 -1.0, %v6054_v19  ;;  %v3285_v7 = vsel %vm2645_vm5, %v7987_v1, %v4955_v48  ;;  %vm2655_vm11 = vcmp.gt.f32.partialorder %v8050_v35, 0.0 }
 0x2ee   : > { %6067 = vpow2.f32 %v2952_v55  ;;  %v2954_v21 = vmul.f32 1.442695, %v2783_v14  ;;  %v8059_v37 = vadd.f32 %v2405_v44, %v7714_v26  ;;  %v4957_v24 = vadd.f32 -1.0, %v6056_v22  ;;  %3668 = vmatmul.mubr.bf16.gmra.mxu1 %v3394_v4 }
 0x2ef   : > { %6069 = vpow2.f32 %v2948_v59  ;;  %v2784_v32 = vmin.f32 %v8056_v16, 0.0  ;;  %v2407_v9 = vpop.f32.mrf.mxu0  ;;  %v3286_v45 = vsel %vm2646_vm2, %v7994_v50, %v4956_v54  ;;  %v3284_v47 = vsel %vm2644_vm4, %v7984_v41, %v4954_v2 }
 0x2f0   : > { %6071 = vpow2.f32 %v2954_v21  ;;  %v2785_v51 = vmin.f32 %v8059_v37, 0.0  ;;  %v8066_v49 = vadd.f32 %v2407_v9, %v7704_v57  ;;  %v3287_v25 = vsel %vm2647_vm3, %v8002_v36, %v4957_v24 }
 0x2f1   : > { %v2409_v28 = vpop.f32.mrf.mxu0  ;;  %v6058_v31 = vpop.eup %6057  ;;  %v2956_v30 = vmul.f32 1.442695, %v2784_v32  ;;  %v3397_v0 = vpack.c.bf16 %v3287_v25, %v3285_v7  ;;  %v3396_v50 = vpack.c.bf16 %v3286_v45, %v3284_v47  ;;  %vm2657_vm14 = vcmp.gt.f32.partialorder %v8059_v37, 0.0 }
 0x2f2   : > { %v2958_v10 = vmul.f32 1.442695, %v2785_v51  ;;  %v2786_v3 = vmin.f32 %v8066_v49, 0.0  ;;  %v8074_v63 = vadd.f32 %v2409_v28, %v7714_v26  ;;  %v4959_v46 = vadd.f32 -1.0, %v6058_v31 }
 0x2f3   : > { %v6060_v15 = vpop.eup %6059  ;;  %v2413_v60 = vpop.f32.mrf.mxu0  ;;  %3675 = vmatprep.mubr.bf16.mxu1 %v3397_v0  ;;  %vm2658_vm0 = vcmp.gt.f32.partialorder %v8066_v49, 0.0  ;;  %vm2656_vm1 = vcmp.gt.f32.partialorder %v8056_v16, 0.0 }
 0x2f4   : > { %v6062_v61 = vpop.eup %6061  ;;  %v2960_v27 = vmul.f32 1.442695, %v2786_v3  ;;  %v2787_v36 = vmin.f32 %v8074_v63, 0.0  ;;  %6073 = vpow2.f32 %v2958_v10  ;;  %v8080_v17 = vadd.f32 %v2413_v60, %v7704_v57 }
 0x2f5   : > { %v6064_v42 = vpop.eup %6063  ;;  %v2415_v40 = vpop.f32.mrf.mxu0  ;;  %v4960_v1 = vadd.f32 -1.0, %v6060_v15  ;;  %v4958_v53 = vadd.f32 -1.0, %v6062_v61  ;;  %v3289_v55 = vsel %vm2649_vm9, %v8011_v6, %v4959_v46  ;;  %vm2659_vm15 = vcmp.gt.f32.partialorder %v8074_v63, 0.0 }
 0x2f6   : > { %6075 = vpow2.f32 %v2960_v27  ;;  %v2962_v8 = vmul.f32 1.442695, %v2787_v36  ;;  %v8083_v38 = vadd.f32 %v2415_v40, %v7714_v26  ;;  %v4961_v41 = vadd.f32 -1.0, %v6064_v42  ;;  %3676 = vmatmul.mubr.bf16.gmra.mxu1 %v3396_v50 }
 0x2f7   : > { %6077 = vpow2.f32 %v2956_v30  ;;  %v2788_v33 = vmin.f32 %v8080_v17, 0.0  ;;  %v2417_v34 = vpop.f32.mrf.mxu0  ;;  %v3290_v59 = vsel %vm2650_vm6, %v8018_v56, %v4960_v1  ;;  %v3288_v48 = vsel %vm2648_vm8, %v8008_v43, %v4958_v53 }
 0x2f8   : > { %6079 = vpow2.f32 %v2962_v8  ;;  %v2789_v20 = vmin.f32 %v8083_v38, 0.0  ;;  %v8090_v13 = vadd.f32 %v2417_v34, %v7704_v57  ;;  %v3291_v11 = vsel %vm2651_vm7, %v8026_v39, %v4961_v41 }
 0x2f9   : > { %v2419_v12 = vpop.f32.mrf.mxu0  ;;  %v6066_v52 = vpop.eup %6065  ;;  %v2964_v4 = vmul.f32 1.442695, %v2788_v33  ;;  %v3399_v44 = vpack.c.bf16 %v3291_v11, %v3289_v55  ;;  %v3398_v56 = vpack.c.bf16 %v3290_v59, %v3288_v48  ;;  %vm2661_vm2 = vcmp.gt.f32.partialorder %v8083_v38, 0.0 }
 0x2fa   : > { %v2966_v62 = vmul.f32 1.442695, %v2789_v20  ;;  %v2790_v23 = vmin.f32 %v8090_v13, 0.0  ;;  %v8098_v19 = vadd.f32 %v2419_v12, %v7714_v26  ;;  %v4963_v2 = vadd.f32 -1.0, %v6066_v52 }
 0x2fb   : > { %v6068_v14 = vpop.eup %6067  ;;  %v2423_v22 = vpop.f32.mrf.mxu0  ;;  %3683 = vmatprep.mubr.bf16.mxu1 %v3399_v44  ;;  %vm2662_vm4 = vcmp.gt.f32.partialorder %v8090_v13, 0.0  ;;  %vm2660_vm5 = vcmp.gt.f32.partialorder %v8080_v17, 0.0 }
 0x2fc   : > { %v6070_v54 = vpop.eup %6069  ;;  %v2968_v21 = vmul.f32 1.442695, %v2790_v23  ;;  %v2791_v39 = vmin.f32 %v8098_v19, 0.0  ;;  %6081 = vpow2.f32 %v2966_v62  ;;  %v8104_v32 = vadd.f32 %v2423_v22, %v7704_v57 }
 0x2fd   : > { %v6072_v24 = vpop.eup %6071  ;;  %v2425_v9 = vpop.f32.mrf.mxu0  ;;  %v4964_v6 = vadd.f32 -1.0, %v6068_v14  ;;  %v4962_v3 = vadd.f32 -1.0, %v6070_v54  ;;  %v3293_v15 = vsel %vm2653_vm10, %v8035_v5, %v4963_v2  ;;  %vm2663_vm3 = vcmp.gt.f32.partialorder %v8098_v19, 0.0 }
 0x2fe   : > { %6083 = vpow2.f32 %v2968_v21  ;;  %v2970_v51 = vmul.f32 1.442695, %v2791_v39  ;;  %v8107_v28 = vadd.f32 %v2425_v9, %v7714_v26  ;;  %v4965_v43 = vadd.f32 -1.0, %v6072_v24  ;;  %3684 = vmatmul.mubr.bf16.gmra.mxu1 %v3398_v56 }
 0x2ff   : > { %6085 = vpow2.f32 %v2964_v4  ;;  %v2792_v25 = vmin.f32 %v8104_v32, 0.0  ;;  %v2427_v45 = vpop.f32.mrf.mxu0  ;;  %v3294_v27 = vsel %vm2654_vm12, %v8042_v18, %v4964_v6  ;;  %v3292_v1 = vsel %vm2652_vm13, %v8032_v58, %v4962_v3 }
 0x300   : > { %6087 = vpow2.f32 %v2970_v51  ;;  %v2793_v31 = vmin.f32 %v8107_v28, 0.0  ;;  %v8114_v10 = vadd.f32 %v2427_v45, %v7704_v57  ;;  %v3295_v30 = vsel %vm2655_vm11, %v8050_v35, %v4965_v43 }
 0x301   : > { %v2429_v7 = vpop.f32.mrf.mxu0  ;;  %v6074_v60 = vpop.eup %6073  ;;  %v2972_v50 = vmul.f32 1.442695, %v2792_v25  ;;  %v3401_v40 = vpack.c.bf16 %v3295_v30, %v3293_v15  ;;  %v3400_v33 = vpack.c.bf16 %v3294_v27, %v3292_v1  ;;  %vm2665_vm6 = vcmp.gt.f32.partialorder %v8107_v28, 0.0 }
 0x302   : > { %v2974_v0 = vmul.f32 1.442695, %v2793_v31  ;;  %v2794_v47 = vmin.f32 %v8114_v10, 0.0  ;;  %v8121_v61 = vadd.f32 %v2429_v7, %v7714_v26  ;;  %v4967_v34 = vadd.f32 -1.0, %v6074_v60 }
 0x303   : > { %v6076_v36 = vpop.eup %6075  ;;  %v2433_v42 = vpop.f32.mrf.mxu0  ;;  %3691 = vmatprep.mubr.bf16.mxu1 %v3401_v40  ;;  %vm2666_vm8 = vcmp.gt.f32.partialorder %v8114_v10, 0.0  ;;  %vm2664_vm9 = vcmp.gt.f32.partialorder %v8104_v32, 0.0 }
 0x304   : > { %v6078_v46 = vpop.eup %6077  ;;  %6089 = vpow2.f32 %v2974_v0  ;;  %v2976_v5 = vmul.f32 1.442695, %v2794_v47  ;;  %v2795_v35 = vmin.f32 %v8121_v61, 0.0  ;;  %v8128_v41 = vadd.f32 %v2433_v42, %v7704_v57 }
 0x305   : > { %v6080_v8 = vpop.eup %6079  ;;  %v2435_v18 = vpop.f32.mrf.mxu0  ;;  %v4968_v53 = vadd.f32 -1.0, %v6076_v36  ;;  %v4966_v23 = vadd.f32 -1.0, %v6078_v46  ;;  %v3297_v14 = vsel %vm2657_vm14, %v8059_v37, %v4967_v34  ;;  %vm2667_vm7 = vcmp.gt.f32.partialorder %v8121_v61, 0.0 }
 0x306   : > { %6091 = vpow2.f32 %v2976_v5  ;;  %v2978_v20 = vmul.f32 1.442695, %v2795_v35  ;;  %v8131_v12 = vadd.f32 %v2435_v18, %v7714_v26  ;;  %v4969_v11 = vadd.f32 -1.0, %v6080_v8  ;;  %3692 = vmatmul.mubr.bf16.gmra.mxu1 %v3400_v33 }
 0x307   : > { %6093 = vpow2.f32 %v2972_v50  ;;  %v2796_v58 = vmin.f32 %v8128_v41, 0.0  ;;  %v2437_v59 = vpop.f32.mrf.mxu0  ;;  %v3298_v21 = vsel %vm2658_vm0, %v8066_v49, %v4968_v53  ;;  %v3296_v6 = vsel %vm2656_vm1, %v8056_v16, %v4966_v23 }
 0x308   : > { %6095 = vpow2.f32 %v2978_v20  ;;  %v2797_v52 = vmin.f32 %v8131_v12, 0.0  ;;  %v8138_v62 = vadd.f32 %v2437_v59, %v7704_v57  ;;  %v3299_v4 = vsel %vm2659_vm15, %v8074_v63, %v4969_v11 }
 0x309   : > { %v2439_v55 = vpop.f32.mrf.mxu0  ;;  %v6082_v22 = vpop.eup %6081  ;;  %v2980_v56 = vmul.f32 1.442695, %v2796_v58  ;;  %v3403_v9 = vpack.c.bf16 %v3299_v4, %v3297_v14  ;;  %v3402_v25 = vpack.c.bf16 %v3298_v21, %v3296_v6  ;;  %vm2669_vm10 = vcmp.gt.f32.partialorder %v8131_v12, 0.0 }
 0x30a   : > { %v2982_v44 = vmul.f32 1.442695, %v2797_v52  ;;  %v2798_v48 = vmin.f32 %v8138_v62, 0.0  ;;  %v8145_v54 = vadd.f32 %v2439_v55, %v7714_v26  ;;  %v4971_v45 = vadd.f32 -1.0, %v6082_v22 }
 0x30b   : > { %v6084_v39 = vpop.eup %6083  ;;  %v2443_v24 = vpop.f32.mrf.mxu0  ;;  %3699 = vmatprep.mubr.bf16.mxu1 %v3403_v9  ;;  %vm2670_vm12 = vcmp.gt.f32.partialorder %v8138_v62, 0.0  ;;  %vm2668_vm13 = vcmp.gt.f32.partialorder %v8128_v41, 0.0 }
 0x30c   : > { %v6086_v2 = vpop.eup %6085  ;;  %6097 = vpow2.f32 %v2982_v44  ;;  %v2984_v37 = vmul.f32 1.442695, %v2798_v48  ;;  %v2799_v63 = vmin.f32 %v8145_v54, 0.0  ;;  %v8152_v43 = vadd.f32 %v2443_v24, %v7704_v57 }
 0x30d   : > { %v6088_v51 = vpop.eup %6087  ;;  %v2445_v49 = vpop.f32.mrf.mxu0  ;;  %v4972_v31 = vadd.f32 -1.0, %v6084_v39  ;;  %v4970_v47 = vadd.f32 -1.0, %v6086_v2  ;;  %v3301_v42 = vsel %vm2661_vm2, %v8083_v38, %v4971_v45  ;;  %vm2671_vm11 = vcmp.gt.f32.partialorder %v8145_v54, 0.0 }
 0x30e   : > { %6099 = vpow2.f32 %v2984_v37  ;;  %v2986_v3 = vmul.f32 1.442695, %v2799_v63  ;;  %v8155_v7 = vadd.f32 %v2445_v49, %v7714_v26  ;;  %v4973_v15 = vadd.f32 -1.0, %v6088_v51  ;;  %3700 = vmatmul.mubr.bf16.gmra.mxu1 %v3402_v25 }
 0x30f   : > { %6101 = vpow2.f32 %v2980_v56  ;;  %v2800_v16 = vmin.f32 %v8152_v43, 0.0  ;;  %v2447_v30 = vpop.f32.mrf.mxu0  ;;  %v3302_v1 = vsel %vm2662_vm4, %v8090_v13, %v4972_v31  ;;  %vm2672_vm0 = vcmp.gt.f32.partialorder %v8152_v43, 0.0 }
 0x310   : > { %6103 = vpow2.f32 %v2986_v3  ;;  %v2801_v60 = vmin.f32 %v8155_v7, 0.0  ;;  %v8162_v0 = vadd.f32 %v2447_v30, %v7704_v57  ;;  %v3303_v40 = vsel %vm2663_vm3, %v8098_v19, %v4973_v15 }
 0x311   : > { %v6090_v27 = vpop.eup %6089  ;;  %v2988_v36 = vmul.f32 1.442695, %v2800_v16  ;;  %v2449_v50 = vpop.f32.mrf.mxu0  ;;  %v3405_v18 = vpack.c.bf16 %v3303_v40, %v3301_v42  ;;  %v3300_v19 = vsel %vm2660_vm5, %v8080_v17, %v4970_v47  ;;  %vm2673_vm1 = vcmp.gt.f32.partialorder %v8155_v7, 0.0 }
 0x312   : > { %v2990_v46 = vmul.f32 1.442695, %v2801_v60  ;;  %v2802_v5 = vmin.f32 %v8162_v0, 0.0  ;;  %v8169_v35 = vadd.f32 %v2449_v50, %v7714_v26  ;;  %v4975_v53 = vadd.f32 -1.0, %v6090_v27 }
 0x313   : > { %v6092_v8 = vpop.eup %6091  ;;  %v2453_v33 = vpop.f32.mrf.mxu0  ;;  %6105 = vpow2.f32 %v2988_v36  ;;  %3707 = vmatprep.mubr.bf16.mxu1 %v3405_v18  ;;  %v3404_v58 = vpack.c.bf16 %v3302_v1, %v3300_v19  ;;  %vm2674_vm14 = vcmp.gt.f32.partialorder %v8162_v0, 0.0 }
 0x314   : > { %v6094_v34 = vpop.eup %6093  ;;  %v2992_v38 = vmul.f32 1.442695, %v2802_v5  ;;  %v2803_v11 = vmin.f32 %v8169_v35, 0.0  ;;  %v8178_v13 = vadd.f32 %v2453_v33, %v7704_v57  ;;  %v4976_v52 = vadd.f32 -1.0, %v6092_v8 }
 0x315   : > { %v6096_v20 = vpop.eup %6095  ;;  %v2455_v59 = vpop.f32.mrf.mxu0  ;;  %6107 = vpow2.f32 %v2990_v46  ;;  %v4974_v14 = vadd.f32 -1.0, %v6094_v34  ;;  %v3305_v21 = vsel %vm2665_vm6, %v8107_v28, %v4975_v53  ;;  %vm2675_vm15 = vcmp.gt.f32.partialorder %v8169_v35, 0.0 }
 0x316   : > { %v8181_v23 = vadd.f32 %v2455_v59, %v7714_v26  ;;  %v4977_v55 = vadd.f32 -1.0, %v6096_v20  ;;  %6109 = vpow2.f32 %v2992_v38  ;;  %v2994_v17 = vmul.f32 1.442695, %v2803_v11  ;;  %3708 = vmatmul.mubr.bf16.gmra.mxu1 %v3404_v58 }
 0x317   : > { %v2804_v4 = vmin.f32 %v8178_v13, 0.0  ;;  %v2457_v22 = vpop.f32.mrf.mxu0  ;;  %v3306_v37 = vsel %vm2666_vm8, %v8114_v10, %v4976_v52  ;;  %v3304_v49 = vsel %vm2664_vm9, %v8104_v32, %v4974_v14  ;;  %vm2676_vm2 = vcmp.gt.f32.partialorder %v8178_v13, 0.0 }
 0x318   : > { %v2805_v44 = vmin.f32 %v8181_v23, 0.0  ;;  %v8186_v48 = vadd.f32 %v2457_v22, %v7704_v57  ;;  %v3307_v39 = vsel %vm2667_vm7, %v8121_v61, %v4977_v55  ;;  %6111 = vpow2.f32 %v2994_v17 }
 0x319   : > { %v6098_v56 = vpop.eup %6097  ;;  %v2996_v24 = vmul.f32 1.442695, %v2804_v4  ;;  %v2459_v9 = vpop.f32.mrf.mxu0  ;;  %v3407_v2 = vpack.c.bf16 %v3307_v39, %v3305_v21  ;;  %v3406_v3 = vpack.c.bf16 %v3306_v37, %v3304_v49  ;;  %vm2677_vm5 = vcmp.gt.f32.partialorder %v8181_v23, 0.0 }
 0x31a   : > { %v2998_v63 = vmul.f32 1.442695, %v2805_v44  ;;  %v2806_v6 = vmin.f32 %v8186_v48, 0.0  ;;  %v8198_v51 = vadd.f32 %v2459_v9, %v7714_v26  ;;  %v4979_v10 = vadd.f32 -1.0, %v6098_v56 }
 0x31b   : > { %v6100_v28 = vpop.eup %6099  ;;  %v2463_v61 = vpop.f32.mrf.mxu0  ;;  %3715 = vmatprep.mubr.bf16.mxu1 %v3407_v2  ;;  %6113 = vpow2.f32 %v2996_v24  ;;  %vm2678_vm3 = vcmp.gt.f32.partialorder %v8186_v48, 0.0 }
 0x31c   : > { %v6102_v25 = vpop.eup %6101  ;;  %v3000_v45 = vmul.f32 1.442695, %v2806_v6  ;;  %v2807_v15 = vmin.f32 %v8198_v51, 0.0  ;;  %v8206_v16 = vadd.f32 %v2463_v61, %v7704_v57  ;;  %v4980_v60 = vadd.f32 -1.0, %v6100_v28 }
 0x31d   : > { %v6104_v31 = vpop.eup %6103  ;;  %v2465_v30 = vpop.f32.mrf.mxu0  ;;  %6115 = vpow2.f32 %v2998_v63  ;;  %v4978_v32 = vadd.f32 -1.0, %v6102_v25  ;;  %v3309_v5 = vsel %vm2669_vm10, %v8131_v12, %v4979_v10  ;;  %vm2679_vm4 = vcmp.gt.f32.partialorder %v8198_v51, 0.0 }
 0x31e   : > { %v8209_v47 = vadd.f32 %v2465_v30, %v7714_v26  ;;  %v4981_v27 = vadd.f32 -1.0, %v6104_v31  ;;  %6117 = vpow2.f32 %v3000_v45  ;;  %v3002_v36 = vmul.f32 1.442695, %v2807_v15  ;;  %3716 = vmatmul.mubr.bf16.gmra.mxu1 %v3406_v3 }
 0x31f   : > { %v2808_v50 = vmin.f32 %v8206_v16, 0.0  ;;  %v2467_v42 = vpop.f32.mrf.mxu0  ;;  %v3310_v34 = vsel %vm2670_vm12, %v8138_v62, %v4980_v60  ;;  %v3308_v11 = vsel %vm2668_vm13, %v8128_v41, %v4978_v32  ;;  %vm2680_vm8 = vcmp.gt.f32.partialorder %v8206_v16, 0.0 }
 0x320   : > { %v2809_v40 = vmin.f32 %v8209_v47, 0.0  ;;  %v8214_v46 = vadd.f32 %v2467_v42, %v7704_v57  ;;  %v3311_v1 = vsel %vm2671_vm11, %v8145_v54, %v4981_v27  ;;  %6119 = vpow2.f32 %v3002_v36  ;;  %v6106_v18 = vpop.eup %6105 }
 0x321   : > { %v2469_v8 = vpop.f32.mrf.mxu0  ;;  %v3409_v33 = vpack.c.bf16 %v3311_v1, %v3309_v5  ;;  %v3004_v38 = vmul.f32 1.442695, %v2808_v50  ;;  %v3408_v52 = vpack.c.bf16 %v3310_v34, %v3308_v11  ;;  %v4982_v4 = vadd.f32 -1.0, %v6106_v18 }
 0x322   : > { %v2810_v19 = vmin.f32 %v8214_v46, 0.0  ;;  %v8226_v53 = vadd.f32 %v2469_v8, %v7714_v26  ;;  %v6108_v20 = vpop.eup %6107  ;;  %v3006_v58 = vmul.f32 1.442695, %v2809_v40  ;;  %vm2682_vm6 = vcmp.gt.f32.partialorder %v8214_v46, 0.0 }
 0x323   : > { %v2473_v12 = vpop.f32.mrf.mxu0  ;;  %3723 = vmatprep.mubr.bf16.mxu1 %v3409_v33  ;;  %v6110_v54 = vpop.eup %6109  ;;  %6121 = vpow2.f32 %v3004_v38  ;;  %v4983_v44 = vadd.f32 -1.0, %v6108_v20  ;;  %v3312_v3 = vsel %vm2672_vm0, %v8152_v43, %v4982_v4  ;;  %vm2681_vm9 = vcmp.gt.f32.partialorder %v8209_v47, 0.0 }
 0x324   : > { %v3008_v59 = vmul.f32 1.442695, %v2810_v19  ;;  %v2811_v55 = vmin.f32 %v8226_v53, 0.0  ;;  %v8232_v62 = vadd.f32 %v2473_v12, %v7704_v57  ;;  %v4984_v21 = vadd.f32 -1.0, %v6110_v54 }
 0x325   : > { %v2475_v14 = vpop.f32.mrf.mxu0  ;;  %v6112_v17 = vpop.eup %6111  ;;  %v3313_v60 = vsel %vm2673_vm1, %v8155_v7, %v4983_v44  ;;  %vm2683_vm7 = vcmp.gt.f32.partialorder %v8226_v53, 0.0 }
 0x326   : > { %v8235_v22 = vadd.f32 %v2475_v14, %v7714_v26  ;;  %6123 = vpow2.f32 %v3008_v59  ;;  %v3010_v39 = vmul.f32 1.442695, %v2811_v55  ;;  %v2812_v41 = vmin.f32 %v8232_v62, 0.0  ;;  %3724 = vmatmul.mubr.bf16.gmra.mxu1 %v3408_v52 }
 0x327   : > { %v2477_v56 = vpop.f32.mrf.mxu0  ;;  %6125 = vpow2.f32 %v3006_v58  ;;  %v4985_v2 = vadd.f32 -1.0, %v6112_v17  ;;  %v3314_v49 = vsel %vm2674_vm14, %v8162_v0, %v4984_v21  ;;  %vm2684_vm12 = vcmp.gt.f32.partialorder %v8232_v62, 0.0 }
 0x328   : > { %v2813_v24 = vmin.f32 %v8235_v22, 0.0  ;;  %v8240_v9 = vadd.f32 %v2477_v56, %v7704_v57  ;;  %6127 = vpow2.f32 %v3010_v39  ;;  %v3012_v37 = vmul.f32 1.442695, %v2812_v41  ;;  %v6114_v6 = vpop.eup %6113 }
 0x329   : > { %v2479_v63 = vpop.f32.mrf.mxu0  ;;  %v3315_v10 = vsel %vm2675_vm15, %v8169_v35, %v4985_v2  ;;  %v3410_v0 = vpack.c.bf16 %v3314_v49, %v3312_v3  ;;  %v4986_v40 = vadd.f32 -1.0, %v6114_v6  ;;  %vm2685_vm13 = vcmp.gt.f32.partialorder %v8235_v22, 0.0 }
 0x32a   : > { %v2814_v28 = vmin.f32 %v8240_v9, 0.0  ;;  %v8246_v61 = vadd.f32 %v2479_v63, %v7714_v26  ;;  %v6116_v25 = vpop.eup %6115  ;;  %v3014_v15 = vmul.f32 1.442695, %v2813_v24  ;;  %6129 = vpow2.f32 %v3012_v37 }
 0x32b   : > { %v2483_v45 = vpop.f32.mrf.mxu0  ;;  %v6118_v31 = vpop.eup %6117  ;;  %v3411_v36 = vpack.c.bf16 %v3315_v10, %v3313_v60  ;;  %v4987_v8 = vadd.f32 -1.0, %v6116_v25  ;;  %v3316_v14 = vsel %vm2676_vm2, %v8178_v13, %v4986_v40  ;;  %vm2686_vm10 = vcmp.gt.f32.partialorder %v8240_v9, 0.0 }
 0x32c   : > { %v3016_v30 = vmul.f32 1.442695, %v2814_v28  ;;  %v2815_v27 = vmin.f32 %v8246_v61, 0.0  ;;  %v8256_v32 = vadd.f32 %v2483_v45, %v7704_v57  ;;  %v4988_v43 = vadd.f32 -1.0, %v6118_v31 }
 0x32d   : > { %v2485_v50 = vpop.f32.mrf.mxu0  ;;  %v6120_v42 = vpop.eup %6119  ;;  %3731 = vmatprep.mubr.bf16.mxu1 %v3411_v36  ;;  %v3317_v4 = vsel %vm2677_vm5, %v8181_v23, %v4987_v8  ;;  %vm2687_vm11 = vcmp.gt.f32.partialorder %v8246_v61, 0.0 }
 0x32e   : > { %6131 = vpow2.f32 %v3016_v30  ;;  %v8259_v35 = vadd.f32 %v2485_v50, %v7714_v26  ;;  %v3018_v5 = vmul.f32 1.442695, %v2815_v27  ;;  %v2816_v1 = vmin.f32 %v8256_v32, 0.0  ;;  %3732 = vmatmul.mubr.bf16.gmra.mxu1 %v3410_v0 }
 0x32f   : > { %v2487_v7 = vpop.f32.mrf.mxu0  ;;  %6133 = vpow2.f32 %v3014_v15  ;;  %v4989_v34 = vadd.f32 -1.0, %v6120_v42  ;;  %v3318_v11 = vsel %vm2678_vm3, %v8186_v48, %v4988_v43  ;;  %vm2688_vm0 = vcmp.gt.f32.partialorder %v8256_v32, 0.0 }
 0x330   : > { %v2817_v33 = vmin.f32 %v8259_v35, 0.0  ;;  %v8264_v18 = vadd.f32 %v2487_v7, %v7704_v57  ;;  %6135 = vpow2.f32 %v3018_v5  ;;  %v3020_v38 = vmul.f32 1.442695, %v2816_v1  ;;  %v6122_v54 = vpop.eup %6121 }
 0x331   : > { %v2489_v19 = vpop.f32.mrf.mxu0  ;;  %v3319_v52 = vsel %vm2679_vm4, %v8198_v51, %v4989_v34  ;;  %v3412_v24 = vpack.c.bf16 %v3318_v11, %v3316_v14  ;;  %v4990_v2 = vadd.f32 -1.0, %v6122_v54  ;;  %vm2689_vm1 = vcmp.gt.f32.partialorder %v8259_v35, 0.0 }
 0x332   : > { %v2818_v20 = vmin.f32 %v8264_v18, 0.0  ;;  %v8271_v12 = vadd.f32 %v2489_v19, %v7714_v26  ;;  %v3022_v58 = vmul.f32 1.442695, %v2817_v33  ;;  %6137 = vpow2.f32 %v3020_v38 }
 0x333   : > { %v2493_v59 = vpop.f32.mrf.mxu0  ;;  %v6124_v55 = vpop.eup %6123  ;;  %v3413_v41 = vpack.c.bf16 %v3319_v52, %v3317_v4  ;;  %v3320_v42 = vsel %vm2680_vm8, %v8206_v16, %v4990_v2  ;;  %vm2690_vm14 = vcmp.gt.f32.partialorder %v8264_v18, 0.0 }
 0x334   : > { %v3024_v17 = vmul.f32 1.442695, %v2818_v20  ;;  %v6126_v44 = vpop.eup %6125  ;;  %v2819_v21 = vmin.f32 %v8271_v12, 0.0  ;;  %v8280_v39 = vadd.f32 %v2493_v59, %v7704_v57  ;;  %v4992_v13 = vadd.f32 -1.0, %v6124_v55 }
 0x335   : > { %v2495_v56 = vpop.f32.mrf.mxu0  ;;  %v6128_v48 = vpop.eup %6127  ;;  %3739 = vmatprep.mubr.bf16.mxu1 %v3413_v41  ;;  %v4991_v25 = vadd.f32 -1.0, %v6126_v44  ;;  %vm2691_vm15 = vcmp.gt.f32.partialorder %v8271_v12, 0.0 }
 0x336   : > { %6139 = vpow2.f32 %v3024_v17  ;;  %v8283_v51 = vadd.f32 %v2495_v56, %v7714_v26  ;;  %v3026_v37 = vmul.f32 1.442695, %v2819_v21  ;;  %v2820_v23 = vmin.f32 %v8280_v39, 0.0  ;;  %3740 = vmatmul.mubr.bf16.gmra.mxu1 %v3412_v24 }
 0x337   : > { %6141 = vpow2.f32 %v3022_v58  ;;  %v2497_v63 = vpop.f32.mrf.mxu0  ;;  %v4993_v49 = vadd.f32 -1.0, %v6128_v48  ;;  %v6130_v31 = vpop.eup %6129  ;;  %v3322_v27 = vsel %vm2682_vm6, %v8214_v46, %v4992_v13  ;;  %v3321_v40 = vsel %vm2681_vm9, %v8209_v47, %v4991_v25 }
 0x338   : > { %v2821_v6 = vmin.f32 %v8283_v51, 0.0  ;;  %v8288_v28 = vadd.f32 %v2497_v63, %v7704_v57  ;;  %6143 = vpow2.f32 %v3026_v37  ;;  %v3028_v45 = vmul.f32 1.442695, %v2820_v23 }
 0x339   : > { %v2499_v10 = vpop.f32.mrf.mxu0  ;;  %v3323_v50 = vsel %vm2683_vm7, %v8226_v53, %v4993_v49  ;;  %v3414_v34 = vpack.c.bf16 %v3322_v27, %v3320_v42  ;;  %v4994_v16 = vadd.f32 -1.0, %v6130_v31  ;;  %vm2692_vm4 = vcmp.gt.f32.partialorder %v8280_v39, 0.0 }
 0x33a   : > { %v3030_v3 = vmul.f32 1.442695, %v2821_v6  ;;  %v2822_v15 = vmin.f32 %v8288_v28, 0.0  ;;  %v8294_v30 = vadd.f32 %v2499_v10, %v7714_v26  ;;  %6145 = vpow2.f32 %v3028_v45 }
 0x33b   : > { %v6132_v60 = vpop.eup %6131  ;;  %v2503_v36 = vpop.f32.mrf.mxu0  ;;  %v3415_v7 = vpack.c.bf16 %v3323_v50, %v3321_v40  ;;  %v3324_v48 = vsel %vm2684_vm12, %v8232_v62, %v4994_v16  ;;  %vm2694_vm2 = vcmp.gt.f32.partialorder %v8288_v28, 0.0  ;;  %vm2693_vm5 = vcmp.gt.f32.partialorder %v8283_v51, 0.0 }
 0x33c   : > { %v3032_v0 = vmul.f32 1.442695, %v2822_v15  ;;  %v6134_v43 = vpop.eup %6133  ;;  %v2823_v5 = vmin.f32 %v8294_v30, 0.0  ;;  %v8304_v1 = vadd.f32 %v2503_v36, %v7704_v57  ;;  %v4996_v46 = vadd.f32 -1.0, %v6132_v60 }
 0x33d   : > { %v2505_v8 = vpop.f32.mrf.mxu0  ;;  %v6136_v33 = vpop.eup %6135  ;;  %6147 = vpow2.f32 %v3030_v3  ;;  %3747 = vmatprep.mubr.bf16.mxu1 %v3415_v7  ;;  %v4995_v11 = vadd.f32 -1.0, %v6134_v43  ;;  %vm2695_vm3 = vcmp.gt.f32.partialorder %v8294_v30, 0.0 }
 0x33e   : > { %v8307_v53 = vadd.f32 %v2505_v8, %v7714_v26  ;;  %6149 = vpow2.f32 %v3032_v0  ;;  %v3034_v38 = vmul.f32 1.442695, %v2823_v5  ;;  %v2824_v47 = vmin.f32 %v8304_v1, 0.0  ;;  %3748 = vmatmul.mubr.bf16.gmra.mxu1 %v3414_v34 }
 0x33f   : > { %v2507_v19 = vpop.f32.mrf.mxu0  ;;  %v4997_v58 = vadd.f32 -1.0, %v6136_v33  ;;  %v6138_v52 = vpop.eup %6137  ;;  %v3326_v55 = vsel %vm2686_vm10, %v8240_v9, %v4996_v46  ;;  %v3325_v9 = vsel %vm2685_vm13, %v8235_v22, %v4995_v11  ;;  %vm2696_vm8 = vcmp.gt.f32.partialorder %v8304_v1, 0.0 }
 0x340   : > { %v2825_v20 = vmin.f32 %v8307_v53, 0.0  ;;  %v8312_v54 = vadd.f32 %v2507_v19, %v7704_v57  ;;  %6151 = vpow2.f32 %v3034_v38  ;;  %v3036_v14 = vmul.f32 1.442695, %v2824_v47 }
 0x341   : > { %v2509_v59 = vpop.f32.mrf.mxu0  ;;  %v3327_v41 = vsel %vm2687_vm11, %v8246_v61, %v4997_v58  ;;  %v3416_v13 = vpack.c.bf16 %v3326_v55, %v3324_v48  ;;  %v4998_v49 = vadd.f32 -1.0, %v6138_v52  ;;  %vm2697_vm9 = vcmp.gt.f32.partialorder %v8307_v53, 0.0 }
 0x342   : > { %v2826_v17 = vmin.f32 %v8312_v54, 0.0  ;;  %v8319_v4 = vadd.f32 %v2509_v59, %v7714_v26  ;;  %v3038_v24 = vmul.f32 1.442695, %v2825_v20  ;;  %v3417_v63 = vpack.c.bf16 %v3327_v41, %v3325_v9 }
 0x343   : > { %v6140_v44 = vpop.eup %6139  ;;  %v2513_v21 = vpop.f32.mrf.mxu0  ;;  %6153 = vpow2.f32 %v3036_v14  ;;  %v3328_v33 = vsel %vm2688_vm0, %v8256_v32, %v4998_v49  ;;  %vm2698_vm6 = vcmp.gt.f32.partialorder %v8312_v54, 0.0 }
 0x344   : > { %v6142_v56 = vpop.eup %6141  ;;  %v3040_v2 = vmul.f32 1.442695, %v2826_v17  ;;  %v2827_v37 = vmin.f32 %v8319_v4, 0.0  ;;  %v8328_v23 = vadd.f32 %v2513_v21, %v7704_v57  ;;  %v5000_v45 = vadd.f32 -1.0, %v6140_v44  ;;  %3755 = vmatprep.mubr.bf16.mxu1 %v3417_v63 }
 0x345   : > { %v2515_v6 = vpop.f32.mrf.mxu0  ;;  %v6144_v25 = vpop.eup %6143  ;;  %v4999_v31 = vadd.f32 -1.0, %v6142_v56  ;;  %vm2699_vm7 = vcmp.gt.f32.partialorder %v8319_v4, 0.0 }
 0x346   : > { %v8331_v61 = vadd.f32 %v2515_v6, %v7714_v26  ;;  %6155 = vpow2.f32 %v3040_v2  ;;  %v3042_v62 = vmul.f32 1.442695, %v2827_v37  ;;  %v2828_v10 = vmin.f32 %v8328_v23, 0.0  ;;  %3756 = vmatmul.mubr.bf16.gmra.mxu1 %v3416_v13 }
 0x347   : > { %v2517_v22 = vpop.f32.mrf.mxu0  ;;  %6157 = vpow2.f32 %v3038_v24  ;;  %v5001_v60 = vadd.f32 -1.0, %v6144_v25  ;;  %v6146_v36 = vpop.eup %6145  ;;  %v3330_v50 = vsel %vm2690_vm14, %v8264_v18, %v5000_v45  ;;  %v3329_v18 = vsel %vm2689_vm1, %v8259_v35, %v4999_v31 }
 0x348   : > { %v2829_v3 = vmin.f32 %v8331_v61, 0.0  ;;  %v8336_v15 = vadd.f32 %v2517_v22, %v7704_v57  ;;  %6159 = vpow2.f32 %v3042_v62  ;;  %v3044_v42 = vmul.f32 1.442695, %v2828_v10 }
 0x349   : > { %v2519_v27 = vpop.f32.mrf.mxu0  ;;  %v3331_v7 = vsel %vm2691_vm15, %v8271_v12, %v5001_v60  ;;  %v3418_v16 = vpack.c.bf16 %v3330_v50, %v3328_v33  ;;  %v5002_v58 = vadd.f32 -1.0, %v6146_v36  ;;  %vm2701_vm12 = vcmp.gt.f32.partialorder %v8331_v61, 0.0 }
 0x34a   : > { %v2830_v0 = vmin.f32 %v8336_v15, 0.0  ;;  %v8343_v40 = vadd.f32 %v2519_v27, %v7714_v26  ;;  %v6148_v43 = vpop.eup %6147  ;;  %v3046_v34 = vmul.f32 1.442695, %v2829_v3  ;;  %v3419_v19 = vpack.c.bf16 %v3331_v7, %v3329_v18 }
 0x34b   : > { %v2523_v5 = vpop.f32.mrf.mxu0  ;;  %v6150_v8 = vpop.eup %6149  ;;  %6161 = vpow2.f32 %v3044_v42  ;;  %v5003_v59 = vadd.f32 -1.0, %v6148_v43  ;;  %v3332_v6 = vsel %vm2692_vm4, %v8280_v39, %v5002_v58  ;;  %vm2702_vm10 = vcmp.gt.f32.partialorder %v8336_v15, 0.0 }
 0x34c   : > { %v3048_v46 = vmul.f32 1.442695, %v2830_v0  ;;  %v2831_v38 = vmin.f32 %v8343_v40, 0.0  ;;  %v8352_v47 = vadd.f32 %v2523_v5, %v7704_v57  ;;  %v5004_v32 = vadd.f32 -1.0, %v6150_v8  ;;  %3763 = vmatprep.mubr.bf16.mxu1 %v3419_v19 }
 0x34d   : > { %v2525_v20 = vpop.f32.mrf.mxu0  ;;  %v6152_v11 = vpop.eup %6151  ;;  %v3333_v49 = vsel %vm2693_vm5, %v8283_v51, %v5003_v59  ;;  %vm2703_vm11 = vcmp.gt.f32.partialorder %v8343_v40, 0.0  ;;  %vm2700_vm13 = vcmp.gt.f32.partialorder %v8328_v23, 0.0 }
 0x34e   : > { %v8355_v12 = vadd.f32 %v2525_v20, %v7714_v26  ;;  %6163 = vpow2.f32 %v3048_v46  ;;  %v3050_v52 = vmul.f32 1.442695, %v2831_v38  ;;  %v2832_v35 = vmin.f32 %v8352_v47, 0.0  ;;  %3764 = vmatmul.mubr.bf16.gmra.mxu1 %v3418_v16 }
 0x34f   : > { %v2527_v55 = vpop.f32.mrf.mxu0  ;;  %6165 = vpow2.f32 %v3046_v34  ;;  %v5005_v44 = vadd.f32 -1.0, %v6152_v11  ;;  %v3334_v9 = vsel %vm2694_vm2, %v8288_v28, %v5004_v32  ;;  %vm2704_vm1 = vcmp.gt.f32.partialorder %v8352_v47, 0.0 }
 0x350   : > { %v2833_v14 = vmin.f32 %v8355_v12, 0.0  ;;  %v8360_v17 = vadd.f32 %v2527_v55, %v7704_v57  ;;  %6167 = vpow2.f32 %v3050_v52  ;;  %v3052_v21 = vmul.f32 1.442695, %v2832_v35  ;;  %v6154_v2 = vpop.eup %6153 }
 0x351   : > { %v2529_v41 = vpop.f32.mrf.mxu0  ;;  %v3335_v37 = vsel %vm2695_vm3, %v8294_v30, %v5005_v44  ;;  %v3420_v28 = vpack.c.bf16 %v3334_v9, %v3332_v6  ;;  %v5006_v60 = vadd.f32 -1.0, %v6154_v2  ;;  %vm2705_vm0 = vcmp.gt.f32.partialorder %v8355_v12, 0.0 }
 0x352   : > { %v3054_v56 = vmul.f32 1.442695, %v2833_v14  ;;  %v2834_v48 = vmin.f32 %v8360_v17, 0.0  ;;  %v8366_v24 = vadd.f32 %v2529_v41, %v7714_v26  ;;  %6169 = vpow2.f32 %v3052_v21 }
 0x353   : > { %v2533_v13 = vpop.f32.mrf.mxu0  ;;  %v6156_v63 = vpop.eup %6155  ;;  %v3421_v22 = vpack.c.bf16 %v3335_v37, %v3333_v49  ;;  %v3336_v20 = vsel %vm2696_vm8, %v8304_v1, %v5006_v60  ;;  %vm2706_vm14 = vcmp.gt.f32.partialorder %v8360_v17, 0.0 }
 0x354   : > { %v3056_v25 = vmul.f32 1.442695, %v2834_v48  ;;  %v6158_v45 = vpop.eup %6157  ;;  %v2835_v62 = vmin.f32 %v8366_v24, 0.0  ;;  %v8376_v10 = vadd.f32 %v2533_v13, %v7704_v57  ;;  %6171 = vpow2.f32 %v3054_v56 }
 0x355   : > { %v2535_v31 = vpop.f32.mrf.mxu0  ;;  %v6160_v3 = vpop.eup %6159  ;;  %v5008_v39 = vadd.f32 -1.0, %v6156_v63  ;;  %3771 = vmatprep.mubr.bf16.mxu1 %v3421_v22  ;;  %v5007_v0 = vadd.f32 -1.0, %v6158_v45  ;;  %vm2707_vm15 = vcmp.gt.f32.partialorder %v8366_v24, 0.0 }
 0x356   : > { %v8379_v30 = vadd.f32 %v2535_v31, %v7714_v26  ;;  %6173 = vpow2.f32 %v3056_v25  ;;  %v3058_v27 = vmul.f32 1.442695, %v2835_v62  ;;  %v2836_v51 = vmin.f32 %v8376_v10, 0.0  ;;  %3772 = vmatmul.mubr.bf16.gmra.mxu1 %v3420_v28 }
 0x357   : > { %v2537_v36 = vpop.f32.mrf.mxu0  ;;  %v5009_v43 = vadd.f32 -1.0, %v6160_v3  ;;  %v3338_v18 = vsel %vm2698_vm6, %v8312_v54, %v5008_v39  ;;  %v3337_v58 = vsel %vm2697_vm9, %v8307_v53, %v5007_v0  ;;  %vm2708_vm5 = vcmp.gt.f32.partialorder %v8376_v10, 0.0 }
 0x358   : > { %v2837_v50 = vmin.f32 %v8379_v30, 0.0  ;;  %v8384_v42 = vadd.f32 %v2537_v36, %v7704_v57  ;;  %6175 = vpow2.f32 %v3058_v27  ;;  %v3060_v5 = vmul.f32 1.442695, %v2836_v51  ;;  %v6162_v46 = vpop.eup %6161 }
 0x359   : > { %v2539_v7 = vpop.f32.mrf.mxu0  ;;  %v3339_v38 = vsel %vm2699_vm7, %v8319_v4, %v5009_v43  ;;  %v3422_v54 = vpack.c.bf16 %v3338_v18, %v3336_v20  ;;  %v5010_v9 = vadd.f32 -1.0, %v6162_v46  ;;  %vm2709_vm4 = vcmp.gt.f32.partialorder %v8379_v30, 0.0 }
 0x35a   : > { %v3062_v8 = vmul.f32 1.442695, %v2837_v50  ;;  %v2838_v33 = vmin.f32 %v8384_v42, 0.0  ;;  %v8390_v34 = vadd.f32 %v2539_v7, %v7714_v26  ;;  %6177 = vpow2.f32 %v3060_v5 }
 0x35b   : > { %v2543_v16 = vpop.f32.mrf.mxu0  ;;  %v6164_v19 = vpop.eup %6163  ;;  %v3423_v35 = vpack.c.bf16 %v3339_v38, %v3337_v58  ;;  %v3340_v39 = vsel %vm2700_vm13, %v8328_v23, %v5010_v9  ;;  %vm2710_vm2 = vcmp.gt.f32.partialorder %v8384_v42, 0.0 }
 0x35c   : > { %v3064_v11 = vmul.f32 1.442695, %v2838_v33  ;;  %v6166_v59 = vpop.eup %6165  ;;  %v2839_v32 = vmin.f32 %v8390_v34, 0.0  ;;  %v8400_v52 = vadd.f32 %v2543_v16, %v7704_v57  ;;  %6179 = vpow2.f32 %v3062_v8 }
 0x35d   : > { %v2545_v55 = vpop.f32.mrf.mxu0  ;;  %v6168_v14 = vpop.eup %6167  ;;  %v5012_v44 = vadd.f32 -1.0, %v6164_v19  ;;  %3779 = vmatprep.mubr.bf16.mxu1 %v3423_v35  ;;  %v5011_v48 = vadd.f32 -1.0, %v6166_v59  ;;  %vm2711_vm3 = vcmp.gt.f32.partialorder %v8390_v34, 0.0 }
 0x35e   : > { %v8403_v4 = vadd.f32 %v2545_v55, %v7714_v26  ;;  %6181 = vpow2.f32 %v3064_v11  ;;  %v3066_v1 = vmul.f32 1.442695, %v2839_v32  ;;  %v2840_v53 = vmin.f32 %v8400_v52, 0.0  ;;  %3780 = vmatmul.mubr.bf16.gmra.mxu1 %v3422_v54 }
 0x35f   : > { %v2547_v21 = vpop.f32.mrf.mxu0  ;;  %v5013_v2 = vadd.f32 -1.0, %v6168_v14  ;;  %v6170_v37 = vpop.eup %6169  ;;  %v3342_v45 = vsel %vm2702_vm10, %v8336_v15, %v5012_v44  ;;  %v3341_v60 = vsel %vm2701_vm12, %v8331_v61, %v5011_v48  ;;  %vm2712_vm9 = vcmp.gt.f32.partialorder %v8400_v52, 0.0 }
 0x360   : > { %v2841_v41 = vmin.f32 %v8403_v4, 0.0  ;;  %v8408_v56 = vadd.f32 %v2547_v21, %v7704_v57  ;;  %6183 = vpow2.f32 %v3066_v1  ;;  %v3068_v63 = vmul.f32 1.442695, %v2840_v53 }
 0x361   : > { %v2549_v13 = vpop.f32.mrf.mxu0  ;;  %v6172_v49 = vpop.eup %6171  ;;  %v3343_v22 = vsel %vm2703_vm11, %v8343_v40, %v5013_v2  ;;  %v3424_v0 = vpack.c.bf16 %v3342_v45, %v3340_v39  ;;  %v5014_v18 = vadd.f32 -1.0, %v6170_v37  ;;  %vm2713_vm8 = vcmp.gt.f32.partialorder %v8403_v4, 0.0 }
 0x362   : > { %v2842_v6 = vmin.f32 %v8408_v56, 0.0  ;;  %v8414_v25 = vadd.f32 %v2549_v13, %v7714_v26  ;;  %v3070_v3 = vmul.f32 1.442695, %v2841_v41  ;;  %v3425_v36 = vpack.c.bf16 %v3343_v22, %v3341_v60 }
 0x363   : > { %v2553_v62 = vpop.f32.mrf.mxu0  ;;  %v6174_v31 = vpop.eup %6173  ;;  %6185 = vpow2.f32 %v3068_v63  ;;  %v5015_v43 = vadd.f32 -1.0, %v6172_v49  ;;  %v3344_v1 = vsel %vm2704_vm1, %v8352_v47, %v5014_v18  ;;  %vm2714_vm6 = vcmp.gt.f32.partialorder %v8408_v56, 0.0 }
 0x364   : > { %v3072_v28 = vmul.f32 1.442695, %v2842_v6  ;;  %v2843_v27 = vmin.f32 %v8414_v25, 0.0  ;;  %v8424_v51 = vadd.f32 %v2553_v62, %v7704_v57  ;;  %v5016_v5 = vadd.f32 -1.0, %v6174_v31  ;;  %3787 = vmatprep.mubr.bf16.mxu1 %v3425_v36 }
 0x365   : > { %v2555_v50 = vpop.f32.mrf.mxu0  ;;  %v6176_v15 = vpop.eup %6175  ;;  %v3345_v44 = vsel %vm2705_vm0, %v8355_v12, %v5015_v43  ;;  %vm2715_vm7 = vcmp.gt.f32.partialorder %v8414_v25, 0.0 }
 0x366   : > { %v8427_v40 = vadd.f32 %v2555_v50, %v7714_v26  ;;  %6187 = vpow2.f32 %v3072_v28  ;;  %v3074_v7 = vmul.f32 1.442695, %v2843_v27  ;;  %v2844_v61 = vmin.f32 %v8424_v51, 0.0  ;;  %3788 = vmatmul.mubr.bf16.gmra.mxu1 %v3424_v0 }
 0x367   : > { %v2557_v23 = vpop.f32.mrf.mxu0  ;;  %6189 = vpow2.f32 %v3070_v3  ;;  %v5017_v46 = vadd.f32 -1.0, %v6176_v15  ;;  %v6178_v38 = vpop.eup %6177  ;;  %v3346_v59 = vsel %vm2706_vm14, %v8360_v17, %v5016_v5  ;;  %vm2716_vm10 = vcmp.gt.f32.partialorder %v8424_v51, 0.0 }
 0x368   : > { %v2845_v8 = vmin.f32 %v8427_v40, 0.0  ;;  %v8432_v33 = vadd.f32 %v2557_v23, %v7704_v57  ;;  %6191 = vpow2.f32 %v3074_v7  ;;  %v3076_v19 = vmul.f32 1.442695, %v2844_v61 }
 0x369   : > { %v2559_v16 = vpop.f32.mrf.mxu0  ;;  %v6180_v58 = vpop.eup %6179  ;;  %v3347_v35 = vsel %vm2707_vm15, %v8366_v24, %v5017_v46  ;;  %v3426_v2 = vpack.c.bf16 %v3346_v59, %v3344_v1  ;;  %v5018_v6 = vadd.f32 -1.0, %v6178_v38  ;;  %vm2717_vm11 = vcmp.gt.f32.partialorder %v8427_v40, 0.0 }
 0x36a   : > { %v2846_v20 = vmin.f32 %v8432_v33, 0.0  ;;  %v8438_v11 = vadd.f32 %v2559_v16, %v7714_v26  ;;  %v3078_v14 = vmul.f32 1.442695, %v2845_v8  ;;  %v3427_v41 = vpack.c.bf16 %v3347_v35, %v3345_v44 }
 0x36b   : > { %v2563_v32 = vpop.f32.mrf.mxu0  ;;  %v6182_v55 = vpop.eup %6181  ;;  %6193 = vpow2.f32 %v3076_v19  ;;  %v5019_v37 = vadd.f32 -1.0, %v6180_v58  ;;  %v3348_v0 = vsel %vm2708_vm5, %v8376_v10, %v5018_v6  ;;  %v8482_v58 = vand.u32 127, %v2169_v29 }
 0x36c   : > { %v3080_v54 = vmul.f32 1.442695, %v2846_v20  ;;  %v2847_v53 = vmin.f32 %v8438_v11, 0.0  ;;  %v8448_v21 = vadd.f32 %v2563_v32, %v7704_v57  ;;  %v5020_v24 = vadd.f32 -1.0, %v6182_v55  ;;  %3795 = vmatprep.mubr.bf16.mxu1 %v3427_v41 }
 0x36d   : > { %v2565_v48 = vpop.f32.mrf.mxu0  ;;  %v6184_v17 = vpop.eup %6183  ;;  %v3349_v50 = vsel %vm2709_vm4, %v8379_v30, %v5019_v37  ;;  %v8502_v37 = vld [vmem:[%s9154_s8] ss:$0 sm:$0xff]  ;;  %vm2718_vm12 = vcmp.gt.f32.partialorder %v8432_v33, 0.0  ;;  %vm2719_vm13 = vcmp.gt.f32.partialorder %v8438_v11, 0.0 }
 0x36e   : > { %6195 = vpow2.f32 %v3080_v54  ;;  %v3082_v9 = vmul.f32 1.442695, %v2847_v53  ;;  %v2848_v12 = vmin.f32 %v8448_v21, 0.0  ;;  %3796 = vmatmul.mubr.bf16.gmra.mxu1 %v3426_v2  ;;  %v5021_v63 = vadd.f32 -1.0, %v6184_v17 }
 0x36f   : > { %v2567_v13 = vpop.f32.mrf.mxu0  ;;  %6197 = vpow2.f32 %v3078_v14  ;;  %v8457_v45 = vadd.f32 %v2565_v48, %v7714_v26  ;;  %v3350_v31 = vsel %vm2710_vm2, %v8384_v42, %v5020_v24  ;;  %vm2720_vm14 = vcmp.gt.f32.partialorder %v8448_v21, 0.0 }
 0x370   : > { %v8452_v47 = vadd.f32 %v2567_v13, %v7704_v57  ;;  %6199 = vpow2.f32 %v3082_v9  ;;  %v6186_v22 = vpop.eup %6185  ;;  %v3351_v60 = vsel %vm2711_vm3, %v8390_v34, %v5021_v63  ;;  %v3084_v27 = vmul.f32 1.442695, %v2848_v12 }
 0x371   : > { %v2569_v49 = vpop.f32.mrf.mxu0  ;;  %v3429_v42 = vpack.c.bf16 %v3351_v60, %v3349_v50  ;;  %v3428_v61 = vpack.c.bf16 %v3350_v31, %v3348_v0  ;;  %v2849_v23 = vmin.f32 %v8457_v45, 0.0  ;;  %v5022_v16 = vadd.f32 -1.0, %v6186_v22 }
 0x372   : > { %v2850_v62 = vmin.f32 %v8452_v47, 0.0  ;;  %v8463_v3 = vadd.f32 %v2569_v49, %v7714_v26  ;;  %vm2722_vm15 = vcmp.gt.f32.partialorder %v8452_v47, 0.0  ;;  %vm2721_vm0 = vcmp.gt.f32.partialorder %v8457_v45, 0.0 }
 0x373   : > { %v2573_v28 = vpop.f32.mrf.mxu0  ;;  %v6188_v39 = vpop.eup %6187  ;;  %3803 = vmatprep.mubr.bf16.mxu1 %v3429_v42  ;;  %v3086_v59 = vmul.f32 1.442695, %v2849_v23  ;;  %v3352_v48 = vsel %vm2712_vm9, %v8400_v52, %v5022_v16 }
 0x374   : > { %v3088_v36 = vmul.f32 1.442695, %v2850_v62  ;;  %v6190_v15 = vpop.eup %6189  ;;  %v8470_v43 = vadd.f32 %v2573_v28, %v7704_v57  ;;  %v5024_v34 = vadd.f32 -1.0, %v6188_v39  ;;  %v2851_v8 = vmin.f32 %v8463_v3, 0.0 }
 0x375   : > { %v2575_v5 = vpop.f32.mrf.mxu0  ;;  %v6192_v7 = vpop.eup %6191  ;;  %v5023_v10 = vadd.f32 -1.0, %v6190_v15  ;;  %vm2723_vm1 = vcmp.gt.f32.partialorder %v8463_v3, 0.0 }
 0x376   : > { %6201 = vpow2.f32 %v3088_v36  ;;  %3804 = vmatmul.mubr.bf16.gmra.mxu1 %v3428_v61  ;;  %v5025_v18 = vadd.f32 -1.0, %v6192_v7  ;;  %v2852_v38 = vmin.f32 %v8470_v43, 0.0  ;;  %v8479_v19 = vadd.f32 %v2575_v5, %v7714_v26 }
 0x377   : > { %v2577_v46 = vpop.f32.mrf.mxu0  ;;  %6203 = vpow2.f32 %v3084_v27  ;;  %v3354_v55 = vsel %vm2714_vm6, %v8408_v56, %v5024_v34  ;;  %v3090_v14 = vmul.f32 1.442695, %v2851_v8  ;;  %v3353_v53 = vsel %vm2713_vm8, %v8403_v4, %v5023_v10 }
 0x378   : > { %v8475_v30 = vadd.f32 %v2577_v46, %v7704_v57  ;;  %v6194_v35 = vpop.eup %6193  ;;  %v3355_v44 = vsel %vm2715_vm7, %v8414_v25, %v5025_v18  ;;  %v3092_v17 = vmul.f32 1.442695, %v2852_v38  ;;  %v2853_v56 = vmin.f32 %v8479_v19, 0.0 }
 0x379   : > { %v2579_v20 = vpop.f32.mrf.mxu0  ;;  %v3431_v2 = vpack.c.bf16 %v3355_v44, %v3353_v53  ;;  %v3430_v25 = vpack.c.bf16 %v3354_v55, %v3352_v48  ;;  %6205 = vpow2.f32 %v3086_v59  ;;  %v5026_v4 = vadd.f32 -1.0, %v6194_v35 }
 0x37a   : > { %v2854_v32 = vmin.f32 %v8475_v30, 0.0  ;;  %v8493_v29 = vadd.f32 %v2579_v20, %v7714_v26  ;;  %6207 = vpow2.f32 %v3090_v14  ;;  %v3094_v31 = vmul.f32 1.442695, %v2853_v56 }
 0x37b   : > { %v2583_v54 = vpop.f32.mrf.mxu0  ;;  %v6196_v1 = vpop.eup %6195  ;;  %3811 = vmatprep.mubr.bf16.mxu1 %v3431_v2  ;;  %6209 = vpow2.f32 %v3092_v17  ;;  %v3356_v61 = vsel %vm2716_vm10, %v8424_v51, %v5026_v4  ;;  %vm2724_vm2 = vcmp.gt.f32.partialorder %v8470_v43, 0.0  ;;  %vm2726_vm3 = vcmp.gt.f32.partialorder %v8475_v30, 0.0 }
 0x37c   : > { %v6198_v41 = vpop.eup %6197  ;;  %v3096_v13 = vmul.f32 1.442695, %v2854_v32  ;;  %v5028_v52 = vadd.f32 -1.0, %v6196_v1  ;;  %v2855_v63 = vmin.f32 %v8493_v29, 0.0  ;;  %v8507_v6 = vadd.f32 %v2583_v54, %v7704_v57 }
 0x37d   : > { %v2585_v24 = vpop.f32.mrf.mxu0  ;;  %v6200_v9 = vpop.eup %6199  ;;  %v5027_v39 = vadd.f32 -1.0, %v6198_v41  ;;  %vm2725_vm4 = vcmp.gt.f32.partialorder %v8479_v19, 0.0  ;;  %vm2727_vm5 = vcmp.gt.f32.partialorder %v8493_v29, 0.0  ;;  %vm4254_vm10 = vcmp.eq.s32.totalorder %v8482_v58, 0 }
 0x37e   : > { %v3621_v49 = vpop.f32.mrf.mxu1  ;;  %3812 = vmatmul.mubr.bf16.gmra.mxu1 %v3430_v25  ;;  %v5029_v22 = vadd.f32 -1.0, %v6200_v9  ;;  %6211 = vpow2.f32 %v3096_v13  ;;  %v8517_v27 = vadd.f32 %v2585_v24, %v7714_v26  ;;  %v3358_v23 = vsel %vm2718_vm12, %v8432_v33, %v5028_v52 }
 0x37f   : > { %v2587_v12 = vpop.f32.mrf.mxu0  ;;  %v8513_v28 = vadd.f32 %v8502_v37, %v3621_v49  ;;  %v3098_v34 = vmul.f32 1.442695, %v2855_v63  ;;  %v2856_v8 = vmin.f32 %v8507_v6, 0.0  ;;  %6213 = vpow2.f32 %v3094_v31 }
 0x380   : > { %v8510_v62 = vadd.f32 %v2587_v12, %v7704_v57  ;;  %v3623_v36 = vpop.f32.mrf.mxu1  ;;  %v3359_v7 = vsel %vm2719_vm13, %v8438_v11, %v5029_v22  ;;  %v3357_v11 = vsel %vm2717_vm11, %v8427_v40, %v5027_v39  ;;  %v2857_v20 = vmin.f32 %v8517_v27, 0.0 }
 0x381   : > { %v2589_v60 = vpop.f32.mrf.mxu0  ;;  %v3870_v0 = vmax.f32 %v8513_v28, -30.0  ;;  %v3433_v32 = vpack.c.bf16 %v3359_v7, %v3357_v11  ;;  %v3432_v35 = vpack.c.bf16 %v3358_v23, %v3356_v61  ;;  %6215 = vpow2.f32 %v3098_v34 }
 0x382   : > { %v2858_v50 = vmin.f32 %v8510_v62, 0.0  ;;  %v8524_v42 = vadd.f32 %v2589_v60, %v7714_v26  ;;  %v3624_v46 = vpop.f32.mrf.mxu1  ;;  %v3100_v53 = vmul.f32 1.442695, %v2856_v8  ;;  %v3102_v9 = vmul.f32 1.442695, %v2857_v20 }
 0x383   : > { %v6202_v15 = vpop.eup %6201  ;;  %v2593_v5 = vpop.f32.mrf.mxu0  ;;  %v3934_v18 = vsub.f32 0.0, %v3870_v0  ;;  %v8535_v16 = vadd.f32 %v8502_v37, %v3624_v46  ;;  %3819 = vmatprep.mubr.bf16.mxu1 %v3433_v32  ;;  %vm2730_vm6 = vcmp.gt.f32.partialorder %v8510_v62, 0.0  ;;  %vm2729_vm7 = vcmp.gt.f32.partialorder %v8517_v27, 0.0 }
 0x384   : > { %v6204_v10 = vpop.eup %6203  ;;  %v5032_v51 = vadd.f32 -1.0, %v6202_v15  ;;  %v3104_v59 = vmul.f32 1.442695, %v2858_v50  ;;  %v3626_v33 = vpop.f32.mrf.mxu1  ;;  %v2859_v54 = vmin.f32 %v8524_v42, 0.0  ;;  %v8544_v41 = vadd.f32 %v2593_v5, %v7704_v57 }
 0x385   : > { %v2595_v38 = vpop.f32.mrf.mxu0  ;;  %v4000_v55 = vmul.f32 1.442695, %v3934_v18  ;;  %v3871_v14 = vmax.f32 %v8535_v16, -30.0  ;;  %v5030_v1 = vadd.f32 -1.0, %v6204_v10  ;;  %vm2731_vm8 = vcmp.gt.f32.partialorder %v8524_v42, 0.0 }
 0x386   : > { %v3629_v40 = vpop.f32.mrf.mxu1  ;;  %3820 = vmatmul.mubr.bf16.gmra.mxu1 %v3432_v35  ;;  %v8551_v56 = vadd.f32 %v2595_v38, %v7714_v26  ;;  %v8556_v24 = vsel %vm2722_vm15, %v8452_v47, %v5032_v51  ;;  %v6206_v13 = vpop.eup %6205  ;;  %v3106_v52 = vmul.f32 1.442695, %v2859_v54  ;;  %v2860_v31 = vmin.f32 %v8544_v41, 0.0 }
 0x387   : > { %v2597_v44 = vpop.f32.mrf.mxu0  ;;  %6217 = vpow2.f32 %v4000_v55  ;;  %v3935_v48 = vsub.f32 0.0, %v3871_v14  ;;  %v8548_v17 = vadd.f32 %v8502_v37, %v3629_v40  ;;  %v6208_v22 = vpop.eup %6207  ;;  %v3360_v47 = vsel %vm2720_vm14, %v8448_v21, %v5030_v1 }
 0x388   : > { %6219 = vpow2.f32 %v3104_v59  ;;  %v3631_v25 = vpop.f32.mrf.mxu1  ;;  %v8561_v63 = vadd.f32 %v2597_v44, %v7704_v57  ;;  %v2861_v50 = vmin.f32 %v8551_v56, 0.0  ;;  %v6210_v5 = vpop.eup %6209  ;;  %v3434_v7 = vpack.c.bf16 %v8556_v24, %v3360_v47 }
 0x389   : > { %v2599_v2 = vpop.f32.mrf.mxu0  ;;  %v4002_v4 = vmul.f32 1.442695, %v3935_v48  ;;  %v3872_v12 = vmax.f32 %v8548_v17, -30.0  ;;  %6221 = vpow2.f32 %v3100_v53  ;;  %v3108_v10 = vmul.f32 1.442695, %v2860_v31 }
 0x38a   : > { %v3632_v60 = vpop.f32.mrf.mxu1  ;;  %v8568_v39 = vadd.f32 %v2599_v2, %v7714_v26  ;;  %v2862_v34 = vmin.f32 %v8561_v63, 0.0  ;;  %v5031_v11 = vadd.f32 -1.0, %v6206_v13  ;;  %v5033_v38 = vadd.f32 -1.0, %v6208_v22 }
 0x38b   : > { %v2603_v49 = vpop.f32.mrf.mxu0  ;;  %6223 = vpow2.f32 %v4002_v4  ;;  %v3936_v36 = vsub.f32 0.0, %v3872_v12  ;;  %v8572_v15 = vadd.f32 %v8502_v37, %v3632_v60  ;;  %v6212_v61 = vpop.eup %6211  ;;  %v5034_v20 = vadd.f32 -1.0, %v6210_v5 }
 0x38c   : > { %6225 = vpow2.f32 %v3102_v9  ;;  %v3634_v21 = vpop.f32.mrf.mxu1  ;;  %v2863_v18 = vmin.f32 %v8568_v39, 0.0  ;;  %v3110_v59 = vmul.f32 1.442695, %v2861_v50  ;;  %v8580_v35 = vpop.eup %6213  ;;  %v5036_v55 = vadd.f32 -1.0, %v6212_v61 }
 0x38d   : > { %v2605_v0 = vpop.f32.mrf.mxu0  ;;  %6227 = vpow2.f32 %v3106_v52  ;;  %v4004_v23 = vmul.f32 1.442695, %v3936_v36  ;;  %v3873_v8 = vmax.f32 %v8572_v15, -30.0  ;;  %v8583_v14 = vadd.f32 %v2603_v49, %v7704_v57 }
 0x38e   : > { %v3637_v51 = vpop.f32.mrf.mxu1  ;;  %v3361_v54 = vsel %vm2721_vm0, %v8457_v45, %v5031_v11  ;;  %v3363_v44 = vsel %vm2723_vm1, %v8463_v3, %v5033_v38  ;;  %v3112_v53 = vmul.f32 1.442695, %v2862_v34  ;;  %v3114_v9 = vmul.f32 1.442695, %v2863_v18  ;;  %v6216_v4 = vpop.eup %6215 }
 0x38f   : > { %v2607_v46 = vpop.f32.mrf.mxu0  ;;  %6229 = vpow2.f32 %v4004_v23  ;;  %v3937_v33 = vsub.f32 0.0, %v3873_v8  ;;  %v3435_v48 = vpack.c.bf16 %v3363_v44, %v3361_v54  ;;  %v8592_v2 = vadd.f32 %v8502_v37, %v3637_v51 }
 0x390   : > { %v3639_v1 = vpop.f32.mrf.mxu1  ;;  %6231 = vpow2.f32 %v3108_v10  ;;  %v8595_v25 = vadd.f32 %v2605_v0, %v7714_v26  ;;  %v8598_v13 = vadd.f32 %v2607_v46, %v7704_v57  ;;  %v8611_v57 = vsel %vm2726_vm3, %v8475_v30, %v5036_v55 }
 0x391   : > { %v2609_v32 = vpop.f32.mrf.mxu0  ;;  %v4006_v40 = vmul.f32 1.442695, %v3937_v33  ;;  %3827 = vmatprep.mubr.bf16.mxu1 %v3435_v48  ;;  %v3874_v3 = vmax.f32 %v8592_v2, -30.0  ;;  %v2864_v47 = vmin.f32 %v8583_v14, 0.0  ;;  %vm2728_vm9 = vcmp.gt.f32.partialorder %v8507_v6, 0.0 }
 0x392   : > { %v3640_v45 = vpop.f32.mrf.mxu1  ;;  %v8606_v12 = vadd.f32 %v2609_v32, %v7714_v26  ;;  %3828 = vmatmul.mubr.bf16.gmra.mxu1 %v3434_v7  ;;  %v2865_v31 = vmin.f32 %v8595_v25, 0.0  ;;  %v8619_v26 = vsel %vm2724_vm2, %v8470_v43, %v5034_v20  ;;  %v2866_v21 = vmin.f32 %v8598_v13, 0.0 }
 0x393   : > { %v3613_v24 = vpop.f32.mrf.mxu0  ;;  %6233 = vpow2.f32 %v4006_v40  ;;  %v8603_v52 = vadd.f32 %v8502_v37, %v3640_v45  ;;  %v3938_v0 = vsub.f32 0.0, %v3874_v3  ;;  %v3436_v34 = vpack.c.bf16 %v8611_v57, %v8619_v26 }
 0x394   : > { %v6218_v22 = vpop.eup %6217  ;;  %6235 = vpow2.f32 %v3110_v59  ;;  %v3642_v60 = vpop.f32.mrf.mxu1  ;;  %v3118_v5 = vmul.f32 1.442695, %v2865_v31  ;;  %v2867_v43 = vmin.f32 %v8606_v12, 0.0  ;;  %v8628_v46 = vadd.f32 %v8502_v37, %v3613_v24 }
 0x395   : > { %v3615_v49 = vpop.f32.mrf.mxu0  ;;  %v6220_v36 = vpop.eup %6219  ;;  %v4126_v50 = vadd.f32 1.0, %v6218_v22  ;;  %6237 = vpow2.f32 %v3112_v53  ;;  %v3875_v7 = vmax.f32 %v8603_v52, -30.0  ;;  %v4008_v8 = vmul.f32 1.442695, %v3938_v0 }
 0x396   : > { %6239 = vpow2.f32 %v3114_v9  ;;  %v3645_v61 = vpop.f32.mrf.mxu1  ;;  %v6222_v23 = vpop.eup %6221  ;;  %v5040_v11 = vadd.f32 -1.0, %v6220_v36  ;;  %v3116_v38 = vmul.f32 1.442695, %v2864_v47  ;;  %v3122_v32 = vmul.f32 1.442695, %v2867_v43 }
 0x397   : > { %v3616_v30 = vpop.f32.mrf.mxu0  ;;  %6241 = vrcp.f32 %v4126_v50  ;;  %v3939_v51 = vsub.f32 0.0, %v3875_v7  ;;  %v3868_v55 = vmax.f32 %v8628_v46, -30.0  ;;  %v3120_v44 = vmul.f32 1.442695, %v2866_v21 }
 0x398   : > { %v6224_v18 = vpop.eup %6223  ;;  %v3647_v20 = vpop.f32.mrf.mxu1  ;;  %6243 = vpow2.f32 %v4008_v8  ;;  %v5035_v53 = vadd.f32 -1.0, %v8580_v35  ;;  %v5037_v24 = vadd.f32 -1.0, %v6216_v4  ;;  %v8636_v9 = vadd.f32 %v8502_v37, %v3645_v61 }
 0x399   : > { %v3618_v10 = vpop.f32.mrf.mxu0  ;;  %v6226_v59 = vpop.eup %6225  ;;  %v4127_v33 = vadd.f32 1.0, %v6224_v18  ;;  %6245 = vpow2.f32 %v3118_v5  ;;  %v4010_v1 = vmul.f32 1.442695, %v3939_v51  ;;  %v3932_v48 = vsub.f32 0.0, %v3868_v55 }
 0x39a   : > { %v6228_v54 = vpop.eup %6227  ;;  %v3648_v40 = vpop.f32.mrf.mxu1  ;;  %v5038_v3 = vadd.f32 -1.0, %v6222_v23  ;;  %v3365_v49 = vsel %vm2725_vm4, %v8479_v19, %v5035_v53  ;;  %v8642_v22 = vadd.f32 %v8502_v37, %v3616_v30  ;;  %v3367_v4 = vsel %vm2727_vm5, %v8493_v29, %v5037_v24 }
 0x39b   : > { %6247 = vrcp.f32 %v4127_v33  ;;  %v3996_v47 = vmul.f32 1.442695, %v3932_v48  ;;  %v3437_v31 = vpack.c.bf16 %v3367_v4, %v3365_v49  ;;  %v3876_v60 = vmax.f32 %v8636_v9, -30.0 }
 0x39c   : > { %v6230_v45 = vpop.eup %6229  ;;  %6249 = vpow2.f32 %v4010_v1  ;;  %v3650_v35 = vpop.f32.mrf.mxu1  ;;  %v3869_v36 = vmax.f32 %v8642_v22, -30.0  ;;  %v8653_v50 = vsel %vm2730_vm6, %v8510_v62, %v5040_v11  ;;  %vm2733_vm11 = vcmp.gt.f32.partialorder %v8551_v56, 0.0 }
 0x39d   : > { %v4128_v57 = vadd.f32 1.0, %v6230_v45  ;;  %6251 = vpow2.f32 %v3122_v32  ;;  %v6232_v26 = vpop.eup %6231  ;;  %vm2735_vm12 = vcmp.gt.f32.partialorder %v8568_v39, 0.0  ;;  %v8658_v29 = vadd.f32 %v8502_v37, %v3648_v40  ;;  %3835 = vmatprep.mubr.bf16.mxu1 %v3437_v31 }
 0x39e   : > { %6253 = vpow2.f32 %v3116_v38  ;;  %v3653_v19 = vpop.f32.mrf.mxu1  ;;  %v5039_v0 = vadd.f32 -1.0, %v6226_v59  ;;  %v3940_v5 = vsub.f32 0.0, %v3876_v60  ;;  %v3933_v21 = vsub.f32 0.0, %v3869_v36  ;;  %3836 = vmatmul.mubr.bf16.gmra.mxu1 %v3436_v34 }
 0x39f   : > { %6255 = vpow2.f32 %v3120_v44  ;;  %v5041_v7 = vadd.f32 -1.0, %v6228_v54  ;;  %v3877_v8 = vmax.f32 %v8658_v29, -30.0  ;;  %v8662_v43 = vadd.f32 %v8502_v37, %v3653_v19 }
 0x3a0   : > { %v6234_v30 = vpop.eup %6233  ;;  %6257 = vpow2.f32 %v3996_v47  ;;  %v3655_v61 = vpop.f32.mrf.mxu1  ;;  %vm2734_vm13 = vcmp.gt.f32.partialorder %v8561_v63, 0.0  ;;  %v4012_v18 = vmul.f32 1.442695, %v3940_v5  ;;  %v3998_v11 = vmul.f32 1.442695, %v3933_v21 }
 0x3a1   : > { %v6236_v23 = vpop.eup %6235  ;;  %6259 = vrcp.f32 %v4128_v57  ;;  %v4129_v62 = vadd.f32 1.0, %v6234_v30  ;;  %v3369_v38 = vsel %vm2729_vm7, %v8517_v27, %v5039_v0  ;;  %v3371_v51 = vsel %vm2731_vm8, %v8524_v42, %v5041_v7 }
 0x3a2   : > { %v6238_v10 = vpop.eup %6237  ;;  %v3656_v20 = vpop.f32.mrf.mxu1  ;;  %v3941_v59 = vsub.f32 0.0, %v3877_v8  ;;  %v3439_v33 = vpack.c.bf16 %v3371_v51, %v3369_v38  ;;  %v3878_v32 = vmax.f32 %v8662_v43, -30.0  ;;  %v3368_v55 = vsel %vm2728_vm9, %v8507_v6, %v5038_v3 }
 0x3a3   : > { %v6240_v34 = vpop.eup %6239  ;;  %6261 = vrcp.f32 %v4129_v62  ;;  %vm2732_vm14 = vcmp.gt.f32.partialorder %v8544_v41, 0.0  ;;  %v8677_v27 = vadd.f32 %v8502_v37, %v3656_v20  ;;  %v5043_v44 = vadd.f32 -1.0, %v6236_v23 }
 0x3a4   : > { %6263 = vpow2.f32 %v4012_v18  ;;  %v3658_v54 = vpop.f32.mrf.mxu1  ;;  %v6242_v42 = vpop.eup %6241  ;;  %v3438_v1 = vpack.c.bf16 %v8653_v50, %v3368_v55  ;;  %v4014_v53 = vmul.f32 1.442695, %v3941_v59  ;;  %3843 = vmatprep.mubr.bf16.mxu1 %v3439_v33  ;;  %v3942_v40 = vsub.f32 0.0, %v3878_v32 }
 0x3a5   : > { %6265 = vpow2.f32 %v3998_v11  ;;  %v6244_v48 = vpop.eup %6243  ;;  %v5042_v24 = vadd.f32 -1.0, %v6232_v26  ;;  %v5044_v45 = vadd.f32 -1.0, %v6238_v10  ;;  %v3879_v6 = vmax.f32 %v8677_v27, -30.0 }
 0x3a6   : > { %v5045_v3 = vadd.f32 -1.0, %v6240_v34  ;;  %v3661_v49 = vpop.f32.mrf.mxu1  ;;  %v6246_v35 = vpop.eup %6245  ;;  %v4130_v57 = vadd.f32 1.0, %v6244_v48  ;;  %6267 = vpow2.f32 %v4014_v53  ;;  %v4016_v47 = vmul.f32 1.442695, %v3942_v40  ;;  %3844 = vmatmul.mubr.bf16.gmra.mxu1 %v3438_v1 }
 0x3a7   : > { %v8682_v4 = vadd.f32 %v8502_v37, %v3661_v49  ;;  %v4257_v60 = vsel %vm4254_vm10, %v6242_v42, %v8513_v28  ;;  %v3943_v36 = vsub.f32 0.0, %v3879_v6  ;;  %v3373_v19 = vsel %vm2733_vm11, %v8551_v56, %v5043_v44 }
 0x3a8   : > { %v6248_v31 = vpop.eup %6247  ;;  %v3375_v26 = vsel %vm2735_vm12, %v8568_v39, %v5045_v3  ;;  %v3663_v50 = vpop.f32.mrf.mxu1  ;;  %6269 = vrcp.f32 %v4130_v57  ;;  %v5047_v61 = vadd.f32 -1.0, %v6246_v35  ;;  %v3374_v62 = vsel %vm2734_vm13, %v8561_v63, %v5044_v45 }
 0x3a9   : > { %v6250_v0 = vpop.eup %6249  ;;  %v4258_v28 = vsel %vm4254_vm10, %v6248_v31, %v8535_v16  ;;  %v3441_v56 = vpack.c.bf16 %v3375_v26, %v3373_v19  ;;  %v3880_v30 = vmax.f32 %v8682_v4, -30.0  ;;  %6271 = vpow2.f32 %v4016_v47 }
 0x3aa   : > { %v6252_v5 = vpop.eup %6251  ;;  %v5205_v39 = vpack.c.bf16 %v4258_v28, %v4257_v60  ;;  %v4131_v21 = vadd.f32 1.0, %v6250_v0  ;;  %v3664_v7 = vpop.f32.mrf.mxu1  ;;  %v4018_v8 = vmul.f32 1.442695, %v3943_v36  ;;  %vm2737_vm15 = vcmp.gt.f32.partialorder %v8595_v25, 0.0 }
 0x3ab   : > { %v6254_v23 = vpop.eup %6253  ;;  %3851 = vmatprep.mubr.bf16.mxu1 %v3441_v56  ;;  %v3944_v16 = vsub.f32 0.0, %v3880_v30  ;;  %v8708_v10 = vadd.f32 %v8502_v37, %v3664_v7  ;;  %vm2739_vm0 = vcmp.gt.f32.partialorder %v8606_v12, 0.0  ;;  %v5049_v38 = vadd.f32 -1.0, %v6252_v5 }
 0x3ac   : > { %v6256_v18 = vpop.eup %6255  ;;  %5357 = vst [vmem:[%s8698_s23 + $0x8] sm:$0xff] %v5205_v39   ;;  %6273 = vrcp.f32 %v4131_v21  ;;  %v3666_v11 = vpop.f32.mrf.mxu1  ;;  %v3372_v63 = vsel %vm2732_vm14, %v8544_v41, %v5042_v24  ;;  %v3377_v55 = vsel %vm2737_vm15, %v8595_v25, %v5047_v61  ;;  %vm2738_vm1 = vcmp.gt.f32.partialorder %v8598_v13, 0.0 }
 0x3ad   : > { %v6258_v51 = vpop.eup %6257  ;;  %6275 = vpow2.f32 %v4018_v8  ;;  %v4020_v20 = vmul.f32 1.442695, %v3944_v16  ;;  %v3881_v34 = vmax.f32 %v8708_v10, -30.0  ;;  %v3440_v33 = vpack.c.bf16 %v3374_v62, %v3372_v63 }
 0x3ae   : > { %v6260_v59 = vpop.eup %6259  ;;  %v4124_v32 = vadd.f32 1.0, %v6258_v51  ;;  %v3379_v54 = vsel %vm2739_vm0, %v8606_v12, %v5049_v38  ;;  %v3669_v44 = vpop.f32.mrf.mxu1  ;;  %v5048_v41 = vadd.f32 -1.0, %v6256_v18  ;;  %v5046_v35 = vadd.f32 -1.0, %v6254_v23 }
 0x3af   : > { %6277 = vpow2.f32 %v4020_v20  ;;  %v3945_v42 = vsub.f32 0.0, %v3881_v34  ;;  %v3443_v1 = vpack.c.bf16 %v3379_v54, %v3377_v55  ;;  %v8720_v53 = vadd.f32 %v8502_v37, %v3669_v44  ;;  %3852 = vmatmul.mubr.bf16.gmra.mxu1 %v3440_v33 }
 0x3b0   : > { %v6262_v40 = vpop.eup %6261  ;;  %v3671_v48 = vpop.f32.mrf.mxu1  ;;  %v4259_v45 = vsel %vm4254_vm10, %v6260_v59, %v8548_v17  ;;  %6279 = vrcp.f32 %v4124_v32  ;;  %vm2736_vm2 = vcmp.gt.f32.partialorder %v8583_v14, 0.0 }
 0x3b1   : > { %v6264_v24 = vpop.eup %6263  ;;  %v4260_v25 = vsel %vm4254_vm10, %v6262_v40, %v8572_v15  ;;  %v4022_v12 = vmul.f32 1.442695, %v3945_v42  ;;  %v3882_v6 = vmax.f32 %v8720_v53, -30.0  ;;  %3859 = vmatprep.mubr.bf16.mxu1 %v3443_v1  ;;  %v3378_v15 = vsel %vm2738_vm1, %v8598_v13, %v5048_v41 }
 0x3b2   : > { %v6266_v3 = vpop.eup %6265  ;;  %v5210_v49 = vpack.c.bf16 %v4260_v25, %v4259_v45  ;;  %v4132_v57 = vadd.f32 1.0, %v6264_v24  ;;  %v3672_v47 = vpop.f32.mrf.mxu1  ;;  %v3376_v56 = vsel %vm2736_vm2, %v8583_v14, %v5046_v35 }
 0x3b3   : > { %v4125_v31 = vadd.f32 1.0, %v6266_v3  ;;  %6281 = vpow2.f32 %v4022_v12  ;;  %v3946_v60 = vsub.f32 0.0, %v3882_v6  ;;  %v8731_v17 = vadd.f32 %v8502_v37, %v3672_v47  ;;  %v6268_v36 = vpop.eup %6267 }
 0x3b4   : > { %5358 = vst [vmem:[%s8698_s23 + $0x10] sm:$0xff] %v5210_v49   ;;  %6283 = vrcp.f32 %v4132_v57  ;;  %v3674_v19 = vpop.f32.mrf.mxu1  ;;  %v4133_v26 = vadd.f32 1.0, %v6268_v36  ;;  %v3442_v39 = vpack.c.bf16 %v3378_v15, %v3376_v56 }
 0x3b5   : > { %6285 = vrcp.f32 %v4125_v31  ;;  %v4024_v50 = vmul.f32 1.442695, %v3946_v60  ;;  %v3883_v0 = vmax.f32 %v8731_v17, -30.0  ;;  %v6270_v28 = vpop.eup %6269 }
 0x3b6   : > { %v3677_v30 = vpop.f32.mrf.mxu1  ;;  %v6272_v5 = vpop.eup %6271  ;;  %6287 = vrcp.f32 %v4133_v26  ;;  %v4261_v14 = vsel %vm4254_vm10, %v6270_v28, %v8592_v2 }
 0x3b7   : > { %v3947_v21 = vsub.f32 0.0, %v3883_v0  ;;  %v8741_v7 = vadd.f32 %v8502_v37, %v3677_v30  ;;  %v4134_v61 = vadd.f32 1.0, %v6272_v5  ;;  %6289 = vpow2.f32 %v4024_v50  ;;  %3860 = vmatmul.mubr.bf16.gmra.mxu1 %v3442_v39 }
 0x3b8   : > { %v3679_v13 = vpop.f32.mrf.mxu1 }
 0x3b9   : > { %v6274_v23 = vpop.eup %6273  ;;  %v4026_v62 = vmul.f32 1.442695, %v3947_v21  ;;  %v3884_v8 = vmax.f32 %v8741_v7, -30.0  ;;  %6291 = vrcp.f32 %v4134_v61 }
 0x3ba   : > { %v6276_v16 = vpop.eup %6275  ;;  %v4262_v18 = vsel %vm4254_vm10, %v6274_v23, %v8603_v52  ;;  %v3680_v11 = vpop.f32.mrf.mxu1 }
 0x3bb   : > { %v5215_v38 = vpack.c.bf16 %v4262_v18, %v4261_v14  ;;  %v4135_v51 = vadd.f32 1.0, %v6276_v16  ;;  %6293 = vpow2.f32 %v4026_v62  ;;  %v3948_v63 = vsub.f32 0.0, %v3884_v8 }
 0x3bc   : > { %v6278_v20 = vpop.eup %6277  ;;  %v8751_v34 = vadd.f32 %v8502_v37, %v3680_v11  ;;  %v3682_v59 = vpop.f32.mrf.mxu1 }
 0x3bd   : > { %5359 = vst [vmem:[%s8698_s23 + $0x18] sm:$0xff] %v5215_v38   ;;  %6295 = vrcp.f32 %v4135_v51  ;;  %v4136_v33 = vadd.f32 1.0, %v6278_v20  ;;  %v4028_v32 = vmul.f32 1.442695, %v3948_v63  ;;  %v6280_v54 = vpop.eup %6279 }
 0x3be   : > { %v3885_v2 = vmax.f32 %v8751_v34, -30.0  ;;  %v3685_v55 = vpop.f32.mrf.mxu1  ;;  %v4255_v45 = vsel %vm4254_vm10, %v6280_v54, %v8628_v46 }
 0x3bf   : > { %v8756_v52 = vadd.f32 %v8502_v37, %v3685_v55  ;;  %6297 = vpow2.f32 %v4028_v32 }
 0x3c0   : > { %v6282_v44 = vpop.eup %6281  ;;  %v3949_v42 = vsub.f32 0.0, %v3885_v2  ;;  %v3687_v1 = vpop.f32.mrf.mxu1  ;;  %6299 = vrcp.f32 %v4136_v33 }
 0x3c1   : > { %v6284_v40 = vpop.eup %6283  ;;  %v4137_v41 = vadd.f32 1.0, %v6282_v44  ;;  %v3886_v48 = vmax.f32 %v8756_v52, -30.0 }
 0x3c2   : > { %v6286_v24 = vpop.eup %6285  ;;  %v4030_v25 = vmul.f32 1.442695, %v3949_v42  ;;  %v3688_v12 = vpop.f32.mrf.mxu1  ;;  %v4263_v46 = vsel %vm4254_vm10, %v6284_v40, %v8636_v9 }
 0x3c3   : > { %v4256_v6 = vsel %vm4254_vm10, %v6286_v24, %v8642_v22  ;;  %6301 = vrcp.f32 %v4137_v41  ;;  %v3950_v3 = vsub.f32 0.0, %v3886_v48  ;;  %v8766_v49 = vadd.f32 %v8502_v37, %v3688_v12  ;;  %v6288_v35 = vpop.eup %6287 }
 0x3c4   : > { %v5200_v57 = vpack.c.bf16 %v4256_v6, %v4255_v45  ;;  %6303 = vpow2.f32 %v4030_v25  ;;  %v3690_v47 = vpop.f32.mrf.mxu1  ;;  %v6290_v31 = vpop.eup %6289  ;;  %v4264_v60 = vsel %vm4254_vm10, %v6288_v35, %v8658_v29 }
 0x3c5   : > { %v4032_v22 = vmul.f32 1.442695, %v3950_v3  ;;  %v3887_v36 = vmax.f32 %v8766_v49, -30.0  ;;  %v5220_v15 = vpack.c.bf16 %v4264_v60, %v4263_v46  ;;  %v4138_v19 = vadd.f32 1.0, %v6290_v31 }
 0x3c6   : > { %5201 = vst [vmem:[%s8698_s23] sm:$0xff] %v5200_v57   ;;  %v3693_v26 = vpop.f32.mrf.mxu1  ;;  %v6292_v50 = vpop.eup %6291 }
 0x3c7   : > { %6305 = vpow2.f32 %v4032_v22  ;;  %v3951_v0 = vsub.f32 0.0, %v3887_v36  ;;  %v8777_v28 = vadd.f32 %v8502_v37, %v3693_v26  ;;  %5360 = vst [vmem:[%s8698_s23 + $0x20] sm:$0xff] %v5220_v15   ;;  %v4265_v21 = vsel %vm4254_vm10, %v6292_v50, %v8662_v43 }
 0x3c8   : > { %v6294_v56 = vpop.eup %6293  ;;  %v3695_v9 = vpop.f32.mrf.mxu1  ;;  %6307 = vrcp.f32 %v4138_v19 }
 0x3c9   : > { %v4139_v30 = vadd.f32 1.0, %v6294_v56  ;;  %v4034_v5 = vmul.f32 1.442695, %v3951_v0  ;;  %v3888_v29 = vmax.f32 %v8777_v28, -30.0 }
 0x3ca   : > { %v6296_v39 = vpop.eup %6295  ;;  %v3696_v61 = vpop.f32.mrf.mxu1 }
 0x3cb   : > { %v4266_v13 = vsel %vm4254_vm10, %v6296_v39, %v8677_v27  ;;  %6309 = vrcp.f32 %v4139_v30  ;;  %v3952_v23 = vsub.f32 0.0, %v3888_v29  ;;  %v8788_v62 = vadd.f32 %v8502_v37, %v3696_v61 }
 0x3cc   : > { %v5225_v8 = vpack.c.bf16 %v4266_v13, %v4265_v21  ;;  %6311 = vpow2.f32 %v4034_v5  ;;  %v3698_v16 = vpop.f32.mrf.mxu1  ;;  %v6298_v14 = vpop.eup %6297 }
 0x3cd   : > { %v4036_v18 = vmul.f32 1.442695, %v3952_v23  ;;  %v3889_v11 = vmax.f32 %v8788_v62, -30.0  ;;  %v6300_v38 = vpop.eup %6299  ;;  %v4140_v43 = vadd.f32 1.0, %v6298_v14 }
 0x3ce   : > { %5361 = vst [vmem:[%s8698_s23 + $0x28] sm:$0xff] %v5225_v8   ;;  %v3701_v51 = vpop.f32.mrf.mxu1  ;;  %v4267_v32 = vsel %vm4254_vm10, %v6300_v38, %v8682_v4 }
 0x3cf   : > { %6313 = vpow2.f32 %v4036_v18  ;;  %v3953_v63 = vsub.f32 0.0, %v3889_v11  ;;  %v8793_v27 = vadd.f32 %v8502_v37, %v3701_v51 }
 0x3d0   : > { %v6302_v20 = vpop.eup %6301  ;;  %v3703_v59 = vpop.f32.mrf.mxu1  ;;  %6315 = vrcp.f32 %v4140_v43 }
 0x3d1   : > { %v6304_v33 = vpop.eup %6303  ;;  %v4268_v2 = vsel %vm4254_vm10, %v6302_v20, %v8708_v10  ;;  %v4038_v55 = vmul.f32 1.442695, %v3953_v63  ;;  %v3890_v54 = vmax.f32 %v8793_v27, -30.0 }
 0x3d2   : > { %v5230_v44 = vpack.c.bf16 %v4268_v2, %v4267_v32  ;;  %v4141_v42 = vadd.f32 1.0, %v6304_v33  ;;  %v3704_v1 = vpop.f32.mrf.mxu1 }
 0x3d3   : > { %6317 = vpow2.f32 %v4038_v55  ;;  %v3954_v40 = vsub.f32 0.0, %v3890_v54  ;;  %v8803_v41 = vadd.f32 %v8502_v37, %v3704_v1 }
 0x3d4   : > { %v6306_v48 = vpop.eup %6305  ;;  %5362 = vst [vmem:[%s8698_s23 + $0x30] sm:$0xff] %v5230_v44   ;;  %6319 = vrcp.f32 %v4141_v42  ;;  %v3706_v4 = vpop.f32.mrf.mxu1 }
 0x3d5   : > { %v4040_v24 = vmul.f32 1.442695, %v3954_v40  ;;  %v3891_v45 = vmax.f32 %v8803_v41, -30.0  ;;  %v6308_v10 = vpop.eup %6307  ;;  %v4142_v25 = vadd.f32 1.0, %v6306_v48 }
 0x3d6   : > { %v3709_v12 = vpop.f32.mrf.mxu1  ;;  %v4269_v31 = vsel %vm4254_vm10, %v6308_v10, %v8720_v53 }
 0x3d7   : > { %v3955_v6 = vsub.f32 0.0, %v3891_v45  ;;  %v8808_v3 = vadd.f32 %v8502_v37, %v3709_v12  ;;  %6321 = vpow2.f32 %v4040_v24 }
 0x3d8   : > { %v6310_v35 = vpop.eup %6309  ;;  %v3711_v57 = vpop.f32.mrf.mxu1  ;;  %6323 = vrcp.f32 %v4142_v25  ;;  %v8850_v25 = vld [vmem:[%s9154_s8] ss:$0 sm:$0xff] }
 0x3d9   : > { %v6312_v47 = vpop.eup %6311  ;;  %v4270_v46 = vsel %vm4254_vm10, %v6310_v35, %v8731_v17  ;;  %v4042_v60 = vmul.f32 1.442695, %v3955_v6  ;;  %v3892_v22 = vmax.f32 %v8808_v3, -30.0 }
 0x3da   : > { %v5235_v36 = vpack.c.bf16 %v4270_v46, %v4269_v31  ;;  %v4143_v15 = vadd.f32 1.0, %v6312_v47  ;;  %v3712_v19 = vpop.f32.mrf.mxu1 }
 0x3db   : > { %6325 = vpow2.f32 %v4042_v60  ;;  %v3956_v26 = vsub.f32 0.0, %v3892_v22  ;;  %v8818_v50 = vadd.f32 %v8502_v37, %v3712_v19 }
 0x3dc   : > { %v6314_v0 = vpop.eup %6313  ;;  %5363 = vst [vmem:[%s8698_s23 + $0x38] sm:$0xff] %v5235_v36   ;;  %6327 = vrcp.f32 %v4143_v15  ;;  %v3714_v53 = vpop.f32.mrf.mxu1 }
 0x3dd   : > { %v4144_v56 = vadd.f32 1.0, %v6314_v0  ;;  %v4044_v9 = vmul.f32 1.442695, %v3956_v26  ;;  %v3893_v17 = vmax.f32 %v8818_v50, -30.0  ;;  %v6316_v5 = vpop.eup %6315 }
 0x3de   : > { %v3717_v30 = vpop.f32.mrf.mxu1  ;;  %v4271_v14 = vsel %vm4254_vm10, %v6316_v5, %v8741_v7 }
 0x3df   : > { %v3957_v29 = vsub.f32 0.0, %v3893_v17  ;;  %v8823_v39 = vadd.f32 %v8502_v37, %v3717_v30  ;;  %6329 = vpow2.f32 %v4044_v9 }
 0x3e0   : > { %v6318_v21 = vpop.eup %6317  ;;  %v3719_v61 = vpop.f32.mrf.mxu1  ;;  %6331 = vrcp.f32 %v4144_v56 }
 0x3e1   : > { %v6320_v13 = vpop.eup %6319  ;;  %v4145_v23 = vadd.f32 1.0, %v6318_v21  ;;  %v4046_v8 = vmul.f32 1.442695, %v3957_v29  ;;  %v3894_v16 = vmax.f32 %v8823_v39, -30.0 }
 0x3e2   : > { %v4272_v18 = vsel %vm4254_vm10, %v6320_v13, %v8751_v34  ;;  %v3720_v11 = vpop.f32.mrf.mxu1 }
 0x3e3   : > { %v5240_v38 = vpack.c.bf16 %v4272_v18, %v4271_v14  ;;  %6333 = vrcp.f32 %v4145_v23  ;;  %v3958_v43 = vsub.f32 0.0, %v3894_v16  ;;  %v8833_v51 = vadd.f32 %v8502_v37, %v3720_v11 }
 0x3e4   : > { %6335 = vpow2.f32 %v4046_v8  ;;  %v3722_v63 = vpop.f32.mrf.mxu1  ;;  %v6322_v20 = vpop.eup %6321 }
 0x3e5   : > { %5364 = vst [vmem:[%s8698_s23 + $0x40] sm:$0xff] %v5240_v38   ;;  %v4048_v59 = vmul.f32 1.442695, %v3958_v43  ;;  %v3895_v33 = vmax.f32 %v8833_v51, -30.0  ;;  %v4146_v32 = vadd.f32 1.0, %v6322_v20  ;;  %v6324_v2 = vpop.eup %6323 }
 0x3e6   : > { %v3725_v7 = vpop.f32.mrf.mxu1  ;;  %v4273_v4 = vsel %vm4254_vm10, %v6324_v2, %v8756_v52 }
 0x3e7   : > { %6337 = vpow2.f32 %v4048_v59  ;;  %v3959_v55 = vsub.f32 0.0, %v3895_v33  ;;  %v8838_v34 = vadd.f32 %v8502_v37, %v3725_v7 }
 0x3e8   : > { %v6326_v54 = vpop.eup %6325  ;;  %v3727_v44 = vpop.f32.mrf.mxu1  ;;  %6339 = vrcp.f32 %v4146_v32 }
 0x3e9   : > { %v6328_v42 = vpop.eup %6327  ;;  %v4147_v1 = vadd.f32 1.0, %v6326_v54  ;;  %v4050_v40 = vmul.f32 1.442695, %v3959_v55  ;;  %v3896_v48 = vmax.f32 %v8838_v34, -30.0 }
 0x3ea   : > { %v4274_v24 = vsel %vm4254_vm10, %v6328_v42, %v8766_v49  ;;  %v3728_v45 = vpop.f32.mrf.mxu1 }
 0x3eb   : > { %v5245_v37 = vpack.c.bf16 %v4274_v24, %v4273_v4  ;;  %6341 = vrcp.f32 %v4147_v1  ;;  %v3960_v10 = vsub.f32 0.0, %v3896_v48  ;;  %v8853_v12 = vadd.f32 %v8850_v25, %v3728_v45 }
 0x3ec   : > { %6343 = vpow2.f32 %v4050_v40  ;;  %v3730_v6 = vpop.f32.mrf.mxu1  ;;  %v6330_v35 = vpop.eup %6329 }
 0x3ed   : > { %5365 = vst [vmem:[%s8698_s23 + $0x48] sm:$0xff] %v5245_v37   ;;  %v4052_v52 = vmul.f32 1.442695, %v3960_v10  ;;  %v3897_v57 = vmax.f32 %v8853_v12, -30.0  ;;  %v6332_v49 = vpop.eup %6331  ;;  %v4148_v47 = vadd.f32 1.0, %v6330_v35 }
 0x3ee   : > { %v3733_v31 = vpop.f32.mrf.mxu1  ;;  %v4275_v19 = vsel %vm4254_vm10, %v6332_v49, %v8777_v28 }
 0x3ef   : > { %6345 = vpow2.f32 %v4052_v52  ;;  %v3961_v46 = vsub.f32 0.0, %v3897_v57  ;;  %v8858_v60 = vadd.f32 %v8850_v25, %v3733_v31 }
 0x3f0   : > { %v6334_v22 = vpop.eup %6333  ;;  %v3735_v36 = vpop.f32.mrf.mxu1  ;;  %6347 = vrcp.f32 %v4148_v47 }
 0x3f1   : > { %v6336_v15 = vpop.eup %6335  ;;  %v4276_v26 = vsel %vm4254_vm10, %v6334_v22, %v8788_v62  ;;  %v4054_v0 = vmul.f32 1.442695, %v3961_v46  ;;  %v3898_v53 = vmax.f32 %v8858_v60, -30.0 }
 0x3f2   : > { %v5250_v56 = vpack.c.bf16 %v4276_v26, %v4275_v19  ;;  %v4149_v9 = vadd.f32 1.0, %v6336_v15  ;;  %v3736_v17 = vpop.f32.mrf.mxu1 }
 0x3f3   : > { %6349 = vpow2.f32 %v4054_v0  ;;  %v3962_v30 = vsub.f32 0.0, %v3898_v53  ;;  %v8868_v5 = vadd.f32 %v8850_v25, %v3736_v17 }
 0x3f4   : > { %v6338_v29 = vpop.eup %6337  ;;  %5366 = vst [vmem:[%s8698_s23 + $0x50] sm:$0xff] %v5250_v56   ;;  %6351 = vrcp.f32 %v4149_v9  ;;  %v3738_v28 = vpop.f32.mrf.mxu1 }
 0x3f5   : > { %v4056_v21 = vmul.f32 1.442695, %v3962_v30  ;;  %v3899_v61 = vmax.f32 %v8868_v5, -30.0  ;;  %v6340_v62 = vpop.eup %6339  ;;  %v4150_v13 = vadd.f32 1.0, %v6338_v29 }
 0x3f6   : > { %v3741_v23 = vpop.f32.mrf.mxu1  ;;  %v4277_v38 = vsel %vm4254_vm10, %v6340_v62, %v8793_v27 }
 0x3f7   : > { %v3963_v8 = vsub.f32 0.0, %v3899_v61  ;;  %v8873_v16 = vadd.f32 %v8850_v25, %v3741_v23  ;;  %6353 = vpow2.f32 %v4056_v21 }
 0x3f8   : > { %v6342_v14 = vpop.eup %6341  ;;  %v3743_v18 = vpop.f32.mrf.mxu1  ;;  %6355 = vrcp.f32 %v4150_v13 }
 0x3f9   : > { %v6344_v11 = vpop.eup %6343  ;;  %v4278_v43 = vsel %vm4254_vm10, %v6342_v14, %v8803_v41  ;;  %v4058_v63 = vmul.f32 1.442695, %v3963_v8  ;;  %v3900_v20 = vmax.f32 %v8873_v16, -30.0 }
 0x3fa   : > { %v5255_v59 = vpack.c.bf16 %v4278_v43, %v4277_v38  ;;  %v4151_v33 = vadd.f32 1.0, %v6344_v11  ;;  %v3744_v32 = vpop.f32.mrf.mxu1 }
 0x3fb   : > { %6357 = vpow2.f32 %v4058_v63  ;;  %v3964_v7 = vsub.f32 0.0, %v3900_v20  ;;  %v8883_v2 = vadd.f32 %v8850_v25, %v3744_v32 }
 0x3fc   : > { %v6346_v55 = vpop.eup %6345  ;;  %5367 = vst [vmem:[%s8698_s23 + $0x58] sm:$0xff] %v5255_v59   ;;  %6359 = vrcp.f32 %v4151_v33  ;;  %v3746_v27 = vpop.f32.mrf.mxu1 }
 0x3fd   : > { %v4152_v54 = vadd.f32 1.0, %v6346_v55  ;;  %v4060_v44 = vmul.f32 1.442695, %v3964_v7  ;;  %v3901_v41 = vmax.f32 %v8883_v2, -30.0  ;;  %v6348_v1 = vpop.eup %6347 }
 0x3fe   : > { %v3749_v42 = vpop.f32.mrf.mxu1  ;;  %v4279_v35 = vsel %vm4254_vm10, %v6348_v1, %v8808_v3 }
 0x3ff   : > { %v3965_v40 = vsub.f32 0.0, %v3901_v41  ;;  %v8888_v48 = vadd.f32 %v8850_v25, %v3749_v42  ;;  %6361 = vpow2.f32 %v4060_v44 }
 0x400   : > { %v6350_v4 = vpop.eup %6349  ;;  %v3751_v24 = vpop.f32.mrf.mxu1  ;;  %6363 = vrcp.f32 %v4152_v54 }
 0x401   : > { %v6352_v45 = vpop.eup %6351  ;;  %v4153_v37 = vadd.f32 1.0, %v6350_v4  ;;  %v4062_v10 = vmul.f32 1.442695, %v3965_v40  ;;  %v3902_v6 = vmax.f32 %v8888_v48, -30.0 }
 0x402   : > { %v4280_v52 = vsel %vm4254_vm10, %v6352_v45, %v8818_v50  ;;  %v3752_v57 = vpop.f32.mrf.mxu1 }
 0x403   : > { %v5260_v49 = vpack.c.bf16 %v4280_v52, %v4279_v35  ;;  %6365 = vrcp.f32 %v4153_v37  ;;  %v3966_v47 = vsub.f32 0.0, %v3902_v6  ;;  %v8898_v31 = vadd.f32 %v8850_v25, %v3752_v57 }
 0x404   : > { %6367 = vpow2.f32 %v4062_v10  ;;  %v3754_v46 = vpop.f32.mrf.mxu1  ;;  %v6354_v22 = vpop.eup %6353 }
 0x405   : > { %5368 = vst [vmem:[%s8698_s23 + $0x60] sm:$0xff] %v5260_v49   ;;  %v4064_v36 = vmul.f32 1.442695, %v3966_v47  ;;  %v3903_v15 = vmax.f32 %v8898_v31, -30.0  ;;  %v4154_v19 = vadd.f32 1.0, %v6354_v22  ;;  %v6356_v26 = vpop.eup %6355 }
 0x406   : > { %v3757_v3 = vpop.f32.mrf.mxu1  ;;  %v4281_v28 = vsel %vm4254_vm10, %v6356_v26, %v8823_v39 }
 0x407   : > { %6369 = vpow2.f32 %v4064_v36  ;;  %v3967_v0 = vsub.f32 0.0, %v3903_v15  ;;  %v8903_v50 = vadd.f32 %v8850_v25, %v3757_v3 }
 0x408   : > { %v6358_v53 = vpop.eup %6357  ;;  %v3759_v56 = vpop.f32.mrf.mxu1  ;;  %6371 = vrcp.f32 %v4154_v19 }
 0x409   : > { %v6360_v9 = vpop.eup %6359  ;;  %v4155_v17 = vadd.f32 1.0, %v6358_v53  ;;  %v4066_v30 = vmul.f32 1.442695, %v3967_v0  ;;  %v3904_v29 = vmax.f32 %v8903_v50, -30.0 }
 0x40a   : > { %v4282_v21 = vsel %vm4254_vm10, %v6360_v9, %v8833_v51  ;;  %v3760_v61 = vpop.f32.mrf.mxu1 }
 0x40b   : > { %v5265_v62 = vpack.c.bf16 %v4282_v21, %v4281_v28  ;;  %6373 = vrcp.f32 %v4155_v17  ;;  %v3968_v13 = vsub.f32 0.0, %v3904_v29  ;;  %v8913_v23 = vadd.f32 %v8850_v25, %v3760_v61 }
 0x40c   : > { %6375 = vpow2.f32 %v4066_v30  ;;  %v3762_v8 = vpop.f32.mrf.mxu1  ;;  %v6362_v14 = vpop.eup %6361 }
 0x40d   : > { %5369 = vst [vmem:[%s8698_s23 + $0x68] sm:$0xff] %v5265_v62   ;;  %v4068_v18 = vmul.f32 1.442695, %v3968_v13  ;;  %v3905_v11 = vmax.f32 %v8913_v23, -30.0  ;;  %v6364_v38 = vpop.eup %6363  ;;  %v4156_v39 = vadd.f32 1.0, %v6362_v14 }
 0x40e   : > { %v3765_v43 = vpop.f32.mrf.mxu1  ;;  %v4283_v32 = vsel %vm4254_vm10, %v6364_v38, %v8838_v34 }
 0x40f   : > { %6377 = vpow2.f32 %v4068_v18  ;;  %v3969_v63 = vsub.f32 0.0, %v3905_v11  ;;  %v8918_v51 = vadd.f32 %v8850_v25, %v3765_v43 }
 0x410   : > { %v6366_v20 = vpop.eup %6365  ;;  %v3767_v59 = vpop.f32.mrf.mxu1  ;;  %6379 = vrcp.f32 %v4156_v39 }
 0x411   : > { %v6368_v33 = vpop.eup %6367  ;;  %v4284_v7 = vsel %vm4254_vm10, %v6366_v20, %v8853_v12  ;;  %v4070_v55 = vmul.f32 1.442695, %v3969_v63  ;;  %v3906_v27 = vmax.f32 %v8918_v51, -30.0 }
 0x412   : > { %v5270_v54 = vpack.c.bf16 %v4284_v7, %v4283_v32  ;;  %v4157_v44 = vadd.f32 1.0, %v6368_v33  ;;  %v3768_v41 = vpop.f32.mrf.mxu1 }
 0x413   : > { %6381 = vpow2.f32 %v4070_v55  ;;  %v3970_v42 = vsub.f32 0.0, %v3906_v27  ;;  %v8928_v1 = vadd.f32 %v8850_v25, %v3768_v41 }
 0x414   : > { %v6370_v40 = vpop.eup %6369  ;;  %5370 = vst [vmem:[%s8698_s23 + $0x70] sm:$0xff] %v5270_v54   ;;  %6383 = vrcp.f32 %v4157_v44  ;;  %v3770_v34 = vpop.f32.mrf.mxu1 }
 0x415   : > { %v4072_v4 = vmul.f32 1.442695, %v3970_v42  ;;  %v3907_v24 = vmax.f32 %v8928_v1, -30.0  ;;  %v6372_v12 = vpop.eup %6371  ;;  %v4158_v45 = vadd.f32 1.0, %v6370_v40 }
 0x416   : > { %v3773_v37 = vpop.f32.mrf.mxu1  ;;  %v4285_v49 = vsel %vm4254_vm10, %v6372_v12, %v8858_v60 }
 0x417   : > { %v3971_v10 = vsub.f32 0.0, %v3907_v24  ;;  %v8933_v6 = vadd.f32 %v8850_v25, %v3773_v37  ;;  %6385 = vpow2.f32 %v4072_v4 }
 0x418   : > { %v6374_v35 = vpop.eup %6373  ;;  %v3775_v52 = vpop.f32.mrf.mxu1  ;;  %6387 = vrcp.f32 %v4158_v45 }
 0x419   : > { %v6376_v57 = vpop.eup %6375  ;;  %v4286_v47 = vsel %vm4254_vm10, %v6374_v35, %v8868_v5  ;;  %v4074_v46 = vmul.f32 1.442695, %v3971_v10  ;;  %v3908_v22 = vmax.f32 %v8933_v6, -30.0 }
 0x41a   : > { %v5275_v36 = vpack.c.bf16 %v4286_v47, %v4285_v49  ;;  %v4159_v15 = vadd.f32 1.0, %v6376_v57  ;;  %v3776_v19 = vpop.f32.mrf.mxu1 }
 0x41b   : > { %6389 = vpow2.f32 %v4074_v46  ;;  %v3972_v3 = vsub.f32 0.0, %v3908_v22  ;;  %v8943_v26 = vadd.f32 %v8850_v25, %v3776_v19 }
 0x41c   : > { %v6378_v0 = vpop.eup %6377  ;;  %5371 = vst [vmem:[%s8698_s23 + $0x78] sm:$0xff] %v5275_v36   ;;  %6391 = vrcp.f32 %v4159_v15  ;;  %v3778_v60 = vpop.f32.mrf.mxu1 }
 0x41d   : > { %v4160_v53 = vadd.f32 1.0, %v6378_v0  ;;  %v4076_v56 = vmul.f32 1.442695, %v3972_v3  ;;  %v3909_v5 = vmax.f32 %v8943_v26, -30.0  ;;  %v6380_v17 = vpop.eup %6379 }
 0x41e   : > { %v3781_v9 = vpop.f32.mrf.mxu1  ;;  %v4287_v14 = vsel %vm4254_vm10, %v6380_v17, %v8873_v16 }
 0x41f   : > { %v3973_v30 = vsub.f32 0.0, %v3909_v5  ;;  %v8948_v29 = vadd.f32 %v8850_v25, %v3781_v9  ;;  %6393 = vpow2.f32 %v4076_v56 }
 0x420   : > { %v6382_v28 = vpop.eup %6381  ;;  %v3783_v21 = vpop.f32.mrf.mxu1  ;;  %6395 = vrcp.f32 %v4160_v53 }
 0x421   : > { %v6384_v61 = vpop.eup %6383  ;;  %v4161_v62 = vadd.f32 1.0, %v6382_v28  ;;  %v4078_v13 = vmul.f32 1.442695, %v3973_v30  ;;  %v3910_v8 = vmax.f32 %v8948_v29, -30.0 }
 0x422   : > { %v4288_v18 = vsel %vm4254_vm10, %v6384_v61, %v8883_v2  ;;  %v3784_v11 = vpop.f32.mrf.mxu1 }
 0x423   : > { %v5280_v38 = vpack.c.bf16 %v4288_v18, %v4287_v14  ;;  %6397 = vrcp.f32 %v4161_v62  ;;  %v3974_v39 = vsub.f32 0.0, %v3910_v8  ;;  %v8958_v43 = vadd.f32 %v8850_v25, %v3784_v11 }
 0x424   : > { %6399 = vpow2.f32 %v4078_v13  ;;  %v3786_v63 = vpop.f32.mrf.mxu1  ;;  %v6386_v20 = vpop.eup %6385 }
 0x425   : > { %5372 = vst [vmem:[%s8698_s23 + $0x80] sm:$0xff] %v5280_v38   ;;  %v4080_v59 = vmul.f32 1.442695, %v3974_v39  ;;  %v3911_v33 = vmax.f32 %v8958_v43, -30.0  ;;  %v4162_v32 = vadd.f32 1.0, %v6386_v20  ;;  %v6388_v7 = vpop.eup %6387 }
 0x426   : > { %v3789_v16 = vpop.f32.mrf.mxu1  ;;  %v4289_v34 = vsel %vm4254_vm10, %v6388_v7, %v8888_v48 }
 0x427   : > { %6401 = vpow2.f32 %v4080_v59  ;;  %v3975_v55 = vsub.f32 0.0, %v3911_v33  ;;  %v8963_v2 = vadd.f32 %v8850_v25, %v3789_v16 }
 0x428   : > { %v6390_v27 = vpop.eup %6389  ;;  %v3791_v54 = vpop.f32.mrf.mxu1  ;;  %6403 = vrcp.f32 %v4162_v32 }
 0x429   : > { %v6392_v44 = vpop.eup %6391  ;;  %v4163_v41 = vadd.f32 1.0, %v6390_v27  ;;  %v4082_v42 = vmul.f32 1.442695, %v3975_v55  ;;  %v3912_v40 = vmax.f32 %v8963_v2, -30.0 }
 0x42a   : > { %v4290_v4 = vsel %vm4254_vm10, %v6392_v44, %v8898_v31  ;;  %v3792_v24 = vpop.f32.mrf.mxu1 }
 0x42b   : > { %v5285_v12 = vpack.c.bf16 %v4290_v4, %v4289_v34  ;;  %6405 = vrcp.f32 %v4163_v41  ;;  %v3976_v45 = vsub.f32 0.0, %v3912_v40  ;;  %v8973_v37 = vadd.f32 %v8850_v25, %v3792_v24 }
 0x42c   : > { %6407 = vpow2.f32 %v4082_v42  ;;  %v3794_v10 = vpop.f32.mrf.mxu1  ;;  %v6394_v35 = vpop.eup %6393 }
 0x42d   : > { %5373 = vst [vmem:[%s8698_s23 + $0x88] sm:$0xff] %v5285_v12   ;;  %v4084_v52 = vmul.f32 1.442695, %v3976_v45  ;;  %v3913_v57 = vmax.f32 %v8973_v37, -30.0  ;;  %v6396_v49 = vpop.eup %6395  ;;  %v4164_v48 = vadd.f32 1.0, %v6394_v35 }
 0x42e   : > { %v3797_v47 = vpop.f32.mrf.mxu1  ;;  %v4291_v19 = vsel %vm4254_vm10, %v6396_v49, %v8903_v50 }
 0x42f   : > { %6409 = vpow2.f32 %v4084_v52  ;;  %v3977_v46 = vsub.f32 0.0, %v3913_v57  ;;  %v8978_v31 = vadd.f32 %v8850_v25, %v3797_v47 }
 0x430   : > { %v6398_v22 = vpop.eup %6397  ;;  %v3799_v36 = vpop.f32.mrf.mxu1  ;;  %6411 = vrcp.f32 %v4164_v48 }
 0x431   : > { %v6400_v15 = vpop.eup %6399  ;;  %v4292_v3 = vsel %vm4254_vm10, %v6398_v22, %v8913_v23  ;;  %v4086_v0 = vmul.f32 1.442695, %v3977_v46  ;;  %v3914_v60 = vmax.f32 %v8978_v31, -30.0 }
 0x432   : > { %v5290_v53 = vpack.c.bf16 %v4292_v3, %v4291_v19  ;;  %v4165_v56 = vadd.f32 1.0, %v6400_v15  ;;  %v3800_v5 = vpop.f32.mrf.mxu1 }
 0x433   : > { %6413 = vpow2.f32 %v4086_v0  ;;  %v3978_v9 = vsub.f32 0.0, %v3914_v60  ;;  %v8988_v17 = vadd.f32 %v8850_v25, %v3800_v5 }
 0x434   : > { %v6402_v30 = vpop.eup %6401  ;;  %5374 = vst [vmem:[%s8698_s23 + $0x90] sm:$0xff] %v5290_v53   ;;  %6415 = vrcp.f32 %v4165_v56  ;;  %v3802_v50 = vpop.f32.mrf.mxu1 }
 0x435   : > { %v4088_v28 = vmul.f32 1.442695, %v3978_v9  ;;  %v3915_v21 = vmax.f32 %v8988_v17, -30.0  ;;  %v6404_v23 = vpop.eup %6403  ;;  %v4166_v61 = vadd.f32 1.0, %v6402_v30 }
 0x436   : > { %v3805_v62 = vpop.f32.mrf.mxu1  ;;  %v4293_v38 = vsel %vm4254_vm10, %v6404_v23, %v8918_v51 }
 0x437   : > { %v3979_v13 = vsub.f32 0.0, %v3915_v21  ;;  %v8993_v8 = vadd.f32 %v8850_v25, %v3805_v62  ;;  %6417 = vpow2.f32 %v4088_v28 }
 0x438   : > { %v6406_v14 = vpop.eup %6405  ;;  %v3807_v18 = vpop.f32.mrf.mxu1  ;;  %6419 = vrcp.f32 %v4166_v61 }
 0x439   : > { %v6408_v11 = vpop.eup %6407  ;;  %v4294_v39 = vsel %vm4254_vm10, %v6406_v14, %v8928_v1  ;;  %v4090_v63 = vmul.f32 1.442695, %v3979_v13  ;;  %v3916_v20 = vmax.f32 %v8993_v8, -30.0 }
 0x43a   : > { %v5295_v59 = vpack.c.bf16 %v4294_v39, %v4293_v38  ;;  %v4167_v33 = vadd.f32 1.0, %v6408_v11  ;;  %v3808_v32 = vpop.f32.mrf.mxu1 }
 0x43b   : > { %6421 = vpow2.f32 %v4090_v63  ;;  %v3980_v16 = vsub.f32 0.0, %v3916_v20  ;;  %v9003_v7 = vadd.f32 %v8850_v25, %v3808_v32 }
 0x43c   : > { %v6410_v55 = vpop.eup %6409  ;;  %5375 = vst [vmem:[%s8698_s23 + $0x98] sm:$0xff] %v5295_v59   ;;  %6423 = vrcp.f32 %v4167_v33  ;;  %v3810_v51 = vpop.f32.mrf.mxu1 }
 0x43d   : > { %v4168_v27 = vadd.f32 1.0, %v6410_v55  ;;  %v4092_v54 = vmul.f32 1.442695, %v3980_v16  ;;  %v3917_v1 = vmax.f32 %v9003_v7, -30.0  ;;  %v6412_v41 = vpop.eup %6411 }
 0x43e   : > { %v3813_v44 = vpop.f32.mrf.mxu1  ;;  %v4295_v35 = vsel %vm4254_vm10, %v6412_v41, %v8933_v6 }
 0x43f   : > { %v3981_v42 = vsub.f32 0.0, %v3917_v1  ;;  %v9008_v40 = vadd.f32 %v8850_v25, %v3813_v44  ;;  %6425 = vpow2.f32 %v4092_v54 }
 0x440   : > { %v6414_v34 = vpop.eup %6413  ;;  %v3815_v4 = vpop.f32.mrf.mxu1  ;;  %6427 = vrcp.f32 %v4168_v27 }
 0x441   : > { %v6416_v24 = vpop.eup %6415  ;;  %v4169_v12 = vadd.f32 1.0, %v6414_v34  ;;  %v4094_v45 = vmul.f32 1.442695, %v3981_v42  ;;  %v3918_v10 = vmax.f32 %v9008_v40, -30.0 }
 0x442   : > { %v4296_v52 = vsel %vm4254_vm10, %v6416_v24, %v8943_v26  ;;  %v3816_v57 = vpop.f32.mrf.mxu1 }
 0x443   : > { %v5300_v49 = vpack.c.bf16 %v4296_v52, %v4295_v35  ;;  %6429 = vrcp.f32 %v4169_v12  ;;  %v3982_v48 = vsub.f32 0.0, %v3918_v10  ;;  %v9018_v47 = vadd.f32 %v8850_v25, %v3816_v57 }
 0x444   : > { %6431 = vpow2.f32 %v4094_v45  ;;  %v3818_v46 = vpop.f32.mrf.mxu1  ;;  %v6418_v22 = vpop.eup %6417 }
 0x445   : > { %5376 = vst [vmem:[%s8698_s23 + $0xa0] sm:$0xff] %v5300_v49   ;;  %v4096_v36 = vmul.f32 1.442695, %v3982_v48  ;;  %v3919_v15 = vmax.f32 %v9018_v47, -30.0  ;;  %v4170_v19 = vadd.f32 1.0, %v6418_v22  ;;  %v6420_v6 = vpop.eup %6419 }
 0x446   : > { %v3821_v0 = vpop.f32.mrf.mxu1  ;;  %v4297_v30 = vsel %vm4254_vm10, %v6420_v6, %v8948_v29 }
 0x447   : > { %6433 = vpow2.f32 %v4096_v36  ;;  %v3983_v3 = vsub.f32 0.0, %v3919_v15  ;;  %v9023_v60 = vadd.f32 %v8850_v25, %v3821_v0 }
 0x448   : > { %v6422_v26 = vpop.eup %6421  ;;  %6435 = vrcp.f32 %v4170_v19  ;;  %v3823_v9 = vpop.f32.mrf.mxu1 }
 0x449   : > { %v6424_v53 = vpop.eup %6423  ;;  %v4171_v56 = vadd.f32 1.0, %v6422_v26  ;;  %v4098_v5 = vmul.f32 1.442695, %v3983_v3  ;;  %v3920_v28 = vmax.f32 %v9023_v60, -30.0 }
 0x44a   : > { %v4298_v50 = vsel %vm4254_vm10, %v6424_v53, %v8958_v43  ;;  %v3824_v23 = vpop.f32.mrf.mxu1 }
 0x44b   : > { %v5305_v21 = vpack.c.bf16 %v4298_v50, %v4297_v30  ;;  %6437 = vrcp.f32 %v4171_v56  ;;  %v3984_v61 = vsub.f32 0.0, %v3920_v28  ;;  %v9033_v62 = vadd.f32 %v8850_v25, %v3824_v23 }
 0x44c   : > { %6439 = vpow2.f32 %v4098_v5  ;;  %v6426_v13 = vpop.eup %6425  ;;  %v3826_v14 = vpop.f32.mrf.mxu1 }
 0x44d   : > { %5377 = vst [vmem:[%s8698_s23 + $0xa8] sm:$0xff] %v5305_v21   ;;  %v6428_v18 = vpop.eup %6427  ;;  %v4172_v29 = vadd.f32 1.0, %v6426_v13  ;;  %v4100_v11 = vmul.f32 1.442695, %v3984_v61  ;;  %v3921_v38 = vmax.f32 %v9033_v62, -30.0 }
 0x44e   : > { %v4299_v20 = vsel %vm4254_vm10, %v6428_v18, %v8963_v2 }
 0x44f   : > { %v3985_v39 = vsub.f32 0.0, %v3921_v38  ;;  %6441 = vpow2.f32 %v4100_v11 }
 0x450   : > { %v6430_v43 = vpop.eup %6429  ;;  %6443 = vrcp.f32 %v4172_v29 }
 0x451   : > { %v6432_v63 = vpop.eup %6431  ;;  %v4300_v59 = vsel %vm4254_vm10, %v6430_v43, %v8973_v37  ;;  %v4102_v16 = vmul.f32 1.442695, %v3985_v39 }
 0x452   : > { %v5310_v33 = vpack.c.bf16 %v4300_v59, %v4299_v20  ;;  %v4173_v32 = vadd.f32 1.0, %v6432_v63  ;;  %v3829_v51 = vpop.f32.mrf.mxu1 }
 0x453   : > { %v9045_v1 = vadd.f32 %v8850_v25, %v3829_v51 }
 0x454   : > { %v6434_v55 = vpop.eup %6433  ;;  %5378 = vst [vmem:[%s8698_s23 + $0xb0] sm:$0xff] %v5310_v33   ;;  %6445 = vrcp.f32 %v4173_v32  ;;  %v3831_v2 = vpop.f32.mrf.mxu1 }
 0x455   : > { %v6436_v27 = vpop.eup %6435  ;;  %v4174_v54 = vadd.f32 1.0, %v6434_v55  ;;  %6447 = vpow2.f32 %v4102_v16  ;;  %v3922_v44 = vmax.f32 %v9045_v1, -30.0 }
 0x456   : > { %v4301_v41 = vsel %vm4254_vm10, %v6436_v27, %v8978_v31  ;;  %v3832_v42 = vpop.f32.mrf.mxu1 }
 0x457   : > { %6449 = vrcp.f32 %v4174_v54  ;;  %v3986_v24 = vsub.f32 0.0, %v3922_v44  ;;  %v9055_v12 = vadd.f32 %v8850_v25, %v3832_v42 }
 0x458   : > { %v6438_v37 = vpop.eup %6437  ;;  %v3834_v35 = vpop.f32.mrf.mxu1 }
 0x459   : > { %v6440_v34 = vpop.eup %6439  ;;  %v4302_v4 = vsel %vm4254_vm10, %v6438_v37, %v8988_v17  ;;  %v4104_v52 = vmul.f32 1.442695, %v3986_v24  ;;  %v3923_v57 = vmax.f32 %v9055_v12, -30.0 }
 0x45a   : > { %v5315_v45 = vpack.c.bf16 %v4302_v4, %v4301_v41  ;;  %v4175_v10 = vadd.f32 1.0, %v6440_v34 }
 0x45b   : > { %v3987_v31 = vsub.f32 0.0, %v3923_v57 }
 0x45c   : > { %5379 = vst [vmem:[%s8698_s23 + $0xb8] sm:$0xff] %v5315_v45   ;;  %6451 = vrcp.f32 %v4175_v10  ;;  %v6442_v49 = vpop.eup %6441 }
 0x45d   : > { %6453 = vpow2.f32 %v4104_v52  ;;  %v6444_v48 = vpop.eup %6443  ;;  %v4176_v46 = vadd.f32 1.0, %v6442_v49  ;;  %v4106_v17 = vmul.f32 1.442695, %v3987_v31 }
 0x45e   : > { %v3837_v36 = vpop.f32.mrf.mxu1  ;;  %v4303_v19 = vsel %vm4254_vm10, %v6444_v48, %v8993_v8 }
 0x45f   : > { %6455 = vpow2.f32 %v4106_v17  ;;  %v9066_v3 = vadd.f32 %v8850_v25, %v3837_v36 }
 0x460   : > { %6457 = vrcp.f32 %v4176_v46  ;;  %v3839_v53 = vpop.f32.mrf.mxu1 }
 0x461   : > { %v6446_v22 = vpop.eup %6445  ;;  %v3924_v56 = vmax.f32 %v9066_v3, -30.0 }
 0x462   : > { %v6448_v15 = vpop.eup %6447  ;;  %v4304_v6 = vsel %vm4254_vm10, %v6446_v22, %v9003_v7  ;;  %v3840_v5 = vpop.f32.mrf.mxu1 }
 0x463   : > { %v5320_v0 = vpack.c.bf16 %v4304_v6, %v4303_v19  ;;  %v4177_v26 = vadd.f32 1.0, %v6448_v15  ;;  %v3988_v30 = vsub.f32 0.0, %v3924_v56  ;;  %v9071_v8 = vadd.f32 %v8850_v25, %v3840_v5 }
 0x464   : > { %v6450_v9 = vpop.eup %6449  ;;  %v3842_v50 = vpop.f32.mrf.mxu1 }
 0x465   : > { %5380 = vst [vmem:[%s8698_s23 + $0xc0] sm:$0xff] %v5320_v0   ;;  %6459 = vrcp.f32 %v4177_v26  ;;  %v4108_v7 = vmul.f32 1.442695, %v3988_v30  ;;  %v3925_v28 = vmax.f32 %v9071_v8, -30.0  ;;  %v4305_v23 = vsel %vm4254_vm10, %v6450_v9, %v9008_v40 }
 0x466   : > { %v3845_v61 = vpop.f32.mrf.mxu1 }
 0x467   : > { %6461 = vpow2.f32 %v4108_v7  ;;  %v3989_v18 = vsub.f32 0.0, %v3925_v28  ;;  %v9081_v29 = vadd.f32 %v8850_v25, %v3845_v61 }
 0x468   : > { %v3847_v38 = vpop.f32.mrf.mxu1 }
 0x469   : > { %v6452_v21 = vpop.eup %6451  ;;  %v4110_v39 = vmul.f32 1.442695, %v3989_v18  ;;  %v3926_v63 = vmax.f32 %v9081_v29, -30.0 }
 0x46a   : > { %v6454_v13 = vpop.eup %6453  ;;  %v4306_v14 = vsel %vm4254_vm10, %v6452_v21, %v9018_v47  ;;  %v3848_v20 = vpop.f32.mrf.mxu1 }
 0x46b   : > { %v5325_v11 = vpack.c.bf16 %v4306_v14, %v4305_v23  ;;  %v4178_v43 = vadd.f32 1.0, %v6454_v13  ;;  %6463 = vpow2.f32 %v4110_v39  ;;  %v3990_v40 = vsub.f32 0.0, %v3926_v63 }
 0x46c   : > { %v9086_v59 = vadd.f32 %v8850_v25, %v3848_v20  ;;  %v6456_v33 = vpop.eup %6455  ;;  %v3850_v47 = vpop.f32.mrf.mxu1 }
 0x46d   : > { %5381 = vst [vmem:[%s8698_s23 + $0xc8] sm:$0xff] %v5325_v11   ;;  %v6458_v32 = vpop.eup %6457  ;;  %6465 = vrcp.f32 %v4178_v43  ;;  %v4179_v16 = vadd.f32 1.0, %v6456_v33  ;;  %v4112_v55 = vmul.f32 1.442695, %v3990_v40 }
 0x46e   : > { %v3927_v51 = vmax.f32 %v9086_v59, -30.0  ;;  %v4307_v37 = vsel %vm4254_vm10, %v6458_v32, %v9023_v60 }
 0x46f   : > { %v3853_v27 = vpop.f32.mrf.mxu1  ;;  %6467 = vrcp.f32 %v4179_v16 }
 0x470   : > { %v3991_v2 = vsub.f32 0.0, %v3927_v51  ;;  %v9090_v44 = vadd.f32 %v8850_v25, %v3853_v27  ;;  %6469 = vpow2.f32 %v4112_v55 }
 0x471   : > { %v3855_v42 = vpop.f32.mrf.mxu1 }
 0x472   : > { %v6460_v54 = vpop.eup %6459  ;;  %v4114_v4 = vmul.f32 1.442695, %v3991_v2  ;;  %v3928_v24 = vmax.f32 %v9090_v44, -30.0 }
 0x473   : > { %v4308_v41 = vsel %vm4254_vm10, %v6460_v54, %v9033_v62  ;;  %v3856_v45 = vpop.f32.mrf.mxu1 }
 0x474   : > { %v5330_v34 = vpack.c.bf16 %v4308_v41, %v4307_v37  ;;  %6471 = vpow2.f32 %v4114_v4  ;;  %v3992_v10 = vsub.f32 0.0, %v3928_v24  ;;  %v9101_v35 = vadd.f32 %v8850_v25, %v3856_v45  ;;  %v6462_v52 = vpop.eup %6461 }
 0x475   : > { %v3858_v57 = vpop.f32.mrf.mxu1  ;;  %v4180_v60 = vadd.f32 1.0, %v6462_v52 }
 0x476   : > { %5382 = vst [vmem:[%s8698_s23 + $0xd0] sm:$0xff] %v5330_v34   ;;  %v4116_v31 = vmul.f32 1.442695, %v3992_v10  ;;  %v3929_v49 = vmax.f32 %v9101_v35, -30.0 }
 0x477   : > { %v3861_v62 = vpop.f32.mrf.mxu1 }
 0x478   : > { %v3993_v48 = vsub.f32 0.0, %v3929_v49  ;;  %v9105_v46 = vadd.f32 %v8850_v25, %v3861_v62  ;;  %v6464_v17 = vpop.eup %6463  ;;  %6473 = vpow2.f32 %v4116_v31 }
 0x479   : > { %v3863_v22 = vpop.f32.mrf.mxu1  ;;  %6475 = vrcp.f32 %v4180_v60  ;;  %v4181_v36 = vadd.f32 1.0, %v6464_v17 }
 0x47a   : > { %v4118_v15 = vmul.f32 1.442695, %v3993_v48  ;;  %v3930_v19 = vmax.f32 %v9105_v46, -30.0  ;;  %v6466_v6 = vpop.eup %6465 }
 0x47b   : > { %v3864_v0 = vpop.f32.mrf.mxu1  ;;  %6477 = vrcp.f32 %v4181_v36  ;;  %v4309_v30 = vsel %vm4254_vm10, %v6466_v6, %v9045_v1 }
 0x47c   : > { %v3994_v26 = vsub.f32 0.0, %v3930_v19  ;;  %v3865_v53 = vadd.f32 %v8850_v25, %v3864_v0  ;;  %v6468_v56 = vpop.eup %6467  ;;  %6479 = vpow2.f32 %v4118_v15 }
 0x47d   : > { %v3866_v5 = vpop.f32.mrf.mxu1  ;;  %v6470_v9 = vpop.eup %6469  ;;  %v4310_v50 = vsel %vm4254_vm10, %v6468_v56, %v9055_v12 }
 0x47e   : > { %v4120_v7 = vmul.f32 1.442695, %v3994_v26  ;;  %v3931_v28 = vmax.f32 %v3865_v53, -30.0  ;;  %v5335_v21 = vpack.c.bf16 %v4310_v50, %v4309_v30  ;;  %v4182_v23 = vadd.f32 1.0, %v6470_v9 }
 0x480   : > { %6481 = vpow2.f32 %v4120_v7  ;;  %v3995_v61 = vsub.f32 0.0, %v3931_v28  ;;  %5383 = vst [vmem:[%s8698_s23 + $0xd8] sm:$0xff] %v5335_v21  }
 0x481   : > { %v6472_v13 = vpop.eup %6471  ;;  %6483 = vrcp.f32 %v4182_v23 }
 0x482   : > { %v4183_v25 = vadd.f32 1.0, %v6472_v13  ;;  %v4122_v14 = vmul.f32 1.442695, %v3995_v61 }
 0x484   : > { %6485 = vrcp.f32 %v4183_v25 }
 0x485   : > { %6487 = vpow2.f32 %v4122_v14  ;;  %v6474_v18 = vpop.eup %6473 }
 0x486   : > { %v6476_v1 = vpop.eup %6475  ;;  %v4184_v11 = vadd.f32 1.0, %v6474_v18 }
 0x487   : > { %v4311_v12 = vsel %vm4254_vm10, %v6476_v1, %v9066_v3 }
 0x488   : > { %v6478_v38 = vpop.eup %6477  ;;  %6489 = vrcp.f32 %v4184_v11 }
 0x489   : > { %v6480_v43 = vpop.eup %6479  ;;  %v4312_v39 = vsel %vm4254_vm10, %v6478_v38, %v9071_v8 }
 0x48a   : > { %v5340_v63 = vpack.c.bf16 %v4312_v39, %v4311_v12  ;;  %v4185_v20 = vadd.f32 1.0, %v6480_v43 }
 0x48c   : > { %5384 = vst [vmem:[%s8698_s23 + $0xe0] sm:$0xff] %v5340_v63   ;;  %6491 = vrcp.f32 %v4185_v20 }
 0x48d   : > { %v6482_v40 = vpop.eup %6481 }
 0x48e   : > { %v6484_v33 = vpop.eup %6483  ;;  %v4186_v47 = vadd.f32 1.0, %v6482_v40 }
 0x48f   : > { %v4313_v3 = vsel %vm4254_vm10, %v6484_v33, %v9081_v29 }
 0x490   : > { %6493 = vrcp.f32 %v4186_v47 }
 0x491   : > { %v6486_v32 = vpop.eup %6485 }
 0x492   : > { %v6488_v16 = vpop.eup %6487  ;;  %v4314_v8 = vsel %vm4254_vm10, %v6486_v32, %v9086_v59 }
 0x493   : > { %v5345_v55 = vpack.c.bf16 %v4314_v8, %v4313_v3  ;;  %v4187_v51 = vadd.f32 1.0, %v6488_v16 }
 0x495   : > { %5385 = vst [vmem:[%s8698_s23 + $0xe8] sm:$0xff] %v5345_v55   ;;  %6495 = vrcp.f32 %v4187_v51  ;;  %v6490_v27 = vpop.eup %6489 }
 0x496   : > { %v4315_v2 = vsel %vm4254_vm10, %v6490_v27, %v9090_v44 }
 0x499   : > { %v6492_v54 = vpop.eup %6491 }
 0x49a   : > { %v4316_v29 = vsel %vm4254_vm10, %v6492_v54, %v9101_v35 }
 0x49b   : > { %v5350_v37 = vpack.c.bf16 %v4316_v29, %v4315_v2 }
 0x49d   : > { %5386 = vst [vmem:[%s8698_s23 + $0xf0] sm:$0xff] %v5350_v37   ;;  %v6494_v41 = vpop.eup %6493 }
 0x49e   : > { %v4317_v42 = vsel %vm4254_vm10, %v6494_v41, %v9105_v46 }
 0x4a2   : > { %v6496_v59 = vpop.eup %6495 }
 0x4a3   : > { %v4318_v34 = vsel %vm4254_vm10, %v6496_v59, %v3865_v53 }
 0x4a4   : > { %v5355_v4 = vpack.c.bf16 %v4318_v34, %v4317_v42 }
 0x4a6   : > { %5387 = vst [vmem:[%s8698_s23 + $0xf8] sm:$0xff] %v5355_v4  }
 0x4a7 PF: > { %s19_s30 = sadd.s32 1, %s6506_s30  }
 0x4a8   : > { %p16_p4 = scmp.ge.s32.totalorder %s19_s30, 4  }
 0x4aa   :  { %18 = sbr.rel (!%p16_p4) target bundleno = 1 (0x1), region = 86 }

</bundles_post_ra>
